<compile_context>
chip_gen: v7x
topology: tpu7x:2x2x1
jax: 0.10.0
libtpu: 0.0.40
codegen_flags: <defaults>
</compile_context>

<pallas_src>
import jax
import jax.numpy as jnp
from jax.experimental import pallas as pl
from jax.experimental.pallas import tpu as pltpu


# ----------------------------------------------------------------------------
# Fused kernel:
#   h1     = relu(x @ W1 + b1)
#   h2     = relu(h1 @ W2 + b2)
#   y_tile = sigmoid(h2 @ W3[:, tile] + b3[tile])
# W3 / b3 / output are (optionally) tiled over the large output dim; everything
# else is the full (tiny) array every step.
# ----------------------------------------------------------------------------
def _baseline_kernel(x_ref, w1_ref, b1_ref, w2_ref, b2_ref, w3_ref, b3_ref, y_ref):
    h1 = jnp.dot(x_ref[...], w1_ref[...], preferred_element_type=jnp.float32)
    h1 = jnp.maximum(h1 + b1_ref[...], 0.0)
    h2 = jnp.dot(h1, w2_ref[...], preferred_element_type=jnp.float32)
    h2 = jnp.maximum(h2 + b2_ref[...], 0.0)
    # fc3: cast activations to W3's storage dtype (f32 default, bf16 opt-in),
    # accumulate in f32, bias-add + sigmoid in f32.
    logits = jnp.dot(h2.astype(w3_ref.dtype), w3_ref[...],
                     preferred_element_type=jnp.float32)
    y_ref[...] = jax.nn.sigmoid(logits + b3_ref[...].astype(jnp.float32))


def _num_tensorcores_per_chip():
    """2 on v7x (megacore split worth it), 1 otherwise / unknown (always safe)."""
    try:
        kind = jax.devices()[0].device_kind.lower()
    except Exception:
        return 1
    return 2 if ("v7" in kind or "7x" in kind) else 1


def _choose_fc3_grid(n_out):
    # v5e / v6e: single TC -> one grid step, whole-array blocks (W3 f32 is
    # ~1.6 MB, far under every generation's scoped-VMEM default even with
    # double buffering).
    # v7x: split the output dim across the 2 TensorCores, but only if the tile
    # stays 128-lane aligned; otherwise fall back to the always-valid 1-step
    # full-extent block.
    if _num_tensorcores_per_chip() == 2 and n_out % (2 * 128) == 0:
        return 2
    return 1


def baseline_net_forward(x, params, *, w3_bf16=False):
    input_size = x.shape[-1]
    x_row = x.astype(jnp.float32).reshape(1, input_size)          # x.float()

    w1, b1 = params["w1"], params["b1"]
    w2, b2 = params["w2"], params["b2"]
    w3, b3 = params["w3"], params["b3"]
    if w3_bf16:
        # Opt-in bandwidth/accuracy trade: halves the dominant W3 HBM read.
        w3 = w3.astype(jnp.bfloat16)

    in_f, h1_dim = w1.shape
    h2_dim = w2.shape[1]
    n_out = w3.shape[1]

    grid_n = _choose_fc3_grid(n_out)
    tn = n_out // grid_n

    y_flat = pl.pallas_call(
        _baseline_kernel,
        out_shape=jax.ShapeDtypeStruct((1, n_out), jnp.float32),
        grid=(grid_n,),
        in_specs=[
            pl.BlockSpec((1, in_f), lambda j: (0, 0)),
            pl.BlockSpec((in_f, h1_dim), lambda j: (0, 0)),
            pl.BlockSpec((1, h1_dim), lambda j: (0, 0)),
            pl.BlockSpec((h1_dim, h2_dim), lambda j: (0, 0)),
            pl.BlockSpec((1, h2_dim), lambda j: (0, 0)),
            pl.BlockSpec((h2_dim, tn), lambda j: (0, j)),
            pl.BlockSpec((1, tn), lambda j: (0, j)),
        ],
        out_specs=pl.BlockSpec((1, tn), lambda j: (0, j)),
        compiler_params=pltpu.CompilerParams(
            dimension_semantics=("parallel",)),
    )(x_row, w1, b1, w2, b2, w3, b3)

    # y.view(input_size, 1, 28, 28) -- done in plain JAX (lane-dense kernel
    # output; consumers that only need the flat result can use y_flat directly).
    return y_flat.reshape(input_size, 1, 28, 28)


# ----------------------------------------------------------------------------
# Parameter construction (PyTorch nn.Linear default init: U(-1/sqrt(fan_in), ..))
# ----------------------------------------------------------------------------
def init_params(key, input_size, hidden_1, hidden_2):
    out3 = input_size * 28 * 28
    dims = [(input_size, hidden_1), (hidden_1, hidden_2), (hidden_2, out3)]
    params = {}
    for idx, (fan_in, fan_out) in enumerate(dims, start=1):
        key, kw, kb = jax.random.split(key, 3)
        bound = 1.0 / (fan_in ** 0.5)
        params[f"w{idx}"] = jax.random.uniform(
            kw, (fan_in, fan_out), jnp.float32, minval=-bound, maxval=bound)
        params[f"b{idx}"] = jax.random.uniform(
            kb, (1, fan_out), jnp.float32, minval=-bound, maxval=bound)
    return params


def baseline_net_reference(x, params):
    x_row = x.astype(jnp.float32).reshape(1, -1)
    h1 = jnp.maximum(x_row @ params["w1"] + params["b1"], 0.0)
    h2 = jnp.maximum(h1 @ params["w2"] + params["b2"], 0.0)
    y = jax.nn.sigmoid(h2 @ params["w3"] + params["b3"])
    return y.reshape(x_row.shape[1], 1, 28, 28)


if __name__ == "__main__":
    # The PyTorch forward dynamically rebuilds the layers for the observed
    # input_size; here we simply construct params at that size.
    # TODO(synk): dynamic layer re-instantiation itself has no kernel equivalent.
    input_size = 16
    hidden_1 = 32
    hidden_2 = 32

    key = jax.random.PRNGKey(0)
    key, kx = jax.random.split(key)
    x = jax.random.normal(kx, (input_size,), jnp.float32)

    params = init_params(key, input_size, hidden_1, hidden_2)
    y_ref = baseline_net_reference(x, params)

    # Default path: exact f32 semantics of the module.
    y = jax.block_until_ready(baseline_net_forward(x, params))
    assert y.shape == (input_size, 1, 28, 28), y.shape
    assert jnp.allclose(y, y_ref, atol=1e-5, rtol=1e-5)

    # Opt-in bf16-W3 path (halves the dominant HBM read; ~1e-3 pre-sigmoid error).
    y_bf16 = jax.block_until_ready(baseline_net_forward(x, params, w3_bf16=True))
    assert y_bf16.shape == (input_size, 1, 28, 28), y_bf16.shape
    assert jnp.allclose(y_bf16, y_ref, atol=5e-3, rtol=5e-3)

    print("KERNEL_OK")
</pallas_src>

<mosaic_0001>
module attributes {stable_mosaic.version = 11 : i64} {
  func.func @_baseline_kernel(%arg0: i32, %arg1: memref<1x16xf32, #tpu.memory_space<vmem>>, %arg2: memref<16x32xf32, #tpu.memory_space<vmem>>, %arg3: memref<1x32xf32, #tpu.memory_space<vmem>>, %arg4: memref<32x32xf32, #tpu.memory_space<vmem>>, %arg5: memref<1x32xf32, #tpu.memory_space<vmem>>, %arg6: memref<32x12544xf32, #tpu.memory_space<vmem>>, %arg7: memref<1x12544xf32, #tpu.memory_space<vmem>>, %arg8: memref<1x12544xf32, #tpu.memory_space<vmem>>) attributes {dimension_semantics = [#tpu.dimension_semantics<parallel>], iteration_bounds = array<i64: 1>, scalar_prefetch = 0 : i64, scratch_operands = 0 : i64, tpu.core_type = #tpu.core_type<tc>, window_params = [{pipeline_mode = #tpu.pipeline_mode<synchronous>, transform_indices = @transform_0, window_bounds = array<i64: 1, 16>}, {pipeline_mode = #tpu.pipeline_mode<synchronous>, transform_indices = @transform_1, window_bounds = array<i64: 16, 32>}, {pipeline_mode = #tpu.pipeline_mode<synchronous>, transform_indices = @transform_2, window_bounds = array<i64: 1, 32>}, {pipeline_mode = #tpu.pipeline_mode<synchronous>, transform_indices = @transform_3, window_bounds = array<i64: 32, 32>}, {pipeline_mode = #tpu.pipeline_mode<synchronous>, transform_indices = @transform_4, window_bounds = array<i64: 1, 32>}, {transform_indices = @transform_5, window_bounds = array<i64: 32, 12544>}, {transform_indices = @transform_6, window_bounds = array<i64: 1, 12544>}, {transform_indices = @transform_7, window_bounds = array<i64: 1, 12544>}]} {
    %c0 = arith.constant 0 : index
    %c0_0 = arith.constant 0 : index
    %0 = vector.load %arg1[%c0, %c0_0] : memref<1x16xf32, #tpu.memory_space<vmem>>, vector<1x16xf32>
    %c0_1 = arith.constant 0 : index
    %c0_2 = arith.constant 0 : index
    %1 = vector.load %arg2[%c0_1, %c0_2] : memref<16x32xf32, #tpu.memory_space<vmem>>, vector<16x32xf32>
    %cst = arith.constant dense<0.000000e+00> : vector<1x32xf32>
    %2 = tpu.matmul %0, %1, %cst {dimension_numbers = #tpu.dot_dimension_numbers<[1], [0], [0], [1], [0, 0, 1, 1], [], []>} : vector<1x16xf32>, vector<16x32xf32>, vector<1x32xf32> -> vector<1x32xf32>
    %c0_3 = arith.constant 0 : index
    %c0_4 = arith.constant 0 : index
    %3 = vector.load %arg3[%c0_3, %c0_4] : memref<1x32xf32, #tpu.memory_space<vmem>>, vector<1x32xf32>
    %4 = arith.addf %2, %3 : vector<1x32xf32>
    %cst_5 = arith.constant 0.000000e+00 : f32
    %5 = vector.broadcast %cst_5 : f32 to vector<1x32xf32>
    %6 = arith.maximumf %4, %5 : vector<1x32xf32>
    %c0_6 = arith.constant 0 : index
    %c0_7 = arith.constant 0 : index
    %7 = vector.load %arg4[%c0_6, %c0_7] : memref<32x32xf32, #tpu.memory_space<vmem>>, vector<32x32xf32>
    %cst_8 = arith.constant dense<0.000000e+00> : vector<1x32xf32>
    %8 = tpu.matmul %6, %7, %cst_8 {dimension_numbers = #tpu.dot_dimension_numbers<[1], [0], [0], [1], [0, 0, 1, 1], [], []>} : vector<1x32xf32>, vector<32x32xf32>, vector<1x32xf32> -> vector<1x32xf32>
    %c0_9 = arith.constant 0 : index
    %c0_10 = arith.constant 0 : index
    %9 = vector.load %arg5[%c0_9, %c0_10] : memref<1x32xf32, #tpu.memory_space<vmem>>, vector<1x32xf32>
    %10 = arith.addf %8, %9 : vector<1x32xf32>
    %cst_11 = arith.constant 0.000000e+00 : f32
    %11 = vector.broadcast %cst_11 : f32 to vector<1x32xf32>
    %12 = arith.maximumf %10, %11 : vector<1x32xf32>
    %c0_12 = arith.constant 0 : index
    %c0_13 = arith.constant 0 : index
    %13 = vector.load %arg6[%c0_12, %c0_13] : memref<32x12544xf32, #tpu.memory_space<vmem>>, vector<32x12544xf32>
    %cst_14 = arith.constant dense<0.000000e+00> : vector<1x12544xf32>
    %14 = tpu.matmul %12, %13, %cst_14 {dimension_numbers = #tpu.dot_dimension_numbers<[1], [0], [0], [1], [0, 0, 1, 1], [], []>} : vector<1x32xf32>, vector<32x12544xf32>, vector<1x12544xf32> -> vector<1x12544xf32>
    %c0_15 = arith.constant 0 : index
    %c0_16 = arith.constant 0 : index
    %15 = vector.load %arg7[%c0_15, %c0_16] : memref<1x12544xf32, #tpu.memory_space<vmem>>, vector<1x12544xf32>
    %16 = arith.addf %14, %15 : vector<1x12544xf32>
    %17 = arith.negf %16 : vector<1x12544xf32>
    %18 = math.exp %17 : vector<1x12544xf32>
    %cst_17 = arith.constant 1.000000e+00 : f32
    %19 = vector.broadcast %cst_17 : f32 to vector<1x12544xf32>
    %20 = arith.addf %19, %18 : vector<1x12544xf32>
    %21 = arith.divf %19, %20 : vector<1x12544xf32>
    %c0_18 = arith.constant 0 : index
    %c0_19 = arith.constant 0 : index
    %22 = vector.load %arg8[%c0_18, %c0_19] : memref<1x12544xf32, #tpu.memory_space<vmem>>, vector<1x12544xf32>
    tpu.vector_store %arg8[%c0_18, %c0_19], %21 {strides = array<i32>} : memref<1x12544xf32, #tpu.memory_space<vmem>>, vector<1x12544xf32>,
    return
  }
  func.func @transform_0(%arg0: i32) -> (i32, i32) {
    %c0_i32 = arith.constant 0 : i32
    %c0_i32_0 = arith.constant 0 : i32
    %c0_i32_1 = arith.constant 0 : i32
    return %c0_i32, %c0_i32_0 : i32, i32
  }
  func.func @transform_1(%arg0: i32) -> (i32, i32) {
    %c0_i32 = arith.constant 0 : i32
    %c0_i32_0 = arith.constant 0 : i32
    %c0_i32_1 = arith.constant 0 : i32
    return %c0_i32, %c0_i32_0 : i32, i32
  }
  func.func @transform_2(%arg0: i32) -> (i32, i32) {
    %c0_i32 = arith.constant 0 : i32
    %c0_i32_0 = arith.constant 0 : i32
    %c0_i32_1 = arith.constant 0 : i32
    return %c0_i32, %c0_i32_0 : i32, i32
  }
  func.func @transform_3(%arg0: i32) -> (i32, i32) {
    %c0_i32 = arith.constant 0 : i32
    %c0_i32_0 = arith.constant 0 : i32
    %c0_i32_1 = arith.constant 0 : i32
    return %c0_i32, %c0_i32_0 : i32, i32
  }
  func.func @transform_4(%arg0: i32) -> (i32, i32) {
    %c0_i32 = arith.constant 0 : i32
    %c0_i32_0 = arith.constant 0 : i32
    %c0_i32_1 = arith.constant 0 : i32
    return %c0_i32, %c0_i32_0 : i32, i32
  }
  func.func @transform_5(%arg0: i32) -> (i32, i32) {
    %c0_i32 = arith.constant 0 : i32
    %c0_i32_0 = arith.constant 0 : i32
    return %c0_i32, %arg0 : i32, i32
  }
  func.func @transform_6(%arg0: i32) -> (i32, i32) {
    %c0_i32 = arith.constant 0 : i32
    %c0_i32_0 = arith.constant 0 : i32
    return %c0_i32, %arg0 : i32, i32
  }
  func.func @transform_7(%arg0: i32) -> (i32, i32) {
    %c0_i32 = arith.constant 0 : i32
    %c0_i32_0 = arith.constant 0 : i32
    return %c0_i32, %arg0 : i32, i32
  }
}

</mosaic_0001>

<bundles_post_ra>
// kernel: tpu_custom_call.1
= control target key start
LH: loop header
LB: loop body
LE: loop exit
PB: predicated region body
PF: predicated region fallthrough
CT: control target
= control target key end

     0   :  { %12 = vsyncpa [#allocation3], 0  ;;  %s7823_s0 = inlined_call_operand.hbm [shape: f32[1,16], index: 0, kind: input, shape index: {}]   ;;  %s7824_s1 = inlined_call_operand.hbm [shape: f32[16,32], index: 1, kind: input, shape index: {}]   ;;  %s7825_s2 = inlined_call_operand.hbm [shape: f32[1,32], index: 2, kind: input, shape index: {}]   ;;  %s7826_s3 = inlined_call_operand.hbm [shape: f32[32,32], index: 3, kind: input, shape index: {}]   ;;  %s7827_s4 = inlined_call_operand.hbm [shape: f32[1,32], index: 4, kind: input, shape index: {}]   ;;  %s7828_s5 = inlined_call_operand.hbm [shape: f32[32,12544], index: 5, kind: input, shape index: {}]   ;;  %s7829_s6 = inlined_call_operand.hbm [shape: f32[1,12544], index: 6, kind: input, shape index: {}]   ;;  %s7830_s7 = inlined_call_operand.hbm [shape: f32[1,12544], index: 7, kind: output, shape index: {}]  }
   0x1   :  { %13 = vsyncpa [#allocation6], 0 }
   0x2   :  { %14 = vsyncpa [#allocation9], 0 }
   0x3   :  { %15 = vsyncpa [#allocation12], 0 }
   0x4   :  { %16 = vsyncpa [#allocation4], 0  ;;  %s7170_s24 = smov [#allocation5]   ;;  %s6984_s28 = scalar_lea.hbm %s7824_s1, 256 }
   0x5   :  { %s32_s25 = sshll.u32 %s7170_s24, 4  ;;  %p6985_p0 = scmp.ne.s32.totalorder %s7824_s1, %s6984_s28  ;;  %s33_s25 = int_to_ptr.vmem [resolvable:$true] %s32_s25 }
   0x6   :  { %p6988_p1 = scmp.lt.u32.totalorder %s6984_s28, %s7824_s1 }
   0x8   :  { %p6990_p2 = pnand %p6988_p1, %p6985_p0 }
   0xa   :  { %6993 = shalt.err (!%p6990_p2)
}
   0xb   :  { %s6994_s10 = scalar_lea.vmem %s33_s25, 256  ;;  %p6999_p4 = scmp.lt.s32.totalorder %s33_s25, %s33_s25 }
   0xc   :  { %p6995_p3 = scmp.ne.s32.totalorder %s33_s25, %s6994_s10  ;;  %p7000_p5 = scmp.lt.s32.totalorder %s6994_s10, %s6994_s10 }
   0xe   :  { %p7001_p6 = por %p7000_p5, %p6999_p4 }
  0x10   :  { %p7002_p7 = pnand %p7001_p6, %p6995_p3 }
  0x12   :  { %7005 = shalt.err (!%p7002_p7)
}
  0x13   :  { %s7171_s11 = smov 128   ;;  %s7172_s12 = smov 8  }
  0x14   :  { %38 = dma.hbm_to_vmem [thread:$0]  %s7824_s1, 256, %s33_s25, [#allocation6], %s7171_s11, %s7171_s11, %s7172_s12  }
  0x15   :  { %s7173_s15 = smov [#allocation8]   ;;  %s7174_s17 = smov [#allocation11]  }
  0x16   :  { %s54_s16 = sshll.u32 %s7173_s15, 4  ;;  %s76_s18 = sshll.u32 %s7174_s17, 4  ;;  %s55_s16 = int_to_ptr.vmem [resolvable:$true] %s54_s16  ;;  %s77_s18 = int_to_ptr.vmem [resolvable:$true] %s76_s18 }
  0x17   :  { %s7006_s21 = scalar_lea.hbm %s7826_s3, 512 }
  0x18   :  { %p7007_p8 = scmp.ne.s32.totalorder %s7826_s3, %s7006_s21  ;;  %p7010_p9 = scmp.lt.u32.totalorder %s7006_s21, %s7826_s3 }
  0x1a   :  { %p7012_p10 = pnand %p7010_p9, %p7007_p8 }
  0x1c   :  { %7015 = shalt.err (!%p7012_p10)
}
  0x1d   :  { %s7016_s1 = scalar_lea.vmem %s55_s16, 512  ;;  %p7021_p12 = scmp.lt.s32.totalorder %s55_s16, %s55_s16 }
  0x1e   :  { %p7017_p11 = scmp.ne.s32.totalorder %s55_s16, %s7016_s1  ;;  %p7022_p13 = scmp.lt.s32.totalorder %s7016_s1, %s7016_s1 }
  0x20   :  { %p7023_p0 = por %p7022_p13, %p7021_p12 }
  0x22   :  { %p7024_p1 = pnand %p7023_p0, %p7017_p11 }
  0x24   :  { %7027 = shalt.err (!%p7024_p1)
}
  0x25   :  { %60 = dma.hbm_to_vmem [thread:$0]  %s7826_s3, 512, %s55_s16, [#allocation9], %s7171_s11, %s7171_s11, %s7172_s12  }
  0x26   :  { %s7028_s30 = scalar_lea.hbm %s7828_s5, 50176 }
  0x27   :  { %p7029_p2 = scmp.ne.s32.totalorder %s7828_s5, %s7028_s30  ;;  %p7032_p3 = scmp.lt.u32.totalorder %s7028_s30, %s7828_s5 }
  0x29   :  { %p7034_p4 = pnand %p7032_p3, %p7029_p2 }
  0x2b   :  { %7037 = shalt.err (!%p7034_p4)
}
  0x2c   :  { %s7038_s14 = scalar_lea.vmem %s77_s18, 50176  ;;  %p7043_p6 = scmp.lt.s32.totalorder %s77_s18, %s77_s18 }
  0x2d   :  { %p7039_p5 = scmp.ne.s32.totalorder %s77_s18, %s7038_s14  ;;  %p7044_p7 = scmp.lt.s32.totalorder %s7038_s14, %s7038_s14 }
  0x2f   :  { %p7045_p8 = por %p7044_p7, %p7043_p6 }
  0x31   :  { %p7046_p9 = pnand %p7045_p8, %p7039_p5 }
  0x33   :  { %7049 = shalt.err (!%p7046_p9)
}
  0x34   :  { %s7175_s3 = smov 12544   ;;  %s7176_s11 = smov 784  }
  0x35   :  { %82 = dma.hbm_to_vmem [thread:$0]  %s7828_s5, 50176, %s77_s18, [#allocation12], %s7175_s3, %s7175_s3, %s7176_s11  }
  0x36   :  { %s7177_s16 = smov [#allocation2]   ;;  %s7178_s19 = smov [#allocation7]  }
  0x37   :  { %s23_s17 = sshll.u32 %s7177_s16, 4  ;;  %s45_s20 = sshll.u32 %s7178_s19, 4  ;;  %s24_s17 = int_to_ptr.vmem [resolvable:$true] %s23_s17  ;;  %s46_s20 = int_to_ptr.vmem [resolvable:$true] %s45_s20 }
  0x38   :  { %s7050_s23 = scalar_lea.hbm %s7823_s0, 16 }
  0x39   :  { %p7051_p10 = scmp.ne.s32.totalorder %s7823_s0, %s7050_s23  ;;  %p7054_p11 = scmp.lt.u32.totalorder %s7050_s23, %s7823_s0 }
  0x3b   :  { %p7056_p12 = pnand %p7054_p11, %p7051_p10 }
  0x3d   :  { %7059 = shalt.err (!%p7056_p12)
}
  0x3e   :  { %s7060_s5 = scalar_lea.vmem %s24_s17, 16  ;;  %s7064_s18 = scalar_lea.vmem %s24_s17, 32 }
  0x3f   :  { %p7061_p13 = scmp.ne.s32.totalorder %s24_s17, %s7060_s5  ;;  %p7065_p0 = scmp.lt.s32.totalorder %s24_s17, %s24_s17 }
  0x40   :  { %p7066_p1 = scmp.lt.s32.totalorder %s7064_s18, %s7060_s5 }
  0x42   :  { %p7067_p2 = por %p7066_p1, %p7065_p0 }
  0x44   :  { %p7068_p3 = pnand %p7067_p2, %p7061_p13 }
  0x46   :  { %7071 = shalt.err (!%p7068_p3)
}
  0x47   :  { %26 = dma.hbm_to_vmem [thread:$0]  %s7823_s0, 16, %s24_s17, [#allocation3]  }
  0x48   :  { %s7072_s8 = scalar_lea.hbm %s7825_s2, 16 }
  0x49   :  { %p7073_p4 = scmp.ne.s32.totalorder %s7825_s2, %s7072_s8  ;;  %p7076_p5 = scmp.lt.u32.totalorder %s7072_s8, %s7825_s2 }
  0x4b   :  { %p7078_p6 = pnand %p7076_p5, %p7073_p4 }
  0x4d   :  { %7081 = shalt.err (!%p7078_p6)
}
  0x4e   :  { %s7082_s3 = scalar_lea.vmem %s46_s20, 16  ;;  %s7086_s11 = scalar_lea.vmem %s46_s20, 32 }
  0x4f   :  { %p7083_p7 = scmp.ne.s32.totalorder %s46_s20, %s7082_s3  ;;  %p7087_p8 = scmp.lt.s32.totalorder %s46_s20, %s46_s20 }
  0x50   :  { %p7088_p9 = scmp.lt.s32.totalorder %s7086_s11, %s7082_s3 }
  0x52   :  { %p7089_p10 = por %p7088_p9, %p7087_p8 }
  0x54   :  { %p7090_p11 = pnand %p7089_p10, %p7083_p7 }
  0x56   :  { %7093 = shalt.err (!%p7090_p11)
}
  0x57   :  { %48 = dma.hbm_to_vmem [thread:$0]  %s7825_s2, 16, %s46_s20, [#allocation6]  }
  0x58   :  { %s7179_s15 = smov [#allocation10]   ;;  %s7180_s17 = smov [#allocation13]  }
  0x59   :  { %s67_s16 = sshll.u32 %s7179_s15, 4  ;;  %s89_s19 = sshll.u32 %s7180_s17, 4  ;;  %s68_s16 = int_to_ptr.vmem [resolvable:$true] %s67_s16  ;;  %s90_s19 = int_to_ptr.vmem [resolvable:$true] %s89_s19 }
  0x5a   :  { %s7094_s23 = scalar_lea.hbm %s7827_s4, 16 }
  0x5b   :  { %p7095_p12 = scmp.ne.s32.totalorder %s7827_s4, %s7094_s23  ;;  %p7098_p13 = scmp.lt.u32.totalorder %s7094_s23, %s7827_s4 }
  0x5d   :  { %p7100_p0 = pnand %p7098_p13, %p7095_p12 }
  0x5f   :  { %7103 = shalt.err (!%p7100_p0)
}
  0x60   :  { %s7104_s2 = scalar_lea.vmem %s68_s16, 16  ;;  %s7108_s20 = scalar_lea.vmem %s68_s16, 32 }
  0x61   :  { %p7105_p1 = scmp.ne.s32.totalorder %s68_s16, %s7104_s2  ;;  %p7109_p2 = scmp.lt.s32.totalorder %s68_s16, %s68_s16 }
  0x62   :  { %p7110_p3 = scmp.lt.s32.totalorder %s7108_s20, %s7104_s2 }
  0x64   :  { %p7111_p4 = por %p7110_p3, %p7109_p2 }
  0x66   :  { %p7112_p5 = pnand %p7111_p4, %p7105_p1 }
  0x68   :  { %7115 = shalt.err (!%p7112_p5)
}
  0x69   :  { %70 = dma.hbm_to_vmem [thread:$0]  %s7827_s4, 16, %s68_s16, [#allocation9]  }
  0x6a   :  { %s7116_s29 = scalar_lea.hbm %s7829_s6, 1568 }
  0x6b   :  { %p7117_p6 = scmp.ne.s32.totalorder %s7829_s6, %s7116_s29  ;;  %p7120_p7 = scmp.lt.u32.totalorder %s7116_s29, %s7829_s6 }
  0x6d   :  { %p7122_p8 = pnand %p7120_p7, %p7117_p6 }
  0x6f   :  { %7125 = shalt.err (!%p7122_p8)
}
  0x70   :  { %s7126_s13 = scalar_lea.vmem %s90_s19, 1568  ;;  %p7131_p10 = scmp.lt.s32.totalorder %s90_s19, %s90_s19 }
  0x71   :  { %p7127_p9 = scmp.ne.s32.totalorder %s90_s19, %s7126_s13  ;;  %p7132_p11 = scmp.lt.s32.totalorder %s7126_s13, %s7126_s13 }
  0x73   :  { %p7133_p12 = por %p7132_p11, %p7131_p10 }
  0x75   :  { %p7134_p13 = pnand %p7133_p12, %p7127_p9 }
  0x77   :  { %7137 = shalt.err (!%p7134_p13)
}
  0x78   :  { %92 = dma.hbm_to_vmem [thread:$0]  %s7829_s6, 1568, %s90_s19, [#allocation12]  }
  0x79   :  { %7160 = dma.done.wait [#allocation3], 16  }
  0x7a   :  { %7161 = vsyncadd [#allocation3], 4294967280 }
  0x7b   :  { %7162 = dma.done.wait [#allocation6], 272  }
  0x7c   :  { %7163 = vsyncadd [#allocation6], 4294967024 }
  0x7d   :  { %7164 = dma.done.wait [#allocation9], 528  }
  0x7e   :  { %7165 = vsyncadd [#allocation9], 4294966768 }
  0x7f   :  { %7166 = dma.done.wait [#allocation12], 51744  }
  0x80   :  { %7167 = vsyncadd [#allocation12], 4294915552  ;;  %v7181_v0 = vmov 0.0|0.0   ;;  %vm7182_vm0 = vmmov 0   ;;  %v7183_v1 = vmov 0.0   ;;  %v115_v2 = vld [vmem:[#allocation5] sm:$0xff] }
  0x81   :  { %6175 = vmatprep.subr.bf16.mxu0 %v7181_v0  ;;  %6161 = vmatprep.mubr.msk.f32.mxu0 %vm7182_vm0, %v7183_v1  ;;  %v116_v3 = vld [vmem:[#allocation5 + $0x8] sm:$0xff]  ;;  %v193_v5 = vld [vmem:[#allocation8] sm:$0xff]  ;;  %v194_v6 = vld [vmem:[#allocation8 + $0x8] sm:$0xff]  ;;  %vm118_vm1 = vcmask 130048   ;;  %vm198_vm2 = vcmask 261120   ;;  %s7185_s6 = smov [#allocation14]  }
  0x82   :  { %6178 = vmatprep.subr.bf16.mxu1 %v7181_v0  ;;  %6172 = vmatprep.mubr.msk.f32.mxu1 %vm7182_vm0, %v7183_v1  ;;  %v6176_v4 = vpack.c.bf16 %v116_v3, %v115_v2  ;;  %v6179_v7 = vpack.c.bf16 %v194_v6, %v193_v5  ;;  %v114_v8 = vld [vmem:[#allocation2] sm:$0x1]  ;;  %v195_v9 = vld [vmem:[#allocation8 + $0x10] sm:$0xff]  ;;  %v196_v10 = vld [vmem:[#allocation8 + $0x18] sm:$0xff]  ;;  %s5988_s3 = sshll.u32 %s7185_s6, 4  ;;  %s5989_s3 = int_to_ptr.vmem [resolvable:$true] %s5988_s3 }
  0x83   :  { %v6182_v11 = vpack.c.bf16 %v196_v10, %v195_v9  ;;  %v274_v12 = vld [vmem:[#allocation11 + $0x8] sm:$0xff]  ;;  %v372_v13 = vld [vmem:[#allocation11 + $0x318] sm:$0xff]  ;;  %v273_v17 = vld [vmem:[#allocation11] sm:$0xff]  ;;  %s7138_s11 = scalar_lea.vmem %s5989_s3, 1568  ;;  %p7143_p1 = scmp.lt.s32.totalorder %s5989_s3, %s5989_s3 }
  0x84   :  { %6177 = vmatpush3.bf16.msra.mxu0 %v6176_v4  ;;  %6180 = vmatpush3.bf16.msra.mxu1 %v6179_v7  ;;  %v276_v14 = vld [vmem:[#allocation11 + $0x18] sm:$0xff]  ;;  %v6184_v15 = vpack.c.bf16 %v372_v13, %v274_v12  ;;  %v374_v16 = vld [vmem:[#allocation11 + $0x328] sm:$0xff]  ;;  %v371_v18 = vld [vmem:[#allocation11 + $0x310] sm:$0xff]  ;;  %p7139_p0 = scmp.ne.s32.totalorder %s5989_s3, %s7138_s11  ;;  %p7144_p2 = scmp.lt.s32.totalorder %s7138_s11, %s7138_s11 }
  0x85   :  { %6181 = vmatprep.subr.bf16.mxu1 %v7181_v0  ;;  %v6192_v19 = vpack.c.bf16 %v374_v16, %v276_v14  ;;  %v6186_v20 = vpack.c.bf16 %v371_v18, %v273_v17  ;;  %v117_v21 = vld [vmem:[#allocation7] sm:$0x1]  ;;  %v275_v22 = vld [vmem:[#allocation11 + $0x10] sm:$0xff]  ;;  %v373_v23 = vld [vmem:[#allocation11 + $0x320] sm:$0xff] }
  0x86   :  { %6185 = vmatprep.subr.bf16.mxu0 %v6184_v15  ;;  %v6194_v27 = vpack.c.bf16 %v373_v23, %v275_v22  ;;  %v470_v29 = vld [vmem:[#allocation11 + $0x628] sm:$0xff]  ;;  %v568_v30 = vld [vmem:[#allocation11 + $0x938] sm:$0xff]  ;;  %v469_v34 = vld [vmem:[#allocation11 + $0x620] sm:$0xff]  ;;  %p7145_p3 = por %p7144_p2, %p7143_p1 }
  0x87   :  { %6162 = vmatmul.mubr.msk.f32.vlgmr.msra.gmra.mrb[0].mxu0 %vm118_vm1, %v114_v8  ;;  %v472_v31 = vld [vmem:[#allocation11 + $0x638] sm:$0xff]  ;;  %v6188_v32 = vpack.c.bf16 %v568_v30, %v470_v29  ;;  %v570_v33 = vld [vmem:[#allocation11 + $0x948] sm:$0xff]  ;;  %v567_v35 = vld [vmem:[#allocation11 + $0x930] sm:$0xff] }
  0x88   :  { %1248 = vmatprep.mubr.f32.mxu0 %v7183_v1  ;;  %6183 = vmatpush3.bf16.msra.mxu1 %v6182_v11  ;;  %v6196_v36 = vpack.c.bf16 %v570_v33, %v472_v31  ;;  %v6190_v37 = vpack.c.bf16 %v567_v35, %v469_v34  ;;  %v471_v38 = vld [vmem:[#allocation11 + $0x630] sm:$0xff]  ;;  %v569_v39 = vld [vmem:[#allocation11 + $0x940] sm:$0xff]  ;;  %v278_v41 = vld [vmem:[#allocation11 + $0x28] sm:$0xff]  ;;  %p7146_p4 = pnand %p7145_p3, %p7139_p0 }
  0x89   :  { %6193 = vmatprep.subr.bf16.mxu1 %v6192_v19  ;;  %6187 = vmatpush1.bf16.msra.mxu0 %v6186_v20  ;;  %v6198_v40 = vpack.c.bf16 %v569_v39, %v471_v38  ;;  %v376_v42 = vld [vmem:[#allocation11 + $0x338] sm:$0xff]  ;;  %v378_v45 = vld [vmem:[#allocation11 + $0x348] sm:$0xff]  ;;  %v277_v48 = vld [vmem:[#allocation11 + $0x20] sm:$0xff] }
  0x8a   :  { %6189 = vmatprep.subr.bf16.mxu0 %v6188_v32  ;;  %v280_v43 = vld [vmem:[#allocation11 + $0x38] sm:$0xff]  ;;  %v6200_v44 = vpack.c.bf16 %v376_v42, %v278_v41  ;;  %v375_v49 = vld [vmem:[#allocation11 + $0x330] sm:$0xff]  ;;  %v377_v51 = vld [vmem:[#allocation11 + $0x340] sm:$0xff] }
  0x8b   :  { %v6208_v46 = vpack.c.bf16 %v378_v45, %v280_v43  ;;  %v197_v47 = vld [vmem:[#allocation10] sm:$0x1]  ;;  %v279_v50 = vld [vmem:[#allocation11 + $0x30] sm:$0xff]  ;;  %v474_v52 = vld [vmem:[#allocation11 + $0x648] sm:$0xff]  ;;  %v6202_v59 = vpack.c.bf16 %v375_v49, %v277_v48 }
  0x8c   :  { %v572_v54 = vld [vmem:[#allocation11 + $0x958] sm:$0xff]  ;;  %v574_v56 = vld [vmem:[#allocation11 + $0x968] sm:$0xff]  ;;  %v6210_v60 = vpack.c.bf16 %v377_v51, %v279_v50  ;;  %v473_v61 = vld [vmem:[#allocation11 + $0x640] sm:$0xff] }
  0x8d   :  { %6191 = vmatpush1.bf16.msra.mxu0 %v6190_v37  ;;  %v476_v55 = vld [vmem:[#allocation11 + $0x658] sm:$0xff]  ;;  %v571_v62 = vld [vmem:[#allocation11 + $0x950] sm:$0xff]  ;;  %v6204_v0 = vpack.c.bf16 %v572_v54, %v474_v52  ;;  %v573_v4 = vld [vmem:[#allocation11 + $0x960] sm:$0xff] }
  0x8e   :  { %6201 = vmatprep.subr.bf16.mxu0 %v6200_v44  ;;  %v6212_v2 = vpack.c.bf16 %v574_v56, %v476_v55  ;;  %v475_v3 = vld [vmem:[#allocation11 + $0x650] sm:$0xff]  ;;  %v282_v5 = vld [vmem:[#allocation11 + $0x48] sm:$0xff]  ;;  %v380_v6 = vld [vmem:[#allocation11 + $0x358] sm:$0xff]  ;;  %v6206_v9 = vpack.c.bf16 %v571_v62, %v473_v61 }
  0x8f   :  { %v284_v7 = vld [vmem:[#allocation11 + $0x58] sm:$0xff]  ;;  %v382_v8 = vld [vmem:[#allocation11 + $0x368] sm:$0xff]  ;;  %v6214_v10 = vpack.c.bf16 %v573_v4, %v475_v3  ;;  %v281_v11 = vld [vmem:[#allocation11 + $0x40] sm:$0xff]  ;;  %v6216_v13 = vpack.c.bf16 %v380_v6, %v282_v5 }
  0x90   :  { %v379_v12 = vld [vmem:[#allocation11 + $0x350] sm:$0xff]  ;;  %v6224_v14 = vpack.c.bf16 %v382_v8, %v284_v7  ;;  %v381_v16 = vld [vmem:[#allocation11 + $0x360] sm:$0xff]  ;;  %v478_v17 = vld [vmem:[#allocation11 + $0x668] sm:$0xff] }
  0x91   :  { %v283_v15 = vld [vmem:[#allocation11 + $0x50] sm:$0xff]  ;;  %v576_v18 = vld [vmem:[#allocation11 + $0x978] sm:$0xff]  ;;  %v578_v20 = vld [vmem:[#allocation11 + $0x988] sm:$0xff] }
  0x92   :  { %v480_v19 = vld [vmem:[#allocation11 + $0x678] sm:$0xff]  ;;  %v6226_v22 = vpack.c.bf16 %v381_v16, %v283_v15  ;;  %v477_v23 = vld [vmem:[#allocation11 + $0x660] sm:$0xff]  ;;  %v286_v29 = vld [vmem:[#allocation11 + $0x68] sm:$0xff] }
  0x93   :  { %v384_v30 = vld [vmem:[#allocation11 + $0x378] sm:$0xff]  ;;  %v386_v32 = vld [vmem:[#allocation11 + $0x388] sm:$0xff]  ;;  %v285_v35 = vld [vmem:[#allocation11 + $0x60] sm:$0xff] }
  0x94   :  { %v288_v31 = vld [vmem:[#allocation11 + $0x78] sm:$0xff]  ;;  %v6232_v37 = vpack.c.bf16 %v384_v30, %v286_v29  ;;  %v287_v39 = vld [vmem:[#allocation11 + $0x70] sm:$0xff]  ;;  %v482_v41 = vld [vmem:[#allocation11 + $0x688] sm:$0xff] }
  0x95   :  { %v6240_v38 = vpack.c.bf16 %v386_v32, %v288_v31  ;;  %v580_v42 = vld [vmem:[#allocation11 + $0x998] sm:$0xff]  ;;  %v582_v44 = vld [vmem:[#allocation11 + $0x9a8] sm:$0xff]  ;;  %v579_v48 = vld [vmem:[#allocation11 + $0x990] sm:$0xff] }
  0x96   :  { %v484_v43 = vld [vmem:[#allocation11 + $0x698] sm:$0xff]  ;;  %v6236_v49 = vpack.c.bf16 %v580_v42, %v482_v41  ;;  %v483_v51 = vld [vmem:[#allocation11 + $0x690] sm:$0xff]  ;;  %v581_v52 = vld [vmem:[#allocation11 + $0x9a0] sm:$0xff] }
  0x97   :  { %v6244_v50 = vpack.c.bf16 %v582_v44, %v484_v43  ;;  %v388_v54 = vld [vmem:[#allocation11 + $0x398] sm:$0xff]  ;;  %v390_v56 = vld [vmem:[#allocation11 + $0x3a8] sm:$0xff] }
  0x98   :  { %v292_v55 = vld [vmem:[#allocation11 + $0x98] sm:$0xff]  ;;  %v486_v3 = vld [vmem:[#allocation11 + $0x6a8] sm:$0xff] }
  0x99   :  { %v6256_v62 = vpack.c.bf16 %v390_v56, %v292_v55  ;;  %v584_v4 = vld [vmem:[#allocation11 + $0x9b8] sm:$0xff]  ;;  %v586_v6 = vld [vmem:[#allocation11 + $0x9c8] sm:$0xff] }
  0x9a   :  { %v488_v5 = vld [vmem:[#allocation11 + $0x6b8] sm:$0xff]  ;;  %v294_v15 = vld [vmem:[#allocation11 + $0xa8] sm:$0xff] }
  0x9b   :  { %v392_v16 = vld [vmem:[#allocation11 + $0x3b8] sm:$0xff]  ;;  %v590_v30 = vld [vmem:[#allocation11 + $0x9e8] sm:$0xff] }
  0x9c   :  { %v492_v29 = vld [vmem:[#allocation11 + $0x6d8] sm:$0xff]  ;;  %v398_v42 = vld [vmem:[#allocation11 + $0x3e8] sm:$0xff] }
  0x9d   :  { %v300_v41 = vld [vmem:[#allocation11 + $0xd8] sm:$0xff] }
 0x15a   :  { %v188_v24 = vpop.f32.mrb[0].mxu0 }
 0x15b   :  { %v189_v25 = vadd.f32 %v188_v24, %v117_v21  ;;  %v6163_v26 = vpop.f32.mrb[1].mxu0  ;;  %v6218_v21 = vpack.c.bf16 %v379_v12, %v281_v11  ;;  %v575_v24 = vld [vmem:[#allocation11 + $0x970] sm:$0xff]  ;;  %v6252_v11 = vpack.c.bf16 %v584_v4, %v486_v3  ;;  %v6260_v12 = vpack.c.bf16 %v586_v6, %v488_v5  ;;  %v304_v3 = vld [vmem:[#allocation11 + $0xf8] sm:$0xff]  ;;  %v402_v4 = vld [vmem:[#allocation11 + $0x408] sm:$0xff] }
 0x15c   :  { %v6228_v26 = vpack.c.bf16 %v578_v20, %v480_v19  ;;  %v6222_v33 = vpack.c.bf16 %v575_v24, %v477_v23  ;;  %v6264_v23 = vpack.c.bf16 %v392_v16, %v294_v15  ;;  %v500_v15 = vld [vmem:[#allocation11 + $0x718] sm:$0xff]  ;;  %v598_v16 = vld [vmem:[#allocation11 + $0xa28] sm:$0xff] }
 0x15d   :  { %v192_v28 = vmax.f32 %v189_v25, 0.0  ;;  %v6220_v25 = vpack.c.bf16 %v576_v18, %v478_v17  ;;  %v296_v17 = vld [vmem:[#allocation11 + $0xb8] sm:$0xff]  ;;  %v394_v18 = vld [vmem:[#allocation11 + $0x3c8] sm:$0xff] }
 0x15e   :  { %v6272_v24 = vpack.c.bf16 %v394_v18, %v296_v17 }
 0x15f   :  { %6173 = vmatmul.mubr.msk.f32.vlgmr.msra.gmra.mrb[0].mxu1 %vm198_vm2, %v192_v28  ;;  %v577_v28 = vld [vmem:[#allocation11 + $0x980] sm:$0xff] }
 0x160   :  { %6195 = vmatpush1.bf16.msra.mxu1 %v6194_v27  ;;  %1319 = vmatprep.mubr.f32.mxu1 %v7183_v1  ;;  %v479_v27 = vld [vmem:[#allocation11 + $0x670] sm:$0xff] }
 0x161   :  { %6197 = vmatprep.subr.bf16.mxu1 %v6196_v36  ;;  %v6230_v34 = vpack.c.bf16 %v577_v28, %v479_v27  ;;  %v383_v36 = vld [vmem:[#allocation11 + $0x370] sm:$0xff]  ;;  %v490_v27 = vld [vmem:[#allocation11 + $0x6c8] sm:$0xff]  ;;  %v588_v28 = vld [vmem:[#allocation11 + $0x9d8] sm:$0xff] }
 0x162   :  { %v6234_v45 = vpack.c.bf16 %v383_v36, %v285_v35  ;;  %v6268_v35 = vpack.c.bf16 %v588_v28, %v490_v27  ;;  %v6276_v36 = vpack.c.bf16 %v590_v30, %v492_v29  ;;  %v308_v27 = vld [vmem:[#allocation11 + $0x118] sm:$0xff]  ;;  %v406_v28 = vld [vmem:[#allocation11 + $0x428] sm:$0xff] }
 0x164   :  { %6199 = vmatpush1.bf16.msra.mxu1 %v6198_v40  ;;  %v385_v40 = vld [vmem:[#allocation11 + $0x380] sm:$0xff] }
 0x165   :  { %6209 = vmatprep.subr.bf16.mxu1 %v6208_v46  ;;  %v6242_v46 = vpack.c.bf16 %v385_v40, %v287_v39  ;;  %v298_v39 = vld [vmem:[#allocation11 + $0xc8] sm:$0xff]  ;;  %v396_v40 = vld [vmem:[#allocation11 + $0x3d8] sm:$0xff] }
 0x232   :  { %v268_v53 = vpop.f32.mrb[0].mxu1 }
 0x233   :  { %v269_v57 = vadd.f32 %v268_v53, %v197_v47  ;;  %v6174_v58 = vpop.f32.mrb[1].mxu1  ;;  %v481_v47 = vld [vmem:[#allocation11 + $0x680] sm:$0xff]  ;;  %v290_v53 = vld [vmem:[#allocation11 + $0x88] sm:$0xff] }
 0x234   :  { %v6246_v58 = vpack.c.bf16 %v581_v52, %v483_v51  ;;  %v6248_v61 = vpack.c.bf16 %v388_v54, %v290_v53  ;;  %v494_v51 = vld [vmem:[#allocation11 + $0x6e8] sm:$0xff]  ;;  %v592_v52 = vld [vmem:[#allocation11 + $0x9f8] sm:$0xff] }
 0x235   :  { %v7315_v63 = vmax.f32 %v269_v57, 0.0  ;;  %v6238_v57 = vpack.c.bf16 %v579_v48, %v481_v47  ;;  %v6280_v47 = vpack.c.bf16 %v396_v40, %v298_v39  ;;  %v6288_v48 = vpack.c.bf16 %v398_v42, %v300_v41  ;;  %v496_v53 = vld [vmem:[#allocation11 + $0x6f8] sm:$0xff]  ;;  %v594_v54 = vld [vmem:[#allocation11 + $0xa08] sm:$0xff] }
 0x236   :  { %v504_v39 = vld [vmem:[#allocation11 + $0x738] sm:$0xff]  ;;  %v602_v40 = vld [vmem:[#allocation11 + $0xa48] sm:$0xff] }
 0x237   :  { %6002 = vmatmul.mubr.msk.f32.vlgmr.msra.gmra.mrb[2].mxu0 %vm198_vm2, %v7315_v63  ;;  %6003 = vmatmul.mubr.msk.f32.vlgmr.msra.gmra.mrb[2].mxu1 %vm198_vm2, %v7315_v63 }
 0x238   :  { %6203 = vmatpush1.bf16.msra.mxu0 %v6202_v59  ;;  %6211 = vmatpush1.bf16.msra.mxu1 %v6210_v60  ;;  %v289_v59 = vld [vmem:[#allocation11 + $0x80] sm:$0xff]  ;;  %v387_v60 = vld [vmem:[#allocation11 + $0x390] sm:$0xff] }
 0x239   :  { %6205 = vmatprep.subr.bf16.mxu0 %v6204_v0  ;;  %6213 = vmatprep.subr.bf16.mxu1 %v6212_v2  ;;  %v291_v0 = vld [vmem:[#allocation11 + $0x90] sm:$0xff]  ;;  %v389_v2 = vld [vmem:[#allocation11 + $0x3a0] sm:$0xff]  ;;  %v6250_v7 = vpack.c.bf16 %v387_v60, %v289_v59  ;;  %v6284_v59 = vpack.c.bf16 %v592_v52, %v494_v51  ;;  %v6292_v60 = vpack.c.bf16 %v594_v54, %v496_v53  ;;  %v312_v51 = vld [vmem:[#allocation11 + $0x138] sm:$0xff] }
 0x23a   :  { %1390 = vmatprep.mubr.f32.mxu0 %v7183_v1  ;;  %1461 = vmatprep.mubr.f32.mxu1 %v7183_v1  ;;  %v6258_v8 = vpack.c.bf16 %v389_v2, %v291_v0  ;;  %v302_v0 = vld [vmem:[#allocation11 + $0xe8] sm:$0xff]  ;;  %v400_v2 = vld [vmem:[#allocation11 + $0x3f8] sm:$0xff] }
 0x23b   :  { %v410_v52 = vld [vmem:[#allocation11 + $0x448] sm:$0xff] }
 0x23c   :  { %6207 = vmatpush1.bf16.msra.mxu0 %v6206_v9  ;;  %6215 = vmatpush1.bf16.msra.mxu1 %v6214_v10  ;;  %v485_v9 = vld [vmem:[#allocation11 + $0x6a0] sm:$0xff]  ;;  %v583_v10 = vld [vmem:[#allocation11 + $0x9b0] sm:$0xff] }
 0x23d   :  { %6217 = vmatprep.subr.bf16.mxu0 %v6216_v13  ;;  %6225 = vmatprep.subr.bf16.mxu1 %v6224_v14  ;;  %v487_v13 = vld [vmem:[#allocation11 + $0x6b0] sm:$0xff]  ;;  %v585_v14 = vld [vmem:[#allocation11 + $0x9c0] sm:$0xff]  ;;  %v6254_v19 = vpack.c.bf16 %v583_v10, %v485_v9  ;;  %v6296_v9 = vpack.c.bf16 %v400_v2, %v302_v0  ;;  %v6304_v10 = vpack.c.bf16 %v402_v4, %v304_v3  ;;  %v508_v0 = vld [vmem:[#allocation11 + $0x758] sm:$0xff] }
 0x23e   :  { %v6262_v20 = vpack.c.bf16 %v585_v14, %v487_v13  ;;  %v498_v13 = vld [vmem:[#allocation11 + $0x708] sm:$0xff]  ;;  %v596_v14 = vld [vmem:[#allocation11 + $0xa18] sm:$0xff] }
 0x23f   :  { %6004 = vmatmul.mubr.msk.f32.vlgmr.msra.gmra.mrb[4].mxu0 %vm198_vm2, %v7315_v63  ;;  %6005 = vmatmul.mubr.msk.f32.vlgmr.msra.gmra.mrb[4].mxu1 %vm198_vm2, %v7315_v63  ;;  %v606_v2 = vld [vmem:[#allocation11 + $0xa68] sm:$0xff] }
 0x240   :  { %6219 = vmatpush1.bf16.msra.mxu0 %v6218_v21  ;;  %6227 = vmatpush1.bf16.msra.mxu1 %v6226_v22  ;;  %v293_v21 = vld [vmem:[#allocation11 + $0xa0] sm:$0xff]  ;;  %v391_v22 = vld [vmem:[#allocation11 + $0x3b0] sm:$0xff] }
 0x241   :  { %6221 = vmatprep.subr.bf16.mxu0 %v6220_v25  ;;  %6229 = vmatprep.subr.bf16.mxu1 %v6228_v26  ;;  %v295_v25 = vld [vmem:[#allocation11 + $0xb0] sm:$0xff]  ;;  %v393_v26 = vld [vmem:[#allocation11 + $0x3c0] sm:$0xff]  ;;  %v6266_v31 = vpack.c.bf16 %v391_v22, %v293_v21  ;;  %v6300_v21 = vpack.c.bf16 %v596_v14, %v498_v13  ;;  %v6308_v22 = vpack.c.bf16 %v598_v16, %v500_v15  ;;  %v316_v13 = vld [vmem:[#allocation11 + $0x158] sm:$0xff] }
 0x242   :  { %1532 = vmatprep.mubr.f32.mxu0 %v7183_v1  ;;  %1603 = vmatprep.mubr.f32.mxu1 %v7183_v1  ;;  %v6274_v32 = vpack.c.bf16 %v393_v26, %v295_v25  ;;  %v306_v25 = vld [vmem:[#allocation11 + $0x108] sm:$0xff]  ;;  %v404_v26 = vld [vmem:[#allocation11 + $0x418] sm:$0xff] }
 0x243   :  { %v414_v14 = vld [vmem:[#allocation11 + $0x468] sm:$0xff] }
 0x244   :  { %6223 = vmatpush1.bf16.msra.mxu0 %v6222_v33  ;;  %6231 = vmatpush1.bf16.msra.mxu1 %v6230_v34  ;;  %v489_v33 = vld [vmem:[#allocation11 + $0x6c0] sm:$0xff]  ;;  %v587_v34 = vld [vmem:[#allocation11 + $0x9d0] sm:$0xff] }
 0x245   :  { %6233 = vmatprep.subr.bf16.mxu0 %v6232_v37  ;;  %6241 = vmatprep.subr.bf16.mxu1 %v6240_v38  ;;  %v491_v37 = vld [vmem:[#allocation11 + $0x6d0] sm:$0xff]  ;;  %v589_v38 = vld [vmem:[#allocation11 + $0x9e0] sm:$0xff]  ;;  %v6270_v43 = vpack.c.bf16 %v587_v34, %v489_v33  ;;  %v6312_v33 = vpack.c.bf16 %v404_v26, %v306_v25  ;;  %v6320_v34 = vpack.c.bf16 %v406_v28, %v308_v27  ;;  %v512_v25 = vld [vmem:[#allocation11 + $0x778] sm:$0xff] }
 0x246   :  { %v6278_v44 = vpack.c.bf16 %v589_v38, %v491_v37  ;;  %v502_v37 = vld [vmem:[#allocation11 + $0x728] sm:$0xff]  ;;  %v600_v38 = vld [vmem:[#allocation11 + $0xa38] sm:$0xff] }
 0x247   :  { %6006 = vmatmul.mubr.msk.f32.vlgmr.msra.gmra.mrb[6].mxu0 %vm198_vm2, %v7315_v63  ;;  %6007 = vmatmul.mubr.msk.f32.vlgmr.msra.gmra.mrb[6].mxu1 %vm198_vm2, %v7315_v63  ;;  %v610_v26 = vld [vmem:[#allocation11 + $0xa88] sm:$0xff] }
 0x248   :  { %6235 = vmatpush1.bf16.msra.mxu0 %v6234_v45  ;;  %6243 = vmatpush1.bf16.msra.mxu1 %v6242_v46  ;;  %v297_v45 = vld [vmem:[#allocation11 + $0xc0] sm:$0xff]  ;;  %v395_v46 = vld [vmem:[#allocation11 + $0x3d0] sm:$0xff] }
 0x249   :  { %6237 = vmatprep.subr.bf16.mxu0 %v6236_v49  ;;  %6245 = vmatprep.subr.bf16.mxu1 %v6244_v50  ;;  %v299_v49 = vld [vmem:[#allocation11 + $0xd0] sm:$0xff]  ;;  %v397_v50 = vld [vmem:[#allocation11 + $0x3e0] sm:$0xff]  ;;  %v6282_v55 = vpack.c.bf16 %v395_v46, %v297_v45  ;;  %v6316_v45 = vpack.c.bf16 %v600_v38, %v502_v37  ;;  %v6324_v46 = vpack.c.bf16 %v602_v40, %v504_v39  ;;  %v320_v37 = vld [vmem:[#allocation11 + $0x178] sm:$0xff] }
 0x24a   :  { %1674 = vmatprep.mubr.f32.mxu0 %v7183_v1  ;;  %1745 = vmatprep.mubr.f32.mxu1 %v7183_v1  ;;  %v6290_v56 = vpack.c.bf16 %v397_v50, %v299_v49  ;;  %v310_v49 = vld [vmem:[#allocation11 + $0x128] sm:$0xff]  ;;  %v408_v50 = vld [vmem:[#allocation11 + $0x438] sm:$0xff] }
 0x24b   :  { %v418_v38 = vld [vmem:[#allocation11 + $0x488] sm:$0xff] }
 0x24c   :  { %6239 = vmatpush1.bf16.msra.mxu0 %v6238_v57  ;;  %6247 = vmatpush1.bf16.msra.mxu1 %v6246_v58  ;;  %v493_v57 = vld [vmem:[#allocation11 + $0x6e0] sm:$0xff]  ;;  %v591_v58 = vld [vmem:[#allocation11 + $0x9f0] sm:$0xff] }
 0x24d   :  { %6249 = vmatprep.subr.bf16.mxu0 %v6248_v61  ;;  %6257 = vmatprep.subr.bf16.mxu1 %v6256_v62  ;;  %v495_v61 = vld [vmem:[#allocation11 + $0x6f0] sm:$0xff]  ;;  %v593_v62 = vld [vmem:[#allocation11 + $0xa00] sm:$0xff]  ;;  %v6286_v5 = vpack.c.bf16 %v591_v58, %v493_v57  ;;  %v6328_v57 = vpack.c.bf16 %v408_v50, %v310_v49  ;;  %v6336_v58 = vpack.c.bf16 %v410_v52, %v312_v51  ;;  %v516_v49 = vld [vmem:[#allocation11 + $0x798] sm:$0xff] }
 0x24e   :  { %v6294_v6 = vpack.c.bf16 %v593_v62, %v495_v61  ;;  %v506_v61 = vld [vmem:[#allocation11 + $0x748] sm:$0xff]  ;;  %v604_v62 = vld [vmem:[#allocation11 + $0xa58] sm:$0xff] }
 0x24f   :  { %6008 = vmatmul.mubr.msk.f32.vlgmr.msra.gmra.mrb[8].mxu0 %vm198_vm2, %v7315_v63  ;;  %6009 = vmatmul.mubr.msk.f32.vlgmr.msra.gmra.mrb[8].mxu1 %vm198_vm2, %v7315_v63  ;;  %v614_v50 = vld [vmem:[#allocation11 + $0xaa8] sm:$0xff] }
 0x250   :  { %6251 = vmatpush1.bf16.msra.mxu0 %v6250_v7  ;;  %6259 = vmatpush1.bf16.msra.mxu1 %v6258_v8  ;;  %v301_v7 = vld [vmem:[#allocation11 + $0xe0] sm:$0xff]  ;;  %v399_v8 = vld [vmem:[#allocation11 + $0x3f0] sm:$0xff] }
 0x251   :  { %6253 = vmatprep.subr.bf16.mxu0 %v6252_v11  ;;  %6261 = vmatprep.subr.bf16.mxu1 %v6260_v12  ;;  %v303_v11 = vld [vmem:[#allocation11 + $0xf0] sm:$0xff]  ;;  %v401_v12 = vld [vmem:[#allocation11 + $0x400] sm:$0xff]  ;;  %v6298_v17 = vpack.c.bf16 %v399_v8, %v301_v7  ;;  %v6332_v7 = vpack.c.bf16 %v604_v62, %v506_v61  ;;  %v6340_v8 = vpack.c.bf16 %v606_v2, %v508_v0  ;;  %v324_v61 = vld [vmem:[#allocation11 + $0x198] sm:$0xff] }
 0x252   :  { %1816 = vmatprep.mubr.f32.mxu0 %v7183_v1  ;;  %1887 = vmatprep.mubr.f32.mxu1 %v7183_v1  ;;  %v6306_v18 = vpack.c.bf16 %v401_v12, %v303_v11  ;;  %v314_v11 = vld [vmem:[#allocation11 + $0x148] sm:$0xff]  ;;  %v412_v12 = vld [vmem:[#allocation11 + $0x458] sm:$0xff] }
 0x253   :  { %v422_v62 = vld [vmem:[#allocation11 + $0x4a8] sm:$0xff] }
 0x254   :  { %6255 = vmatpush1.bf16.msra.mxu0 %v6254_v19  ;;  %6263 = vmatpush1.bf16.msra.mxu1 %v6262_v20  ;;  %v497_v19 = vld [vmem:[#allocation11 + $0x700] sm:$0xff]  ;;  %v595_v20 = vld [vmem:[#allocation11 + $0xa10] sm:$0xff] }
 0x255   :  { %6265 = vmatprep.subr.bf16.mxu0 %v6264_v23  ;;  %6273 = vmatprep.subr.bf16.mxu1 %v6272_v24  ;;  %v499_v23 = vld [vmem:[#allocation11 + $0x710] sm:$0xff]  ;;  %v597_v24 = vld [vmem:[#allocation11 + $0xa20] sm:$0xff]  ;;  %v6302_v29 = vpack.c.bf16 %v595_v20, %v497_v19  ;;  %v6344_v19 = vpack.c.bf16 %v412_v12, %v314_v11  ;;  %v6352_v20 = vpack.c.bf16 %v414_v14, %v316_v13  ;;  %v520_v11 = vld [vmem:[#allocation11 + $0x7b8] sm:$0xff] }
 0x256   :  { %v6310_v30 = vpack.c.bf16 %v597_v24, %v499_v23  ;;  %v510_v23 = vld [vmem:[#allocation11 + $0x768] sm:$0xff]  ;;  %v608_v24 = vld [vmem:[#allocation11 + $0xa78] sm:$0xff] }
 0x257   :  { %6010 = vmatmul.mubr.msk.f32.vlgmr.msra.gmra.mrb[10].mxu0 %vm198_vm2, %v7315_v63  ;;  %6011 = vmatmul.mubr.msk.f32.vlgmr.msra.gmra.mrb[10].mxu1 %vm198_vm2, %v7315_v63  ;;  %v618_v12 = vld [vmem:[#allocation11 + $0xac8] sm:$0xff] }
 0x258   :  { %6267 = vmatpush1.bf16.msra.mxu0 %v6266_v31  ;;  %6275 = vmatpush1.bf16.msra.mxu1 %v6274_v32  ;;  %v305_v31 = vld [vmem:[#allocation11 + $0x100] sm:$0xff]  ;;  %v403_v32 = vld [vmem:[#allocation11 + $0x410] sm:$0xff] }
 0x259   :  { %6269 = vmatprep.subr.bf16.mxu0 %v6268_v35  ;;  %6277 = vmatprep.subr.bf16.mxu1 %v6276_v36  ;;  %v307_v35 = vld [vmem:[#allocation11 + $0x110] sm:$0xff]  ;;  %v405_v36 = vld [vmem:[#allocation11 + $0x420] sm:$0xff]  ;;  %v6314_v41 = vpack.c.bf16 %v403_v32, %v305_v31  ;;  %v6348_v31 = vpack.c.bf16 %v608_v24, %v510_v23  ;;  %v6356_v32 = vpack.c.bf16 %v610_v26, %v512_v25  ;;  %v328_v23 = vld [vmem:[#allocation11 + $0x1b8] sm:$0xff] }
 0x25a   :  { %1958 = vmatprep.mubr.f32.mxu0 %v7183_v1  ;;  %2029 = vmatprep.mubr.f32.mxu1 %v7183_v1  ;;  %v6322_v42 = vpack.c.bf16 %v405_v36, %v307_v35  ;;  %v318_v35 = vld [vmem:[#allocation11 + $0x168] sm:$0xff]  ;;  %v416_v36 = vld [vmem:[#allocation11 + $0x478] sm:$0xff] }
 0x25b   :  { %v426_v24 = vld [vmem:[#allocation11 + $0x4c8] sm:$0xff] }
 0x25c   :  { %6271 = vmatpush1.bf16.msra.mxu0 %v6270_v43  ;;  %6279 = vmatpush1.bf16.msra.mxu1 %v6278_v44  ;;  %v501_v43 = vld [vmem:[#allocation11 + $0x720] sm:$0xff]  ;;  %v599_v44 = vld [vmem:[#allocation11 + $0xa30] sm:$0xff] }
 0x25d   :  { %6281 = vmatprep.subr.bf16.mxu0 %v6280_v47  ;;  %6289 = vmatprep.subr.bf16.mxu1 %v6288_v48  ;;  %v503_v47 = vld [vmem:[#allocation11 + $0x730] sm:$0xff]  ;;  %v601_v48 = vld [vmem:[#allocation11 + $0xa40] sm:$0xff]  ;;  %v6318_v53 = vpack.c.bf16 %v599_v44, %v501_v43  ;;  %v6360_v43 = vpack.c.bf16 %v416_v36, %v318_v35  ;;  %v6368_v44 = vpack.c.bf16 %v418_v38, %v320_v37  ;;  %v524_v35 = vld [vmem:[#allocation11 + $0x7d8] sm:$0xff] }
 0x25e   :  { %v6326_v54 = vpack.c.bf16 %v601_v48, %v503_v47  ;;  %v514_v47 = vld [vmem:[#allocation11 + $0x788] sm:$0xff]  ;;  %v612_v48 = vld [vmem:[#allocation11 + $0xa98] sm:$0xff] }
 0x25f   :  { %6012 = vmatmul.mubr.msk.f32.vlgmr.msra.gmra.mrb[12].mxu0 %vm198_vm2, %v7315_v63  ;;  %6013 = vmatmul.mubr.msk.f32.vlgmr.msra.gmra.mrb[12].mxu1 %vm198_vm2, %v7315_v63  ;;  %v622_v36 = vld [vmem:[#allocation11 + $0xae8] sm:$0xff] }
 0x260   :  { %6283 = vmatpush1.bf16.msra.mxu0 %v6282_v55  ;;  %6291 = vmatpush1.bf16.msra.mxu1 %v6290_v56  ;;  %v309_v55 = vld [vmem:[#allocation11 + $0x120] sm:$0xff]  ;;  %v407_v56 = vld [vmem:[#allocation11 + $0x430] sm:$0xff] }
 0x261   :  { %6285 = vmatprep.subr.bf16.mxu0 %v6284_v59  ;;  %6293 = vmatprep.subr.bf16.mxu1 %v6292_v60  ;;  %v311_v59 = vld [vmem:[#allocation11 + $0x130] sm:$0xff]  ;;  %v409_v60 = vld [vmem:[#allocation11 + $0x440] sm:$0xff]  ;;  %v6330_v3 = vpack.c.bf16 %v407_v56, %v309_v55  ;;  %v6364_v55 = vpack.c.bf16 %v612_v48, %v514_v47  ;;  %v6372_v56 = vpack.c.bf16 %v614_v50, %v516_v49  ;;  %v332_v47 = vld [vmem:[#allocation11 + $0x1d8] sm:$0xff] }
 0x262   :  { %2100 = vmatprep.mubr.f32.mxu0 %v7183_v1  ;;  %2171 = vmatprep.mubr.f32.mxu1 %v7183_v1  ;;  %v6338_v4 = vpack.c.bf16 %v409_v60, %v311_v59  ;;  %v322_v59 = vld [vmem:[#allocation11 + $0x188] sm:$0xff]  ;;  %v420_v60 = vld [vmem:[#allocation11 + $0x498] sm:$0xff] }
 0x263   :  { %v430_v48 = vld [vmem:[#allocation11 + $0x4e8] sm:$0xff] }
 0x264   :  { %6287 = vmatpush1.bf16.msra.mxu0 %v6286_v5  ;;  %6295 = vmatpush1.bf16.msra.mxu1 %v6294_v6  ;;  %v505_v5 = vld [vmem:[#allocation11 + $0x740] sm:$0xff]  ;;  %v603_v6 = vld [vmem:[#allocation11 + $0xa50] sm:$0xff] }
 0x265   :  { %6297 = vmatprep.subr.bf16.mxu0 %v6296_v9  ;;  %6305 = vmatprep.subr.bf16.mxu1 %v6304_v10  ;;  %v507_v9 = vld [vmem:[#allocation11 + $0x750] sm:$0xff]  ;;  %v605_v10 = vld [vmem:[#allocation11 + $0xa60] sm:$0xff]  ;;  %v6334_v15 = vpack.c.bf16 %v603_v6, %v505_v5  ;;  %v6376_v5 = vpack.c.bf16 %v420_v60, %v322_v59  ;;  %v6384_v6 = vpack.c.bf16 %v422_v62, %v324_v61  ;;  %v528_v59 = vld [vmem:[#allocation11 + $0x7f8] sm:$0xff] }
 0x266   :  { %v6342_v16 = vpack.c.bf16 %v605_v10, %v507_v9  ;;  %v518_v9 = vld [vmem:[#allocation11 + $0x7a8] sm:$0xff]  ;;  %v616_v10 = vld [vmem:[#allocation11 + $0xab8] sm:$0xff] }
 0x267   :  { %6014 = vmatmul.mubr.msk.f32.vlgmr.msra.gmra.mrb[14].mxu0 %vm198_vm2, %v7315_v63  ;;  %6015 = vmatmul.mubr.msk.f32.vlgmr.msra.gmra.mrb[14].mxu1 %vm198_vm2, %v7315_v63  ;;  %v626_v60 = vld [vmem:[#allocation11 + $0xb08] sm:$0xff] }
 0x268   :  { %6299 = vmatpush1.bf16.msra.mxu0 %v6298_v17  ;;  %6307 = vmatpush1.bf16.msra.mxu1 %v6306_v18  ;;  %v313_v17 = vld [vmem:[#allocation11 + $0x140] sm:$0xff]  ;;  %v411_v18 = vld [vmem:[#allocation11 + $0x450] sm:$0xff] }
 0x269   :  { %6301 = vmatprep.subr.bf16.mxu0 %v6300_v21  ;;  %6309 = vmatprep.subr.bf16.mxu1 %v6308_v22  ;;  %v315_v21 = vld [vmem:[#allocation11 + $0x150] sm:$0xff]  ;;  %v413_v22 = vld [vmem:[#allocation11 + $0x460] sm:$0xff]  ;;  %v6346_v27 = vpack.c.bf16 %v411_v18, %v313_v17  ;;  %v6380_v17 = vpack.c.bf16 %v616_v10, %v518_v9  ;;  %v6388_v18 = vpack.c.bf16 %v618_v12, %v520_v11  ;;  %v336_v9 = vld [vmem:[#allocation11 + $0x1f8] sm:$0xff] }
 0x26a   :  { %2242 = vmatprep.mubr.f32.mxu0 %v7183_v1  ;;  %2313 = vmatprep.mubr.f32.mxu1 %v7183_v1  ;;  %v6354_v28 = vpack.c.bf16 %v413_v22, %v315_v21  ;;  %v326_v21 = vld [vmem:[#allocation11 + $0x1a8] sm:$0xff]  ;;  %v424_v22 = vld [vmem:[#allocation11 + $0x4b8] sm:$0xff] }
 0x26b   :  { %v434_v10 = vld [vmem:[#allocation11 + $0x508] sm:$0xff] }
 0x26c   :  { %6303 = vmatpush1.bf16.msra.mxu0 %v6302_v29  ;;  %6311 = vmatpush1.bf16.msra.mxu1 %v6310_v30  ;;  %v509_v29 = vld [vmem:[#allocation11 + $0x760] sm:$0xff]  ;;  %v607_v30 = vld [vmem:[#allocation11 + $0xa70] sm:$0xff] }
 0x26d   :  { %6313 = vmatprep.subr.bf16.mxu0 %v6312_v33  ;;  %6321 = vmatprep.subr.bf16.mxu1 %v6320_v34  ;;  %v511_v33 = vld [vmem:[#allocation11 + $0x770] sm:$0xff]  ;;  %v609_v34 = vld [vmem:[#allocation11 + $0xa80] sm:$0xff]  ;;  %v6350_v39 = vpack.c.bf16 %v607_v30, %v509_v29  ;;  %v6392_v29 = vpack.c.bf16 %v424_v22, %v326_v21  ;;  %v6400_v30 = vpack.c.bf16 %v426_v24, %v328_v23  ;;  %v532_v21 = vld [vmem:[#allocation11 + $0x818] sm:$0xff] }
 0x26e   :  { %v6358_v40 = vpack.c.bf16 %v609_v34, %v511_v33  ;;  %v522_v33 = vld [vmem:[#allocation11 + $0x7c8] sm:$0xff]  ;;  %v620_v34 = vld [vmem:[#allocation11 + $0xad8] sm:$0xff] }
 0x26f   :  { %6016 = vmatmul.mubr.msk.f32.vlgmr.msra.gmra.mrb[16].mxu0 %vm198_vm2, %v7315_v63  ;;  %6017 = vmatmul.mubr.msk.f32.vlgmr.msra.gmra.mrb[16].mxu1 %vm198_vm2, %v7315_v63  ;;  %v630_v22 = vld [vmem:[#allocation11 + $0xb28] sm:$0xff] }
 0x270   :  { %6315 = vmatpush1.bf16.msra.mxu0 %v6314_v41  ;;  %6323 = vmatpush1.bf16.msra.mxu1 %v6322_v42  ;;  %v317_v41 = vld [vmem:[#allocation11 + $0x160] sm:$0xff]  ;;  %v415_v42 = vld [vmem:[#allocation11 + $0x470] sm:$0xff] }
 0x271   :  { %6317 = vmatprep.subr.bf16.mxu0 %v6316_v45  ;;  %6325 = vmatprep.subr.bf16.mxu1 %v6324_v46  ;;  %v319_v45 = vld [vmem:[#allocation11 + $0x170] sm:$0xff]  ;;  %v417_v46 = vld [vmem:[#allocation11 + $0x480] sm:$0xff]  ;;  %v6362_v51 = vpack.c.bf16 %v415_v42, %v317_v41  ;;  %v6396_v41 = vpack.c.bf16 %v620_v34, %v522_v33  ;;  %v6404_v42 = vpack.c.bf16 %v622_v36, %v524_v35  ;;  %v340_v33 = vld [vmem:[#allocation11 + $0x218] sm:$0xff] }
 0x272   :  { %2384 = vmatprep.mubr.f32.mxu0 %v7183_v1  ;;  %2455 = vmatprep.mubr.f32.mxu1 %v7183_v1  ;;  %v6370_v52 = vpack.c.bf16 %v417_v46, %v319_v45  ;;  %v330_v45 = vld [vmem:[#allocation11 + $0x1c8] sm:$0xff]  ;;  %v428_v46 = vld [vmem:[#allocation11 + $0x4d8] sm:$0xff] }
 0x273   :  { %v438_v34 = vld [vmem:[#allocation11 + $0x528] sm:$0xff] }
 0x274   :  { %6319 = vmatpush1.bf16.msra.mxu0 %v6318_v53  ;;  %6327 = vmatpush1.bf16.msra.mxu1 %v6326_v54  ;;  %v513_v53 = vld [vmem:[#allocation11 + $0x780] sm:$0xff]  ;;  %v611_v54 = vld [vmem:[#allocation11 + $0xa90] sm:$0xff] }
 0x275   :  { %6329 = vmatprep.subr.bf16.mxu0 %v6328_v57  ;;  %6337 = vmatprep.subr.bf16.mxu1 %v6336_v58  ;;  %v515_v57 = vld [vmem:[#allocation11 + $0x790] sm:$0xff]  ;;  %v613_v58 = vld [vmem:[#allocation11 + $0xaa0] sm:$0xff]  ;;  %v6366_v0 = vpack.c.bf16 %v611_v54, %v513_v53  ;;  %v6408_v53 = vpack.c.bf16 %v428_v46, %v330_v45  ;;  %v6416_v54 = vpack.c.bf16 %v430_v48, %v332_v47  ;;  %v536_v45 = vld [vmem:[#allocation11 + $0x838] sm:$0xff] }
 0x276   :  { %v6374_v2 = vpack.c.bf16 %v613_v58, %v515_v57  ;;  %v526_v57 = vld [vmem:[#allocation11 + $0x7e8] sm:$0xff]  ;;  %v624_v58 = vld [vmem:[#allocation11 + $0xaf8] sm:$0xff] }
 0x277   :  { %6018 = vmatmul.mubr.msk.f32.vlgmr.msra.gmra.mrb[18].mxu0 %vm198_vm2, %v7315_v63  ;;  %6019 = vmatmul.mubr.msk.f32.vlgmr.msra.gmra.mrb[18].mxu1 %vm198_vm2, %v7315_v63  ;;  %v634_v46 = vld [vmem:[#allocation11 + $0xb48] sm:$0xff] }
 0x278   :  { %6331 = vmatpush1.bf16.msra.mxu0 %v6330_v3  ;;  %6339 = vmatpush1.bf16.msra.mxu1 %v6338_v4  ;;  %v321_v3 = vld [vmem:[#allocation11 + $0x180] sm:$0xff]  ;;  %v419_v4 = vld [vmem:[#allocation11 + $0x490] sm:$0xff] }
 0x279   :  { %6333 = vmatprep.subr.bf16.mxu0 %v6332_v7  ;;  %6341 = vmatprep.subr.bf16.mxu1 %v6340_v8  ;;  %v323_v7 = vld [vmem:[#allocation11 + $0x190] sm:$0xff]  ;;  %v421_v8 = vld [vmem:[#allocation11 + $0x4a0] sm:$0xff]  ;;  %v6378_v13 = vpack.c.bf16 %v419_v4, %v321_v3  ;;  %v6412_v3 = vpack.c.bf16 %v624_v58, %v526_v57  ;;  %v6420_v4 = vpack.c.bf16 %v626_v60, %v528_v59  ;;  %v344_v57 = vld [vmem:[#allocation11 + $0x238] sm:$0xff] }
 0x27a   :  { %2526 = vmatprep.mubr.f32.mxu0 %v7183_v1  ;;  %2597 = vmatprep.mubr.f32.mxu1 %v7183_v1  ;;  %v6386_v14 = vpack.c.bf16 %v421_v8, %v323_v7  ;;  %v334_v7 = vld [vmem:[#allocation11 + $0x1e8] sm:$0xff]  ;;  %v432_v8 = vld [vmem:[#allocation11 + $0x4f8] sm:$0xff] }
 0x27b   :  { %v442_v58 = vld [vmem:[#allocation11 + $0x548] sm:$0xff] }
 0x27c   :  { %6335 = vmatpush1.bf16.msra.mxu0 %v6334_v15  ;;  %6343 = vmatpush1.bf16.msra.mxu1 %v6342_v16  ;;  %v517_v15 = vld [vmem:[#allocation11 + $0x7a0] sm:$0xff]  ;;  %v615_v16 = vld [vmem:[#allocation11 + $0xab0] sm:$0xff] }
 0x27d   :  { %6345 = vmatprep.subr.bf16.mxu0 %v6344_v19  ;;  %6353 = vmatprep.subr.bf16.mxu1 %v6352_v20  ;;  %v519_v19 = vld [vmem:[#allocation11 + $0x7b0] sm:$0xff]  ;;  %v617_v20 = vld [vmem:[#allocation11 + $0xac0] sm:$0xff]  ;;  %v6382_v25 = vpack.c.bf16 %v615_v16, %v517_v15  ;;  %v6424_v15 = vpack.c.bf16 %v432_v8, %v334_v7  ;;  %v6432_v16 = vpack.c.bf16 %v434_v10, %v336_v9  ;;  %v540_v7 = vld [vmem:[#allocation11 + $0x858] sm:$0xff] }
 0x27e   :  { %v6390_v26 = vpack.c.bf16 %v617_v20, %v519_v19  ;;  %v530_v19 = vld [vmem:[#allocation11 + $0x808] sm:$0xff]  ;;  %v628_v20 = vld [vmem:[#allocation11 + $0xb18] sm:$0xff] }
 0x27f   :  { %6020 = vmatmul.mubr.msk.f32.vlgmr.msra.gmra.mrb[20].mxu0 %vm198_vm2, %v7315_v63  ;;  %6021 = vmatmul.mubr.msk.f32.vlgmr.msra.gmra.mrb[20].mxu1 %vm198_vm2, %v7315_v63  ;;  %v638_v8 = vld [vmem:[#allocation11 + $0xb68] sm:$0xff] }
 0x280   :  { %6347 = vmatpush1.bf16.msra.mxu0 %v6346_v27  ;;  %6355 = vmatpush1.bf16.msra.mxu1 %v6354_v28  ;;  %v325_v27 = vld [vmem:[#allocation11 + $0x1a0] sm:$0xff]  ;;  %v423_v28 = vld [vmem:[#allocation11 + $0x4b0] sm:$0xff] }
 0x281   :  { %6349 = vmatprep.subr.bf16.mxu0 %v6348_v31  ;;  %6357 = vmatprep.subr.bf16.mxu1 %v6356_v32  ;;  %v327_v31 = vld [vmem:[#allocation11 + $0x1b0] sm:$0xff]  ;;  %v425_v32 = vld [vmem:[#allocation11 + $0x4c0] sm:$0xff]  ;;  %v6394_v37 = vpack.c.bf16 %v423_v28, %v325_v27  ;;  %v6428_v27 = vpack.c.bf16 %v628_v20, %v530_v19  ;;  %v6436_v28 = vpack.c.bf16 %v630_v22, %v532_v21  ;;  %v348_v19 = vld [vmem:[#allocation11 + $0x258] sm:$0xff] }
 0x282   :  { %2668 = vmatprep.mubr.f32.mxu0 %v7183_v1  ;;  %2739 = vmatprep.mubr.f32.mxu1 %v7183_v1  ;;  %v6402_v38 = vpack.c.bf16 %v425_v32, %v327_v31  ;;  %v338_v31 = vld [vmem:[#allocation11 + $0x208] sm:$0xff]  ;;  %v436_v32 = vld [vmem:[#allocation11 + $0x518] sm:$0xff] }
 0x283   :  { %v446_v20 = vld [vmem:[#allocation11 + $0x568] sm:$0xff] }
 0x284   :  { %6351 = vmatpush1.bf16.msra.mxu0 %v6350_v39  ;;  %6359 = vmatpush1.bf16.msra.mxu1 %v6358_v40  ;;  %v521_v39 = vld [vmem:[#allocation11 + $0x7c0] sm:$0xff]  ;;  %v619_v40 = vld [vmem:[#allocation11 + $0xad0] sm:$0xff] }
 0x285   :  { %6361 = vmatprep.subr.bf16.mxu0 %v6360_v43  ;;  %6369 = vmatprep.subr.bf16.mxu1 %v6368_v44  ;;  %v523_v43 = vld [vmem:[#allocation11 + $0x7d0] sm:$0xff]  ;;  %v621_v44 = vld [vmem:[#allocation11 + $0xae0] sm:$0xff]  ;;  %v6398_v49 = vpack.c.bf16 %v619_v40, %v521_v39  ;;  %v6440_v39 = vpack.c.bf16 %v436_v32, %v338_v31  ;;  %v6448_v40 = vpack.c.bf16 %v438_v34, %v340_v33  ;;  %v544_v31 = vld [vmem:[#allocation11 + $0x878] sm:$0xff] }
 0x286   :  { %v6406_v50 = vpack.c.bf16 %v621_v44, %v523_v43  ;;  %v534_v43 = vld [vmem:[#allocation11 + $0x828] sm:$0xff]  ;;  %v632_v44 = vld [vmem:[#allocation11 + $0xb38] sm:$0xff] }
 0x287   :  { %6022 = vmatmul.mubr.msk.f32.vlgmr.msra.gmra.mrb[22].mxu0 %vm198_vm2, %v7315_v63  ;;  %6023 = vmatmul.mubr.msk.f32.vlgmr.msra.gmra.mrb[22].mxu1 %vm198_vm2, %v7315_v63  ;;  %v642_v32 = vld [vmem:[#allocation11 + $0xb88] sm:$0xff] }
 0x288   :  { %6363 = vmatpush1.bf16.msra.mxu0 %v6362_v51  ;;  %6371 = vmatpush1.bf16.msra.mxu1 %v6370_v52  ;;  %v329_v51 = vld [vmem:[#allocation11 + $0x1c0] sm:$0xff]  ;;  %v427_v52 = vld [vmem:[#allocation11 + $0x4d0] sm:$0xff] }
 0x289   :  { %6365 = vmatprep.subr.bf16.mxu0 %v6364_v55  ;;  %6373 = vmatprep.subr.bf16.mxu1 %v6372_v56  ;;  %v331_v55 = vld [vmem:[#allocation11 + $0x1d0] sm:$0xff]  ;;  %v429_v56 = vld [vmem:[#allocation11 + $0x4e0] sm:$0xff]  ;;  %v6410_v61 = vpack.c.bf16 %v427_v52, %v329_v51  ;;  %v6444_v51 = vpack.c.bf16 %v632_v44, %v534_v43  ;;  %v6452_v52 = vpack.c.bf16 %v634_v46, %v536_v45  ;;  %v352_v43 = vld [vmem:[#allocation11 + $0x278] sm:$0xff] }
 0x28a   :  { %2810 = vmatprep.mubr.f32.mxu0 %v7183_v1  ;;  %2881 = vmatprep.mubr.f32.mxu1 %v7183_v1  ;;  %v6418_v62 = vpack.c.bf16 %v429_v56, %v331_v55  ;;  %v342_v55 = vld [vmem:[#allocation11 + $0x228] sm:$0xff]  ;;  %v440_v56 = vld [vmem:[#allocation11 + $0x538] sm:$0xff] }
 0x28b   :  { %v450_v44 = vld [vmem:[#allocation11 + $0x588] sm:$0xff] }
 0x28c   :  { %6367 = vmatpush1.bf16.msra.mxu0 %v6366_v0  ;;  %6375 = vmatpush1.bf16.msra.mxu1 %v6374_v2  ;;  %v525_v0 = vld [vmem:[#allocation11 + $0x7e0] sm:$0xff]  ;;  %v623_v2 = vld [vmem:[#allocation11 + $0xaf0] sm:$0xff] }
 0x28d   :  { %6377 = vmatprep.subr.bf16.mxu0 %v6376_v5  ;;  %6385 = vmatprep.subr.bf16.mxu1 %v6384_v6  ;;  %v527_v5 = vld [vmem:[#allocation11 + $0x7f0] sm:$0xff]  ;;  %v625_v6 = vld [vmem:[#allocation11 + $0xb00] sm:$0xff]  ;;  %v6414_v11 = vpack.c.bf16 %v623_v2, %v525_v0  ;;  %v6456_v0 = vpack.c.bf16 %v440_v56, %v342_v55  ;;  %v6464_v2 = vpack.c.bf16 %v442_v58, %v344_v57  ;;  %v548_v55 = vld [vmem:[#allocation11 + $0x898] sm:$0xff] }
 0x28e   :  { %v6422_v12 = vpack.c.bf16 %v625_v6, %v527_v5  ;;  %v538_v5 = vld [vmem:[#allocation11 + $0x848] sm:$0xff]  ;;  %v636_v6 = vld [vmem:[#allocation11 + $0xb58] sm:$0xff] }
 0x28f   :  { %6024 = vmatmul.mubr.msk.f32.vlgmr.msra.gmra.mrb[24].mxu0 %vm198_vm2, %v7315_v63  ;;  %6025 = vmatmul.mubr.msk.f32.vlgmr.msra.gmra.mrb[24].mxu1 %vm198_vm2, %v7315_v63  ;;  %v646_v56 = vld [vmem:[#allocation11 + $0xba8] sm:$0xff] }
 0x290   :  { %6379 = vmatpush1.bf16.msra.mxu0 %v6378_v13  ;;  %6387 = vmatpush1.bf16.msra.mxu1 %v6386_v14  ;;  %v333_v13 = vld [vmem:[#allocation11 + $0x1e0] sm:$0xff]  ;;  %v431_v14 = vld [vmem:[#allocation11 + $0x4f0] sm:$0xff] }
 0x291   :  { %6381 = vmatprep.subr.bf16.mxu0 %v6380_v17  ;;  %6389 = vmatprep.subr.bf16.mxu1 %v6388_v18  ;;  %v335_v17 = vld [vmem:[#allocation11 + $0x1f0] sm:$0xff]  ;;  %v433_v18 = vld [vmem:[#allocation11 + $0x500] sm:$0xff]  ;;  %v6426_v23 = vpack.c.bf16 %v431_v14, %v333_v13  ;;  %v6460_v13 = vpack.c.bf16 %v636_v6, %v538_v5  ;;  %v6468_v14 = vpack.c.bf16 %v638_v8, %v540_v7  ;;  %v356_v5 = vld [vmem:[#allocation11 + $0x298] sm:$0xff] }
 0x292   :  { %2952 = vmatprep.mubr.f32.mxu0 %v7183_v1  ;;  %3023 = vmatprep.mubr.f32.mxu1 %v7183_v1  ;;  %v6434_v24 = vpack.c.bf16 %v433_v18, %v335_v17  ;;  %v346_v17 = vld [vmem:[#allocation11 + $0x248] sm:$0xff]  ;;  %v444_v18 = vld [vmem:[#allocation11 + $0x558] sm:$0xff] }
 0x293   :  { %v454_v6 = vld [vmem:[#allocation11 + $0x5a8] sm:$0xff] }
 0x294   :  { %6383 = vmatpush1.bf16.msra.mxu0 %v6382_v25  ;;  %6391 = vmatpush1.bf16.msra.mxu1 %v6390_v26  ;;  %v529_v25 = vld [vmem:[#allocation11 + $0x800] sm:$0xff]  ;;  %v627_v26 = vld [vmem:[#allocation11 + $0xb10] sm:$0xff] }
 0x295   :  { %6393 = vmatprep.subr.bf16.mxu0 %v6392_v29  ;;  %6401 = vmatprep.subr.bf16.mxu1 %v6400_v30  ;;  %v531_v29 = vld [vmem:[#allocation11 + $0x810] sm:$0xff]  ;;  %v629_v30 = vld [vmem:[#allocation11 + $0xb20] sm:$0xff]  ;;  %v6430_v35 = vpack.c.bf16 %v627_v26, %v529_v25  ;;  %v6472_v25 = vpack.c.bf16 %v444_v18, %v346_v17  ;;  %v6480_v26 = vpack.c.bf16 %v446_v20, %v348_v19  ;;  %v552_v17 = vld [vmem:[#allocation11 + $0x8b8] sm:$0xff] }
 0x296   :  { %v6438_v36 = vpack.c.bf16 %v629_v30, %v531_v29  ;;  %v542_v29 = vld [vmem:[#allocation11 + $0x868] sm:$0xff]  ;;  %v640_v30 = vld [vmem:[#allocation11 + $0xb78] sm:$0xff] }
 0x297   :  { %6026 = vmatmul.mubr.msk.f32.vlgmr.msra.gmra.mrb[26].mxu0 %vm198_vm2, %v7315_v63  ;;  %6027 = vmatmul.mubr.msk.f32.vlgmr.msra.gmra.mrb[26].mxu1 %vm198_vm2, %v7315_v63  ;;  %v650_v18 = vld [vmem:[#allocation11 + $0xbc8] sm:$0xff] }
 0x298   :  { %6395 = vmatpush1.bf16.msra.mxu0 %v6394_v37  ;;  %6403 = vmatpush1.bf16.msra.mxu1 %v6402_v38  ;;  %v337_v37 = vld [vmem:[#allocation11 + $0x200] sm:$0xff]  ;;  %v435_v38 = vld [vmem:[#allocation11 + $0x510] sm:$0xff] }
 0x299   :  { %6397 = vmatprep.subr.bf16.mxu0 %v6396_v41  ;;  %6405 = vmatprep.subr.bf16.mxu1 %v6404_v42  ;;  %v339_v41 = vld [vmem:[#allocation11 + $0x210] sm:$0xff]  ;;  %v437_v42 = vld [vmem:[#allocation11 + $0x520] sm:$0xff]  ;;  %v6442_v47 = vpack.c.bf16 %v435_v38, %v337_v37  ;;  %v6476_v37 = vpack.c.bf16 %v640_v30, %v542_v29  ;;  %v6484_v38 = vpack.c.bf16 %v642_v32, %v544_v31  ;;  %v360_v29 = vld [vmem:[#allocation11 + $0x2b8] sm:$0xff] }
 0x29a   :  { %3094 = vmatprep.mubr.f32.mxu0 %v7183_v1  ;;  %3165 = vmatprep.mubr.f32.mxu1 %v7183_v1  ;;  %v6450_v48 = vpack.c.bf16 %v437_v42, %v339_v41  ;;  %v350_v41 = vld [vmem:[#allocation11 + $0x268] sm:$0xff]  ;;  %v448_v42 = vld [vmem:[#allocation11 + $0x578] sm:$0xff] }
 0x29b   :  { %v458_v30 = vld [vmem:[#allocation11 + $0x5c8] sm:$0xff] }
 0x29c   :  { %6399 = vmatpush1.bf16.msra.mxu0 %v6398_v49  ;;  %6407 = vmatpush1.bf16.msra.mxu1 %v6406_v50  ;;  %v533_v49 = vld [vmem:[#allocation11 + $0x820] sm:$0xff]  ;;  %v631_v50 = vld [vmem:[#allocation11 + $0xb30] sm:$0xff] }
 0x29d   :  { %6409 = vmatprep.subr.bf16.mxu0 %v6408_v53  ;;  %6417 = vmatprep.subr.bf16.mxu1 %v6416_v54  ;;  %v535_v53 = vld [vmem:[#allocation11 + $0x830] sm:$0xff]  ;;  %v633_v54 = vld [vmem:[#allocation11 + $0xb40] sm:$0xff]  ;;  %v6446_v59 = vpack.c.bf16 %v631_v50, %v533_v49  ;;  %v6488_v49 = vpack.c.bf16 %v448_v42, %v350_v41  ;;  %v6496_v50 = vpack.c.bf16 %v450_v44, %v352_v43  ;;  %v556_v41 = vld [vmem:[#allocation11 + $0x8d8] sm:$0xff] }
 0x29e   :  { %v6454_v60 = vpack.c.bf16 %v633_v54, %v535_v53  ;;  %v546_v53 = vld [vmem:[#allocation11 + $0x888] sm:$0xff]  ;;  %v644_v54 = vld [vmem:[#allocation11 + $0xb98] sm:$0xff] }
 0x29f   :  { %6028 = vmatmul.mubr.msk.f32.vlgmr.msra.gmra.mrb[28].mxu0 %vm198_vm2, %v7315_v63  ;;  %6029 = vmatmul.mubr.msk.f32.vlgmr.msra.gmra.mrb[28].mxu1 %vm198_vm2, %v7315_v63  ;;  %v654_v42 = vld [vmem:[#allocation11 + $0xbe8] sm:$0xff] }
 0x2a0   :  { %6411 = vmatpush1.bf16.msra.mxu0 %v6410_v61  ;;  %6419 = vmatpush1.bf16.msra.mxu1 %v6418_v62  ;;  %v341_v61 = vld [vmem:[#allocation11 + $0x220] sm:$0xff]  ;;  %v439_v62 = vld [vmem:[#allocation11 + $0x530] sm:$0xff] }
 0x2a1   :  { %6413 = vmatprep.subr.bf16.mxu0 %v6412_v3  ;;  %6421 = vmatprep.subr.bf16.mxu1 %v6420_v4  ;;  %v343_v3 = vld [vmem:[#allocation11 + $0x230] sm:$0xff]  ;;  %v441_v4 = vld [vmem:[#allocation11 + $0x540] sm:$0xff]  ;;  %v6458_v9 = vpack.c.bf16 %v439_v62, %v341_v61  ;;  %v6492_v61 = vpack.c.bf16 %v644_v54, %v546_v53  ;;  %v6500_v62 = vpack.c.bf16 %v646_v56, %v548_v55  ;;  %v364_v53 = vld [vmem:[#allocation11 + $0x2d8] sm:$0xff] }
 0x2a2   :  { %3236 = vmatprep.mubr.f32.mxu0 %v7183_v1  ;;  %3307 = vmatprep.mubr.f32.mxu1 %v7183_v1  ;;  %v6466_v10 = vpack.c.bf16 %v441_v4, %v343_v3  ;;  %v354_v3 = vld [vmem:[#allocation11 + $0x288] sm:$0xff]  ;;  %v452_v4 = vld [vmem:[#allocation11 + $0x598] sm:$0xff] }
 0x2a3   :  { %v462_v54 = vld [vmem:[#allocation11 + $0x5e8] sm:$0xff] }
 0x2a4   :  { %6415 = vmatpush1.bf16.msra.mxu0 %v6414_v11  ;;  %6423 = vmatpush1.bf16.msra.mxu1 %v6422_v12  ;;  %v537_v11 = vld [vmem:[#allocation11 + $0x840] sm:$0xff]  ;;  %v635_v12 = vld [vmem:[#allocation11 + $0xb50] sm:$0xff] }
 0x2a5   :  { %6425 = vmatprep.subr.bf16.mxu0 %v6424_v15  ;;  %6433 = vmatprep.subr.bf16.mxu1 %v6432_v16  ;;  %v539_v15 = vld [vmem:[#allocation11 + $0x850] sm:$0xff]  ;;  %v637_v16 = vld [vmem:[#allocation11 + $0xb60] sm:$0xff]  ;;  %v6462_v21 = vpack.c.bf16 %v635_v12, %v537_v11  ;;  %v6504_v11 = vpack.c.bf16 %v452_v4, %v354_v3  ;;  %v6512_v12 = vpack.c.bf16 %v454_v6, %v356_v5  ;;  %v560_v3 = vld [vmem:[#allocation11 + $0x8f8] sm:$0xff] }
 0x2a6   :  { %v6470_v22 = vpack.c.bf16 %v637_v16, %v539_v15  ;;  %v550_v15 = vld [vmem:[#allocation11 + $0x8a8] sm:$0xff]  ;;  %v648_v16 = vld [vmem:[#allocation11 + $0xbb8] sm:$0xff] }
 0x2a7   :  { %6030 = vmatmul.mubr.msk.f32.vlgmr.msra.gmra.mrb[30].mxu0 %vm198_vm2, %v7315_v63  ;;  %6031 = vmatmul.mubr.msk.f32.vlgmr.msra.gmra.mrb[30].mxu1 %vm198_vm2, %v7315_v63  ;;  %v658_v4 = vld [vmem:[#allocation11 + $0xc08] sm:$0xff] }
 0x2a8   :  { %6427 = vmatpush1.bf16.msra.mxu0 %v6426_v23  ;;  %6435 = vmatpush1.bf16.msra.mxu1 %v6434_v24  ;;  %v345_v23 = vld [vmem:[#allocation11 + $0x240] sm:$0xff]  ;;  %v443_v24 = vld [vmem:[#allocation11 + $0x550] sm:$0xff] }
 0x2a9   :  { %6429 = vmatprep.subr.bf16.mxu0 %v6428_v27  ;;  %6437 = vmatprep.subr.bf16.mxu1 %v6436_v28  ;;  %v347_v27 = vld [vmem:[#allocation11 + $0x250] sm:$0xff]  ;;  %v445_v28 = vld [vmem:[#allocation11 + $0x560] sm:$0xff]  ;;  %v6474_v33 = vpack.c.bf16 %v443_v24, %v345_v23  ;;  %v6508_v23 = vpack.c.bf16 %v648_v16, %v550_v15  ;;  %v6516_v24 = vpack.c.bf16 %v650_v18, %v552_v17  ;;  %v368_v15 = vld [vmem:[#allocation11 + $0x2f8] sm:$0xff] }
 0x2aa   :  { %3378 = vmatprep.mubr.f32.mxu0 %v7183_v1  ;;  %3449 = vmatprep.mubr.f32.mxu1 %v7183_v1  ;;  %v6482_v34 = vpack.c.bf16 %v445_v28, %v347_v27  ;;  %v358_v27 = vld [vmem:[#allocation11 + $0x2a8] sm:$0xff]  ;;  %v456_v28 = vld [vmem:[#allocation11 + $0x5b8] sm:$0xff] }
 0x2ab   :  { %v466_v16 = vld [vmem:[#allocation11 + $0x608] sm:$0xff] }
 0x2ac   :  { %6431 = vmatpush1.bf16.msra.mxu0 %v6430_v35  ;;  %6439 = vmatpush1.bf16.msra.mxu1 %v6438_v36  ;;  %v541_v35 = vld [vmem:[#allocation11 + $0x860] sm:$0xff]  ;;  %v639_v36 = vld [vmem:[#allocation11 + $0xb70] sm:$0xff] }
 0x2ad   :  { %6441 = vmatprep.subr.bf16.mxu0 %v6440_v39  ;;  %6449 = vmatprep.subr.bf16.mxu1 %v6448_v40  ;;  %v543_v39 = vld [vmem:[#allocation11 + $0x870] sm:$0xff]  ;;  %v641_v40 = vld [vmem:[#allocation11 + $0xb80] sm:$0xff]  ;;  %v6478_v45 = vpack.c.bf16 %v639_v36, %v541_v35  ;;  %v6520_v35 = vpack.c.bf16 %v456_v28, %v358_v27  ;;  %v6528_v36 = vpack.c.bf16 %v458_v30, %v360_v29  ;;  %v564_v27 = vld [vmem:[#allocation11 + $0x918] sm:$0xff] }
 0x2ae   :  { %v6486_v46 = vpack.c.bf16 %v641_v40, %v543_v39  ;;  %v554_v39 = vld [vmem:[#allocation11 + $0x8c8] sm:$0xff]  ;;  %v652_v40 = vld [vmem:[#allocation11 + $0xbd8] sm:$0xff] }
 0x2af   :  { %6032 = vmatmul.mubr.msk.f32.vlgmr.msra.gmra.mrb[32].mxu0 %vm198_vm2, %v7315_v63  ;;  %6033 = vmatmul.mubr.msk.f32.vlgmr.msra.gmra.mrb[32].mxu1 %vm198_vm2, %v7315_v63  ;;  %v662_v28 = vld [vmem:[#allocation11 + $0xc28] sm:$0xff] }
 0x2b0   :  { %6443 = vmatpush1.bf16.msra.mxu0 %v6442_v47  ;;  %6451 = vmatpush1.bf16.msra.mxu1 %v6450_v48  ;;  %v349_v47 = vld [vmem:[#allocation11 + $0x260] sm:$0xff]  ;;  %v447_v48 = vld [vmem:[#allocation11 + $0x570] sm:$0xff] }
 0x2b1   :  { %6445 = vmatprep.subr.bf16.mxu0 %v6444_v51  ;;  %6453 = vmatprep.subr.bf16.mxu1 %v6452_v52  ;;  %v351_v51 = vld [vmem:[#allocation11 + $0x270] sm:$0xff]  ;;  %v449_v52 = vld [vmem:[#allocation11 + $0x580] sm:$0xff]  ;;  %v6490_v57 = vpack.c.bf16 %v447_v48, %v349_v47  ;;  %v6524_v47 = vpack.c.bf16 %v652_v40, %v554_v39  ;;  %v6532_v48 = vpack.c.bf16 %v654_v42, %v556_v41 }
 0x2b2   :  { %3520 = vmatprep.mubr.f32.mxu0 %v7183_v1  ;;  %3591 = vmatprep.mubr.f32.mxu1 %v7183_v1  ;;  %v6498_v58 = vpack.c.bf16 %v449_v52, %v351_v51  ;;  %v362_v51 = vld [vmem:[#allocation11 + $0x2c8] sm:$0xff]  ;;  %v460_v52 = vld [vmem:[#allocation11 + $0x5d8] sm:$0xff]  ;;  %v369_v42 = vld [vmem:[#allocation11 + $0x300] sm:$0xff] }
 0x2b4   :  { %6447 = vmatpush1.bf16.msra.mxu0 %v6446_v59  ;;  %6455 = vmatpush1.bf16.msra.mxu1 %v6454_v60  ;;  %v545_v59 = vld [vmem:[#allocation11 + $0x880] sm:$0xff]  ;;  %v643_v60 = vld [vmem:[#allocation11 + $0xb90] sm:$0xff] }
 0x2b5   :  { %6457 = vmatprep.subr.bf16.mxu0 %v6456_v0  ;;  %6465 = vmatprep.subr.bf16.mxu1 %v6464_v2  ;;  %v547_v0 = vld [vmem:[#allocation11 + $0x890] sm:$0xff]  ;;  %v645_v2 = vld [vmem:[#allocation11 + $0xba0] sm:$0xff]  ;;  %v6494_v7 = vpack.c.bf16 %v643_v60, %v545_v59  ;;  %v6536_v59 = vpack.c.bf16 %v460_v52, %v362_v51  ;;  %v6544_v60 = vpack.c.bf16 %v462_v54, %v364_v53  ;;  %v691_v51 = vlaneseq }
 0x2b6   :  { %v6502_v8 = vpack.c.bf16 %v645_v2, %v547_v0  ;;  %v558_v0 = vld [vmem:[#allocation11 + $0x8e8] sm:$0xff]  ;;  %v656_v2 = vld [vmem:[#allocation11 + $0xbf8] sm:$0xff] }
 0x2b7   :  { %6034 = vmatmul.mubr.msk.f32.vlgmr.msra.gmra.mrb[34].mxu0 %vm198_vm2, %v7315_v63  ;;  %6035 = vmatmul.mubr.msk.f32.vlgmr.msra.gmra.mrb[34].mxu1 %vm198_vm2, %v7315_v63  ;;  %v7463_v52 = vshrl.u32 %v691_v51, 7  ;;  %vm5979_vm3 = vcmp.lt.s32.totalorder %v691_v51, 256 }
 0x2b8   :  { %6459 = vmatpush1.bf16.msra.mxu0 %v6458_v9  ;;  %6467 = vmatpush1.bf16.msra.mxu1 %v6466_v10  ;;  %v353_v9 = vld [vmem:[#allocation11 + $0x280] sm:$0xff]  ;;  %v451_v10 = vld [vmem:[#allocation11 + $0x590] sm:$0xff] }
 0x2b9   :  { %6461 = vmatprep.subr.bf16.mxu0 %v6460_v13  ;;  %6469 = vmatprep.subr.bf16.mxu1 %v6468_v14  ;;  %v355_v13 = vld [vmem:[#allocation11 + $0x290] sm:$0xff]  ;;  %v453_v14 = vld [vmem:[#allocation11 + $0x5a0] sm:$0xff]  ;;  %v6506_v19 = vpack.c.bf16 %v451_v10, %v353_v9  ;;  %v6540_v9 = vpack.c.bf16 %v656_v2, %v558_v0  ;;  %v6548_v10 = vpack.c.bf16 %v658_v4, %v560_v3  ;;  %v7466_v53 = vsub.s32 0, %v7463_v52 }
 0x2ba   :  { %3662 = vmatprep.mubr.f32.mxu0 %v7183_v1  ;;  %3733 = vmatprep.mubr.f32.mxu1 %v7183_v1  ;;  %v6514_v20 = vpack.c.bf16 %v453_v14, %v355_v13  ;;  %v366_v13 = vld [vmem:[#allocation11 + $0x2e8] sm:$0xff]  ;;  %v464_v14 = vld [vmem:[#allocation11 + $0x5f8] sm:$0xff]  ;;  %v7469_v54 = vsub.s32 2, %v7463_v52  ;;  %v7482_v4 = vsub.s32 4, %v7463_v52 }
 0x2bc   :  { %6463 = vmatpush1.bf16.msra.mxu0 %v6462_v21  ;;  %6471 = vmatpush1.bf16.msra.mxu1 %v6470_v22  ;;  %v549_v21 = vld [vmem:[#allocation11 + $0x8a0] sm:$0xff]  ;;  %v647_v22 = vld [vmem:[#allocation11 + $0xbb0] sm:$0xff] }
 0x2bd   :  { %6473 = vmatprep.subr.bf16.mxu0 %v6472_v25  ;;  %6481 = vmatprep.subr.bf16.mxu1 %v6480_v26  ;;  %v551_v25 = vld [vmem:[#allocation11 + $0x8b0] sm:$0xff]  ;;  %v649_v26 = vld [vmem:[#allocation11 + $0xbc0] sm:$0xff]  ;;  %v6510_v31 = vpack.c.bf16 %v647_v22, %v549_v21  ;;  %v6552_v21 = vpack.c.bf16 %v464_v14, %v366_v13  ;;  %v6560_v22 = vpack.c.bf16 %v466_v16, %v368_v15 }
 0x2be   :  { %v6518_v32 = vpack.c.bf16 %v649_v26, %v551_v25  ;;  %v562_v25 = vld [vmem:[#allocation11 + $0x908] sm:$0xff]  ;;  %v660_v26 = vld [vmem:[#allocation11 + $0xc18] sm:$0xff] }
 0x2bf   :  { %6036 = vmatmul.mubr.msk.f32.vlgmr.msra.gmra.mrb[36].mxu0 %vm198_vm2, %v7315_v63  ;;  %6037 = vmatmul.mubr.msk.f32.vlgmr.msra.gmra.mrb[36].mxu1 %vm198_vm2, %v7315_v63 }
 0x2c0   :  { %6475 = vmatpush1.bf16.msra.mxu0 %v6474_v33  ;;  %6483 = vmatpush1.bf16.msra.mxu1 %v6482_v34  ;;  %v357_v33 = vld [vmem:[#allocation11 + $0x2a0] sm:$0xff]  ;;  %v455_v34 = vld [vmem:[#allocation11 + $0x5b0] sm:$0xff] }
 0x2c1   :  { %6477 = vmatprep.subr.bf16.mxu0 %v6476_v37  ;;  %6485 = vmatprep.subr.bf16.mxu1 %v6484_v38  ;;  %v359_v37 = vld [vmem:[#allocation11 + $0x2b0] sm:$0xff]  ;;  %v457_v38 = vld [vmem:[#allocation11 + $0x5c0] sm:$0xff]  ;;  %v6522_v43 = vpack.c.bf16 %v455_v34, %v357_v33  ;;  %v6564_v33 = vpack.c.bf16 %v662_v28, %v564_v27 }
 0x2c2   :  { %3804 = vmatprep.mubr.f32.mxu0 %v7183_v1  ;;  %3875 = vmatprep.mubr.f32.mxu1 %v7183_v1  ;;  %v6530_v44 = vpack.c.bf16 %v457_v38, %v359_v37  ;;  %v659_v34 = vld [vmem:[#allocation11 + $0xc10] sm:$0xff]  ;;  %v370_v37 = vld [vmem:[#allocation11 + $0x308] sm:$0xff]  ;;  %v468_v38 = vld [vmem:[#allocation11 + $0x618] sm:$0xff] }
 0x2c3   :  { %v6568_v41 = vpack.c.bf16 %v468_v38, %v370_v37 }
 0x2c4   :  { %6479 = vmatpush1.bf16.msra.mxu0 %v6478_v45  ;;  %6487 = vmatpush1.bf16.msra.mxu1 %v6486_v46  ;;  %v553_v45 = vld [vmem:[#allocation11 + $0x8c0] sm:$0xff]  ;;  %v651_v46 = vld [vmem:[#allocation11 + $0xbd0] sm:$0xff] }
 0x2c5   :  { %6489 = vmatprep.subr.bf16.mxu0 %v6488_v49  ;;  %6497 = vmatprep.subr.bf16.mxu1 %v6496_v50  ;;  %v555_v49 = vld [vmem:[#allocation11 + $0x8d0] sm:$0xff]  ;;  %v653_v50 = vld [vmem:[#allocation11 + $0xbe0] sm:$0xff]  ;;  %v6526_v55 = vpack.c.bf16 %v651_v46, %v553_v45  ;;  %v664_v45 = vld [vmem:[#allocation11 + $0xc38] sm:$0xff] }
 0x2c6   :  { %v6534_v56 = vpack.c.bf16 %v653_v50, %v555_v49  ;;  %v663_v49 = vld [vmem:[#allocation11 + $0xc30] sm:$0xff] }
 0x2c7   :  { %6038 = vmatmul.mubr.msk.f32.vlgmr.msra.gmra.mrb[38].mxu0 %vm198_vm2, %v7315_v63  ;;  %6039 = vmatmul.mubr.msk.f32.vlgmr.msra.gmra.mrb[38].mxu1 %vm198_vm2, %v7315_v63 }
 0x2c8   :  { %6491 = vmatpush1.bf16.msra.mxu0 %v6490_v57  ;;  %6499 = vmatpush1.bf16.msra.mxu1 %v6498_v58  ;;  %v361_v57 = vld [vmem:[#allocation11 + $0x2c0] sm:$0xff]  ;;  %v459_v58 = vld [vmem:[#allocation11 + $0x5d0] sm:$0xff] }
 0x2c9   :  { %6493 = vmatprep.subr.bf16.mxu0 %v6492_v61  ;;  %6501 = vmatprep.subr.bf16.mxu1 %v6500_v62  ;;  %v363_v61 = vld [vmem:[#allocation11 + $0x2d0] sm:$0xff]  ;;  %v461_v62 = vld [vmem:[#allocation11 + $0x5e0] sm:$0xff]  ;;  %v6538_v5 = vpack.c.bf16 %v459_v58, %v361_v57 }
 0x2ca   :  { %3946 = vmatprep.mubr.f32.mxu0 %v7183_v1  ;;  %4017 = vmatprep.mubr.f32.mxu1 %v7183_v1  ;;  %v6546_v6 = vpack.c.bf16 %v461_v62, %v363_v61 }
 0x2cc   :  { %6495 = vmatpush1.bf16.msra.mxu0 %v6494_v7  ;;  %6503 = vmatpush1.bf16.msra.mxu1 %v6502_v8  ;;  %v557_v7 = vld [vmem:[#allocation11 + $0x8e0] sm:$0xff]  ;;  %v655_v8 = vld [vmem:[#allocation11 + $0xbf0] sm:$0xff] }
 0x2cd   :  { %6505 = vmatprep.subr.bf16.mxu0 %v6504_v11  ;;  %6513 = vmatprep.subr.bf16.mxu1 %v6512_v12  ;;  %v559_v11 = vld [vmem:[#allocation11 + $0x8f0] sm:$0xff]  ;;  %v657_v12 = vld [vmem:[#allocation11 + $0xc00] sm:$0xff]  ;;  %v6542_v17 = vpack.c.bf16 %v655_v8, %v557_v7  ;;  %v7488_v8 = vsub.s32 5, %v7463_v52 }
 0x2ce   :  { %v6550_v18 = vpack.c.bf16 %v657_v12, %v559_v11 }
 0x2cf   :  { %6040 = vmatmul.mubr.msk.f32.vlgmr.msra.gmra.mrb[40].mxu0 %vm198_vm2, %v7315_v63  ;;  %6041 = vmatmul.mubr.msk.f32.vlgmr.msra.gmra.mrb[40].mxu1 %vm198_vm2, %v7315_v63 }
 0x2d0   :  { %6507 = vmatpush1.bf16.msra.mxu0 %v6506_v19  ;;  %6515 = vmatpush1.bf16.msra.mxu1 %v6514_v20  ;;  %v365_v19 = vld [vmem:[#allocation11 + $0x2e0] sm:$0xff]  ;;  %v463_v20 = vld [vmem:[#allocation11 + $0x5f0] sm:$0xff] }
 0x2d1   :  { %6509 = vmatprep.subr.bf16.mxu0 %v6508_v23  ;;  %6517 = vmatprep.subr.bf16.mxu1 %v6516_v24  ;;  %v367_v23 = vld [vmem:[#allocation11 + $0x2f0] sm:$0xff]  ;;  %v465_v24 = vld [vmem:[#allocation11 + $0x600] sm:$0xff]  ;;  %v6554_v29 = vpack.c.bf16 %v463_v20, %v365_v19 }
 0x2d2   :  { %4088 = vmatprep.mubr.f32.mxu0 %v7183_v1  ;;  %4159 = vmatprep.mubr.f32.mxu1 %v7183_v1  ;;  %v6562_v30 = vpack.c.bf16 %v465_v24, %v367_v23 }
 0x2d4   :  { %6511 = vmatpush1.bf16.msra.mxu0 %v6510_v31  ;;  %6519 = vmatpush1.bf16.msra.mxu1 %v6518_v32  ;;  %v561_v31 = vld [vmem:[#allocation11 + $0x900] sm:$0xff]  ;;  %v6556_v32 = vpack.c.bf16 %v660_v26, %v562_v25  ;;  %v7497_v26 = vld [vmem:[#allocation13 + $0x8] sm:$0xff] }
 0x2d5   :  { %6521 = vmatprep.subr.bf16.mxu0 %v6520_v35  ;;  %6529 = vmatprep.subr.bf16.mxu1 %v6528_v36  ;;  %v563_v35 = vld [vmem:[#allocation11 + $0x910] sm:$0xff]  ;;  %v661_v36 = vld [vmem:[#allocation11 + $0xc20] sm:$0xff]  ;;  %v6558_v39 = vpack.c.bf16 %v659_v34, %v561_v31  ;;  %v726_v31 = vrot.slane %v7497_v26, %v7466_v53 }
 0x2d6   :  { %v6566_v40 = vpack.c.bf16 %v661_v36, %v563_v35 }
 0x2d7   :  { %6042 = vmatmul.mubr.msk.f32.vlgmr.msra.gmra.mrb[42].mxu0 %vm198_vm2, %v7315_v63  ;;  %6043 = vmatmul.mubr.msk.f32.vlgmr.msra.gmra.mrb[42].mxu1 %vm198_vm2, %v7315_v63 }
 0x2d8   :  { %6523 = vmatpush1.bf16.msra.mxu0 %v6522_v43  ;;  %6531 = vmatpush1.bf16.msra.mxu1 %v6530_v44  ;;  %v467_v43 = vld [vmem:[#allocation11 + $0x610] sm:$0xff]  ;;  %v566_v44 = vld [vmem:[#allocation11 + $0x928] sm:$0xff] }
 0x2d9   :  { %6525 = vmatprep.subr.bf16.mxu0 %v6524_v47  ;;  %6533 = vmatprep.subr.bf16.mxu1 %v6532_v48  ;;  %v6570_v46 = vpack.c.bf16 %v467_v43, %v369_v42  ;;  %v6572_v47 = vpack.c.bf16 %v664_v45, %v566_v44  ;;  %v565_v48 = vld [vmem:[#allocation11 + $0x920] sm:$0xff] }
 0x2da   :  { %4230 = vmatprep.mubr.f32.mxu0 %v7183_v1  ;;  %4301 = vmatprep.mubr.f32.mxu1 %v7183_v1  ;;  %v6574_v50 = vpack.c.bf16 %v663_v49, %v565_v48 }
 0x2dc   :  { %6527 = vmatpush1.bf16.msra.mxu0 %v6526_v55  ;;  %6535 = vmatpush1.bf16.msra.mxu1 %v6534_v56  ;;  %v665_v55 = vld [vmem:[#allocation13] sm:$0xff]  ;;  %v7472_v56 = vsub.s32 1, %v7463_v52 }
 0x2dd   :  { %6537 = vmatprep.subr.bf16.mxu0 %v6536_v59  ;;  %6545 = vmatprep.subr.bf16.mxu1 %v6544_v60  ;;  %v694_v57 = vrot.slane %v665_v55, %v7466_v53  ;;  %v710_v14 = vrot.slane %v665_v55, %v7482_v4  ;;  %v714_v16 = vrot.slane %v665_v55, %v7488_v8 }
 0x2de   :  { %v698_v58 = vrot.slane %v665_v55, %v7472_v56 }
 0x2df   :  { %6044 = vmatmul.mubr.msk.f32.vlgmr.msra.gmra.mrb[44].mxu0 %vm198_vm2, %v7315_v63  ;;  %6045 = vmatmul.mubr.msk.f32.vlgmr.msra.gmra.mrb[44].mxu1 %vm198_vm2, %v7315_v63 }
 0x2e0   :  { %6539 = vmatpush1.bf16.msra.mxu0 %v6538_v5  ;;  %6547 = vmatpush1.bf16.msra.mxu1 %v6546_v6  ;;  %v7485_v5 = vsub.s32 6, %v7463_v52 }
 0x2e1   :  { %6541 = vmatprep.subr.bf16.mxu0 %v6540_v9  ;;  %6549 = vmatprep.subr.bf16.mxu1 %v6548_v10  ;;  %v7491_v9 = vsub.s32 7, %v7463_v52 }
 0x2e2   :  { %4372 = vmatprep.mubr.f32.mxu0 %v7183_v1  ;;  %4443 = vmatprep.mubr.f32.mxu1 %v7183_v1  ;;  %v718_v15 = vrot.slane %v665_v55, %v7485_v5 }
 0x2e4   :  { %6543 = vmatpush1.bf16.msra.mxu0 %v6542_v17  ;;  %6551 = vmatpush1.bf16.msra.mxu1 %v6550_v18  ;;  %v722_v17 = vrot.slane %v665_v55, %v7491_v9 }
 0x2e5   :  { %6553 = vmatprep.subr.bf16.mxu0 %v6552_v21  ;;  %6561 = vmatprep.subr.bf16.mxu1 %v6560_v22 }
 0x2e7   :  { %6046 = vmatmul.mubr.msk.f32.vlgmr.msra.gmra.mrb[46].mxu0 %vm198_vm2, %v7315_v63  ;;  %6047 = vmatmul.mubr.msk.f32.vlgmr.msra.gmra.mrb[46].mxu1 %vm198_vm2, %v7315_v63 }
 0x2e8   :  { %6555 = vmatpush1.bf16.msra.mxu0 %v6554_v29  ;;  %6563 = vmatpush1.bf16.msra.mxu1 %v6562_v30 }
 0x2e9   :  { %6557 = vmatprep.subr.bf16.mxu0 %v6556_v32  ;;  %6565 = vmatprep.subr.bf16.mxu1 %v6564_v33  ;;  %v734_v32 = vrot.slane %v7497_v26, %v7469_v54  ;;  %v730_v33 = vrot.slane %v7497_v26, %v7472_v56 }
 0x2ea   :  { %4514 = vmatprep.mubr.f32.mxu0 %v7183_v1  ;;  %4585 = vmatprep.mubr.f32.mxu1 %v7183_v1 }
 0x2ec   :  { %6559 = vmatpush1.bf16.msra.mxu0 %v6558_v39  ;;  %6567 = vmatpush1.bf16.msra.mxu1 %v6566_v40 }
 0x2ed   :  { %6569 = vmatprep.subr.bf16.mxu0 %v6568_v41 }
 0x2ef   :  { %6048 = vmatmul.mubr.msk.f32.vlgmr.msra.gmra.mrb[48].mxu0 %vm198_vm2, %v7315_v63  ;;  %6049 = vmatmul.mubr.msk.f32.vlgmr.msra.gmra.mrb[48].mxu1 %vm198_vm2, %v7315_v63 }
 0x2f0   :  { %6571 = vmatpush1.bf16.msra.mxu0 %v6570_v46  ;;  %4656 = vmatprep.mubr.f32.mxu0 %v7183_v1  ;;  %v7475_v1 = vsub.s32 3, %v7463_v52 }
 0x2f1   :  { %6573 = vmatprep.subr.bf16.mxu0 %v6572_v47 }
 0x2f2   :  { %v706_v59 = vrot.slane %v665_v55, %v7475_v1  ;;  %v738_v34 = vrot.slane %v7497_v26, %v7475_v1 }
 0x2f4   :  { %6575 = vmatpush1.bf16.msra.mxu0 %v6574_v50 }
 0x2f7   :  { %6050 = vmatmul.mubr.msk.f32.vlgmr.msra.gmra.mrb[50].mxu0 %vm198_vm2, %v7315_v63  ;;  %v702_v63 = vrot.slane %v665_v55, %v7469_v54 }
 0x30a   :  { %v1250_v60 = vpop.f32.mrb[2].mxu0  ;;  %v1321_v61 = vpop.f32.mrb[2].mxu1 }
 0x30b   :  { %v1251_v62 = vadd.f32 %v1250_v60, %v694_v57  ;;  %v1322_v0 = vadd.f32 %v1321_v61, %v702_v63  ;;  %v1252_v2 = vpop.f32.mrb[3].mxu0  ;;  %v1323_v3 = vpop.f32.mrb[3].mxu1  ;;  %v7184_v63 = vmov 1966171168   ;;  %v742_v61 = vrot.slane %v7497_v26, %v7482_v4 }
 0x30c   :  { %v1253_v6 = vadd.f32 %v1252_v2, %v698_v58  ;;  %v1324_v7 = vadd.f32 %v1323_v3, %v706_v59  ;;  %v5354_v58 = vunpack.c.l.s4 %v7184_v63  ;;  %v754_v2 = vrot.slane %v7497_v26, %v7491_v9 }
 0x30d   :  { %v6051_v10 = vmul.f32 -1.442695, %v1251_v62  ;;  %v6053_v11 = vmul.f32 -1.442695, %v1322_v0  ;;  %v750_v62 = vrot.slane %v7497_v26, %v7485_v5  ;;  %v746_v0 = vrot.slane %v7497_v26, %v7488_v8 }
 0x30e   :  { %v6052_v12 = vmul.f32 -1.442695, %v1253_v6  ;;  %v6054_v13 = vmul.f32 -1.442695, %v1324_v7  ;;  %v5355_v7 = vunpack.c.0.s8 %v5354_v58 }
 0x30f   :  { %6592 = vpow2.f32 %v6051_v10 }
 0x310   :  { %6594 = vpow2.f32 %v6053_v11 }
 0x311   :  { %6596 = vpow2.f32 %v6052_v12 }
 0x312   :  { %6598 = vpow2.f32 %v6054_v13  ;;  %v1392_v18 = vpop.f32.mrb[4].mxu0  ;;  %v1463_v19 = vpop.f32.mrb[4].mxu1 }
 0x313   :  { %v1393_v20 = vadd.f32 %v1392_v18, %v710_v14  ;;  %v1464_v21 = vadd.f32 %v1463_v19, %v718_v15  ;;  %v1394_v22 = vpop.f32.mrb[5].mxu0  ;;  %v1465_v23 = vpop.f32.mrb[5].mxu1 }
 0x314   :  { %v1395_v24 = vadd.f32 %v1394_v22, %v714_v16  ;;  %v1466_v25 = vadd.f32 %v1465_v23, %v722_v17  ;;  %v7515_v23 = vld [vmem:[#allocation13 + $0x10] sm:$0xff] }
 0x315   :  { %v6055_v27 = vmul.f32 -1.442695, %v1393_v20  ;;  %v6057_v28 = vmul.f32 -1.442695, %v1464_v21 }
 0x316   :  { %v6056_v29 = vmul.f32 -1.442695, %v1395_v24  ;;  %v6058_v30 = vmul.f32 -1.442695, %v1466_v25 }
 0x317   :  { %6600 = vpow2.f32 %v6055_v27 }
 0x318   :  { %6602 = vpow2.f32 %v6057_v28 }
 0x319   :  { %v6593_v35 = vpop.eup %6592  ;;  %6604 = vpow2.f32 %v6056_v29 }
 0x31a   :  { %v6595_v36 = vpop.eup %6594  ;;  %v4957_v37 = vadd.f32 1.0, %v6593_v35  ;;  %6606 = vpow2.f32 %v6058_v30  ;;  %v1534_v38 = vpop.f32.mrb[6].mxu0  ;;  %v7518_v30 = vsub.s32 %v5355_v7, %v7463_v52  ;;  %v762_v35 = vrot.slane %v7515_v23, %v7472_v56 }
 0x31b   :  { %v1605_v39 = vpop.f32.mrb[6].mxu1  ;;  %v6597_v40 = vpop.eup %6596  ;;  %v4959_v41 = vadd.f32 1.0, %v6595_v36  ;;  %v1535_v42 = vadd.f32 %v1534_v38, %v726_v31  ;;  %v770_v52 = vrot.slane %v7515_v23, %v7475_v1  ;;  %v774_v7 = vrot.slane %v7515_v23, %v7482_v4 }
 0x31c   :  { %v1606_v43 = vadd.f32 %v1605_v39, %v734_v32  ;;  %v1536_v44 = vpop.f32.mrb[7].mxu0  ;;  %v1607_v45 = vpop.f32.mrb[7].mxu1  ;;  %6608 = vrcp.f32 %v4957_v37  ;;  %v4958_v47 = vadd.f32 1.0, %v6597_v40  ;;  %v758_v32 = vrot.slane %v7515_v23, %v7466_v53 }
 0x31d   :  { %v6599_v46 = vpop.eup %6598  ;;  %v1537_v48 = vadd.f32 %v1536_v44, %v730_v33  ;;  %v1608_v49 = vadd.f32 %v1607_v45, %v738_v34  ;;  %6610 = vrcp.f32 %v4959_v41  ;;  %v6059_v55 = vmul.f32 -1.442695, %v1535_v42 }
 0x31e   :  { %v4960_v50 = vadd.f32 1.0, %v6599_v46  ;;  %v6061_v57 = vmul.f32 -1.442695, %v1606_v43  ;;  %6612 = vrcp.f32 %v4958_v47  ;;  %v766_v34 = vrot.slane %v7515_v23, %v7469_v54 }
 0x31f   :  { %v6060_v59 = vmul.f32 -1.442695, %v1537_v48  ;;  %v6062_v60 = vmul.f32 -1.442695, %v1608_v49 }
 0x320   :  { %6614 = vrcp.f32 %v4960_v50 }
 0x321   :  { %6616 = vpow2.f32 %v6059_v55  ;;  %v6601_v3 = vpop.eup %6600 }
 0x322   :  { %6618 = vpow2.f32 %v6061_v57  ;;  %v6603_v6 = vpop.eup %6602  ;;  %v4961_v10 = vadd.f32 1.0, %v6601_v3  ;;  %v1676_v11 = vpop.f32.mrb[8].mxu0 }
 0x323   :  { %6620 = vpow2.f32 %v6060_v59  ;;  %v1747_v12 = vpop.f32.mrb[8].mxu1  ;;  %v6605_v13 = vpop.eup %6604  ;;  %v4963_v14 = vadd.f32 1.0, %v6603_v6  ;;  %v1677_v15 = vadd.f32 %v1676_v11, %v742_v61 }
 0x324   :  { %6622 = vpow2.f32 %v6062_v60  ;;  %v1748_v16 = vadd.f32 %v1747_v12, %v750_v62  ;;  %v1678_v17 = vpop.f32.mrb[9].mxu0  ;;  %v1749_v18 = vpop.f32.mrb[9].mxu1  ;;  %v4962_v20 = vadd.f32 1.0, %v6605_v13  ;;  %v782_v13 = vrot.slane %v7515_v23, %v7485_v5 }
 0x325   :  { %v6607_v19 = vpop.eup %6606  ;;  %6624 = vrcp.f32 %v4961_v10  ;;  %v1679_v21 = vadd.f32 %v1678_v17, %v746_v0  ;;  %v1750_v22 = vadd.f32 %v1749_v18, %v754_v2  ;;  %v6063_v25 = vmul.f32 -1.442695, %v1677_v15  ;;  %v7535_v10 = vld [vmem:[#allocation13 + $0x18] sm:$0xff] }
 0x326   :  { %6626 = vrcp.f32 %v4963_v14  ;;  %v4964_v24 = vadd.f32 1.0, %v6607_v19  ;;  %v6065_v26 = vmul.f32 -1.442695, %v1748_v16  ;;  %v6609_v27 = vpop.eup %6608  ;;  %v778_v16 = vrot.slane %v7515_v23, %v7488_v8 }
 0x327   :  { %6628 = vrcp.f32 %v4962_v20  ;;  %v6064_v28 = vmul.f32 -1.442695, %v1679_v21  ;;  %v6611_v29 = vpop.eup %6610  ;;  %v6066_v31 = vmul.f32 -1.442695, %v1750_v22  ;;  %v786_v21 = vrot.slane %v7515_v23, %v7491_v9 }
 0x328   :  { %6630 = vrcp.f32 %v4964_v24  ;;  %v6613_v33 = vpop.eup %6612  ;;  %v790_v22 = vrot.slane %v7535_v10, %v7466_v53 }
 0x329   :  { %6632 = vpow2.f32 %v6063_v25  ;;  %v5349_v37 = vcombine.low %v6609_v27, %v6613_v33 }
 0x32a   :  { %v6615_v36 = vpop.eup %6614  ;;  %6634 = vpow2.f32 %v6065_v26  ;;  %v1818_v40 = vpop.f32.mrb[10].mxu0 }
 0x32b   :  { %v6617_v38 = vpop.eup %6616  ;;  %v5350_v39 = vcombine.low %v6611_v29, %v6615_v36  ;;  %6636 = vpow2.f32 %v6064_v28  ;;  %v1889_v41 = vpop.f32.mrb[10].mxu1  ;;  %v7529_v43 = vrot.slane %v5349_v37, %v7518_v30  ;;  %v1819_v45 = vadd.f32 %v1818_v40, %v758_v32 }
 0x32c   :  { %v6619_v42 = vpop.eup %6618  ;;  %v4965_v44 = vadd.f32 1.0, %v6617_v38  ;;  %6638 = vpow2.f32 %v6066_v31  ;;  %v1820_v46 = vpop.f32.mrb[11].mxu0  ;;  %v1890_v55 = vadd.f32 %v1889_v41, %v766_v34 }
 0x32d   :  { %v1891_v47 = vpop.f32.mrb[11].mxu1  ;;  %v6621_v48 = vpop.eup %6620  ;;  %v5366_v49 = vrot.slane %v5350_v39, %v7518_v30  ;;  %v4967_v50 = vadd.f32 1.0, %v6619_v42  ;;  %v1821_v57 = vadd.f32 %v1820_v46, %v762_v35  ;;  %v6067_v59 = vmul.f32 -1.442695, %v1819_v45 }
 0x32e   :  { %v6623_v63 = vpop.eup %6622  ;;  %6640 = vrcp.f32 %v4965_v44  ;;  %v4966_v58 = vadd.f32 1.0, %v6621_v48  ;;  %v1892_v60 = vadd.f32 %v1891_v47, %v770_v52  ;;  %v6069_v2 = vmul.f32 -1.442695, %v1890_v55 }
 0x32f   :  { %v6625_v61 = vpop.eup %6624  ;;  %v5381_v62 = vcombine.low %v7529_v43, %v5366_v49  ;;  %6642 = vrcp.f32 %v4967_v50  ;;  %v4968_v0 = vadd.f32 1.0, %v6623_v63  ;;  %v6068_v6 = vmul.f32 -1.442695, %v1821_v57 }
 0x330   :  { %v6627_v3 = vpop.eup %6626  ;;  %6644 = vrcp.f32 %v4966_v58  ;;  %v6070_v12 = vmul.f32 -1.442695, %v1892_v60  ;;  %v798_v43 = vrot.slane %v7535_v10, %v7469_v54  ;;  %v794_v47 = vrot.slane %v7535_v10, %v7472_v56 }
 0x331   :  { %v6629_v11 = vpop.eup %6628  ;;  %6646 = vrcp.f32 %v4968_v0  ;;  %v5389_v45 = vrot.slane %v5381_v62, %v7518_v30 }
 0x332   :  { %v6631_v14 = vpop.eup %6630  ;;  %v5351_v15 = vcombine.low %v6625_v61, %v6629_v11  ;;  %6648 = vpow2.f32 %v6067_v59  ;;  %v1960_v19 = vpop.f32.mrb[12].mxu0  ;;  %v802_v59 = vrot.slane %v7535_v10, %v7475_v1 }
 0x333   :  { %v6633_v17 = vpop.eup %6632  ;;  %v5352_v18 = vcombine.low %v6627_v3, %v6631_v14  ;;  %6650 = vpow2.f32 %v6069_v2  ;;  %v2031_v20 = vpop.f32.mrb[12].mxu1  ;;  %v1961_v27 = vadd.f32 %v1960_v19, %v774_v7 }
 0x334   :  { %v6635_v24 = vpop.eup %6634  ;;  %v5373_v25 = vrot.slane %v5351_v15, %v7518_v30  ;;  %v4969_v26 = vadd.f32 1.0, %v6633_v17  ;;  %6652 = vpow2.f32 %v6068_v6  ;;  %v1962_v28 = vpop.f32.mrb[13].mxu0  ;;  %v2032_v34 = vadd.f32 %v2031_v20, %v782_v13 }
 0x335   :  { %v2033_v29 = vpop.f32.mrb[13].mxu1  ;;  %v6637_v31 = vpop.eup %6636  ;;  %v5380_v32 = vrot.slane %v5352_v18, %v7518_v30  ;;  %v4971_v33 = vadd.f32 1.0, %v6635_v24  ;;  %6654 = vpow2.f32 %v6070_v12  ;;  %v6071_v36 = vmul.f32 -1.442695, %v1961_v27 }
 0x336   :  { %v6639_v35 = vpop.eup %6638  ;;  %6656 = vrcp.f32 %v4969_v26  ;;  %v4970_v23 = vadd.f32 1.0, %v6637_v31  ;;  %v1963_v37 = vadd.f32 %v1962_v28, %v778_v16  ;;  %v6073_v39 = vmul.f32 -1.442695, %v2032_v34 }
 0x337   :  { %v5382_v52 = vcombine.low %v5373_v25, %v5380_v32  ;;  %6658 = vrcp.f32 %v4971_v33  ;;  %v4972_v38 = vadd.f32 1.0, %v6639_v35  ;;  %v2034_v42 = vadd.f32 %v2033_v29, %v786_v21 }
 0x338   :  { %v6641_v40 = vpop.eup %6640  ;;  %6660 = vrcp.f32 %v4970_v23  ;;  %v6072_v41 = vmul.f32 -1.442695, %v1963_v37  ;;  %v806_v16 = vrot.slane %v7535_v10, %v7482_v4  ;;  %v814_v17 = vrot.slane %v7535_v10, %v7485_v5  ;;  %v7568_v37 = vld [vmem:[#allocation13 + $0x20] sm:$0xff] }
 0x339   :  { %v6643_v44 = vpop.eup %6642  ;;  %v5396_v46 = vrot.slane %v5382_v52, %v7518_v30  ;;  %6662 = vrcp.f32 %v4972_v38  ;;  %v6074_v49 = vmul.f32 -1.442695, %v2034_v42  ;;  %v810_v29 = vrot.slane %v7535_v10, %v7488_v8 }
 0x33a   :  { %v6645_v48 = vpop.eup %6644  ;;  %6664 = vpow2.f32 %v6071_v36  ;;  %v2102_v63 = vpop.f32.mrb[14].mxu0  ;;  %v818_v36 = vrot.slane %v7535_v10, %v7491_v9  ;;  %v822_v10 = vrot.slane %v7568_v37, %v7466_v53 }
 0x33b   :  { %v6647_v50 = vpop.eup %6646  ;;  %v5397_v55 = vcombine.low %v5389_v45, %v5396_v46  ;;  %v5398_v57 = vcombine.low %v6641_v40, %v6645_v48  ;;  %6666 = vpow2.f32 %v6073_v39  ;;  %v2173_v58 = vpop.f32.mrb[14].mxu1  ;;  %v2103_v62 = vadd.f32 %v2102_v63, %v790_v22 }
 0x33c   :  { %v6649_v60 = vpop.eup %6648  ;;  %v5399_v61 = vcombine.low %v6643_v44, %v6647_v50  ;;  %6668 = vpow2.f32 %v6072_v41  ;;  %v2174_v0 = vadd.f32 %v2173_v58, %v798_v43  ;;  %v2104_v2 = vpop.f32.mrb[15].mxu0 }
 0x33d   :  { %v2175_v3 = vpop.f32.mrb[15].mxu1  ;;  %v6651_v6 = vpop.eup %6650  ;;  %5965 = vst [vmem:[#allocation14] sm:$0xff] %v5397_v55  ;;  %v7556_v7 = vrot.slane %v5398_v57, %v7518_v30  ;;  %v4973_v11 = vadd.f32 1.0, %v6649_v60  ;;  %6670 = vpow2.f32 %v6074_v49  ;;  %v2105_v12 = vadd.f32 %v2104_v2, %v794_v47 }
 0x33e   :  { %v6653_v13 = vpop.eup %6652  ;;  %v5415_v14 = vrot.slane %v5399_v61, %v7518_v30  ;;  %v4975_v15 = vadd.f32 1.0, %v6651_v6  ;;  %v6075_v20 = vmul.f32 -1.442695, %v2103_v62  ;;  %v2176_v21 = vadd.f32 %v2175_v3, %v802_v59 }
 0x33f   :  { %v6655_v18 = vpop.eup %6654  ;;  %6672 = vrcp.f32 %v4973_v11  ;;  %v4974_v19 = vadd.f32 1.0, %v6653_v13  ;;  %v6077_v26 = vmul.f32 -1.442695, %v2174_v0  ;;  %v6076_v28 = vmul.f32 -1.442695, %v2105_v12 }
 0x340   :  { %v6657_v22 = vpop.eup %6656  ;;  %v5430_v24 = vcombine.low %v7556_v7, %v5415_v14  ;;  %6674 = vrcp.f32 %v4975_v15  ;;  %v4976_v25 = vadd.f32 1.0, %v6655_v18  ;;  %v6078_v32 = vmul.f32 -1.442695, %v2176_v21 }
 0x341   :  { %v6659_v27 = vpop.eup %6658  ;;  %6676 = vrcp.f32 %v4974_v19  ;;  %v830_v0 = vrot.slane %v7568_v37, %v7469_v54  ;;  %v826_v2 = vrot.slane %v7568_v37, %v7472_v56  ;;  %v834_v15 = vrot.slane %v7568_v37, %v7475_v1 }
 0x342   :  { %v6661_v31 = vpop.eup %6660  ;;  %6678 = vrcp.f32 %v4976_v25  ;;  %v2244_v35 = vpop.f32.mrb[16].mxu0  ;;  %v5438_v6 = vrot.slane %v5430_v24, %v7518_v30 }
 0x343   :  { %v6663_v33 = vpop.eup %6662  ;;  %v5400_v34 = vcombine.low %v6657_v22, %v6661_v31  ;;  %6680 = vpow2.f32 %v6075_v20  ;;  %v2315_v23 = vpop.f32.mrb[16].mxu1  ;;  %v2245_v39 = vadd.f32 %v2244_v35, %v806_v16  ;;  %v846_v35 = vrot.slane %v7568_v37, %v7485_v5 }
 0x344   :  { %v6665_v52 = vpop.eup %6664  ;;  %v5401_v38 = vcombine.low %v6659_v27, %v6663_v33  ;;  %6682 = vpow2.f32 %v6077_v26  ;;  %v2316_v40 = vadd.f32 %v2315_v23, %v814_v17  ;;  %v2246_v41 = vpop.f32.mrb[17].mxu0 }
 0x345   :  { %v2317_v42 = vpop.f32.mrb[17].mxu1  ;;  %v6667_v43 = vpop.eup %6666  ;;  %v5422_v44 = vrot.slane %v5400_v34, %v7518_v30  ;;  %v4977_v45 = vadd.f32 1.0, %v6665_v52  ;;  %6684 = vpow2.f32 %v6076_v28  ;;  %v2247_v46 = vadd.f32 %v2246_v41, %v810_v29 }
 0x346   :  { %v6669_v47 = vpop.eup %6668  ;;  %v5429_v48 = vrot.slane %v5401_v38, %v7518_v30  ;;  %v4979_v49 = vadd.f32 1.0, %v6667_v43  ;;  %6686 = vpow2.f32 %v6078_v32  ;;  %v6079_v57 = vmul.f32 -1.442695, %v2245_v39 }
 0x347   :  { %v6671_v50 = vpop.eup %6670  ;;  %6688 = vrcp.f32 %v4977_v45  ;;  %v4978_v55 = vadd.f32 1.0, %v6669_v47  ;;  %v6081_v63 = vmul.f32 -1.442695, %v2316_v40  ;;  %v2318_v60 = vadd.f32 %v2317_v42, %v818_v36 }
 0x348   :  { %v5431_v58 = vcombine.low %v5422_v44, %v5429_v48  ;;  %6690 = vrcp.f32 %v4979_v49  ;;  %v4980_v59 = vadd.f32 1.0, %v6671_v50  ;;  %v6080_v62 = vmul.f32 -1.442695, %v2247_v46  ;;  %v7593_v46 = vld [vmem:[#allocation13 + $0x28] sm:$0xff] }
 0x349   :  { %v6673_v61 = vpop.eup %6672  ;;  %6692 = vrcp.f32 %v4978_v55  ;;  %v6082_v11 = vmul.f32 -1.442695, %v2318_v60  ;;  %v838_v34 = vrot.slane %v7568_v37, %v7482_v4  ;;  %v842_v45 = vrot.slane %v7568_v37, %v7488_v8 }
 0x34a   :  { %v6675_v3 = vpop.eup %6674  ;;  %v5445_v7 = vrot.slane %v5431_v58, %v7518_v30  ;;  %6694 = vrcp.f32 %v4980_v59  ;;  %v2386_v13 = vpop.f32.mrb[18].mxu0  ;;  %v850_v50 = vrot.slane %v7568_v37, %v7491_v9 }
 0x34b   :  { %v6677_v12 = vpop.eup %6676  ;;  %6696 = vpow2.f32 %v6079_v57  ;;  %v2457_v14 = vpop.f32.mrb[18].mxu1  ;;  %v2387_v19 = vadd.f32 %v2386_v13, %v822_v10 }
 0x34c   :  { %v6679_v16 = vpop.eup %6678  ;;  %v5446_v17 = vcombine.low %v5438_v6, %v5445_v7  ;;  %v5447_v18 = vcombine.low %v6673_v61, %v6677_v12  ;;  %6698 = vpow2.f32 %v6081_v63  ;;  %v2388_v20 = vpop.f32.mrb[19].mxu0  ;;  %v2458_v25 = vadd.f32 %v2457_v14, %v830_v0 }
 0x34d   :  { %v2459_v21 = vpop.f32.mrb[19].mxu1  ;;  %v6681_v22 = vpop.eup %6680  ;;  %v5448_v24 = vcombine.low %v6675_v3, %v6679_v16  ;;  %6700 = vpow2.f32 %v6080_v62  ;;  %v2389_v29 = vadd.f32 %v2388_v20, %v826_v2  ;;  %v6083_v52 = vmul.f32 -1.442695, %v2387_v19 }
 0x34e   :  { %v6683_v26 = vpop.eup %6682  ;;  %5966 = vst [vmem:[#allocation14 + $0x8] sm:$0xff] %v5446_v17  ;;  %v7583_v27 = vrot.slane %v5447_v18, %v7518_v30  ;;  %v4981_v28 = vadd.f32 1.0, %v6681_v22  ;;  %6702 = vpow2.f32 %v6082_v11  ;;  %v2460_v38 = vadd.f32 %v2459_v21, %v834_v15 }
 0x34f   :  { %v6685_v31 = vpop.eup %6684  ;;  %v5464_v32 = vrot.slane %v5448_v24, %v7518_v30  ;;  %v4983_v33 = vadd.f32 1.0, %v6683_v26  ;;  %v6085_v42 = vmul.f32 -1.442695, %v2458_v25  ;;  %v6084_v44 = vmul.f32 -1.442695, %v2389_v29 }
 0x350   :  { %v6687_v23 = vpop.eup %6686  ;;  %6704 = vrcp.f32 %v4981_v28  ;;  %v4982_v36 = vadd.f32 1.0, %v6685_v31  ;;  %v6086_v48 = vmul.f32 -1.442695, %v2460_v38  ;;  %v854_v0 = vrot.slane %v7593_v46, %v7466_v53 }
 0x351   :  { %v6689_v39 = vpop.eup %6688  ;;  %v5479_v40 = vcombine.low %v7583_v27, %v5464_v32  ;;  %6706 = vrcp.f32 %v4983_v33  ;;  %v4984_v41 = vadd.f32 1.0, %v6687_v23  ;;  %v862_v17 = vrot.slane %v7593_v46, %v7469_v54 }
 0x352   :  { %v6691_v43 = vpop.eup %6690  ;;  %6708 = vrcp.f32 %v4982_v36  ;;  %v2528_v49 = vpop.f32.mrb[20].mxu0  ;;  %v858_v24 = vrot.slane %v7593_v46, %v7472_v56 }
 0x353   :  { %v6693_v47 = vpop.eup %6692  ;;  %6710 = vrcp.f32 %v4984_v41  ;;  %v2599_v10 = vpop.f32.mrb[20].mxu1  ;;  %v2529_v63 = vadd.f32 %v2528_v49, %v838_v34  ;;  %v5487_v26 = vrot.slane %v5479_v40, %v7518_v30 }
 0x354   :  { %v6695_v55 = vpop.eup %6694  ;;  %v5449_v57 = vcombine.low %v6689_v39, %v6693_v47  ;;  %6712 = vpow2.f32 %v6083_v52  ;;  %v2530_v58 = vpop.f32.mrb[21].mxu0  ;;  %v2600_v62 = vadd.f32 %v2599_v10, %v846_v35  ;;  %v866_v35 = vrot.slane %v7593_v46, %v7475_v1 }
 0x355   :  { %v2601_v59 = vpop.f32.mrb[21].mxu1  ;;  %v6697_v60 = vpop.eup %6696  ;;  %v5450_v61 = vcombine.low %v6691_v43, %v6695_v55  ;;  %6714 = vpow2.f32 %v6085_v42  ;;  %v2531_v7 = vadd.f32 %v2530_v58, %v842_v45  ;;  %v6087_v16 = vmul.f32 -1.442695, %v2529_v63 }
 0x356   :  { %v6699_v2 = vpop.eup %6698  ;;  %v5471_v3 = vrot.slane %v5449_v57, %v7518_v30  ;;  %v4985_v6 = vadd.f32 1.0, %v6697_v60  ;;  %6716 = vpow2.f32 %v6084_v44  ;;  %v2602_v13 = vadd.f32 %v2601_v59, %v850_v50 }
 0x357   :  { %v6701_v37 = vpop.eup %6700  ;;  %v5478_v11 = vrot.slane %v5450_v61, %v7518_v30  ;;  %v4987_v12 = vadd.f32 1.0, %v6699_v2  ;;  %6718 = vpow2.f32 %v6086_v48  ;;  %v6089_v20 = vmul.f32 -1.442695, %v2600_v62  ;;  %v7618_v2 = vld [vmem:[#allocation13 + $0x30] sm:$0xff] }
 0x358   :  { %v6703_v14 = vpop.eup %6702  ;;  %6720 = vrcp.f32 %v4985_v6  ;;  %v4986_v15 = vadd.f32 1.0, %v6701_v37  ;;  %v6088_v22 = vmul.f32 -1.442695, %v2531_v7  ;;  %v6090_v28 = vmul.f32 -1.442695, %v2602_v13 }
 0x359   :  { %v5480_v18 = vcombine.low %v5471_v3, %v5478_v11  ;;  %6722 = vrcp.f32 %v4987_v12  ;;  %v4988_v19 = vadd.f32 1.0, %v6703_v14  ;;  %v870_v48 = vrot.slane %v7593_v46, %v7482_v4 }
 0x35a   :  { %v6705_v21 = vpop.eup %6704  ;;  %6724 = vrcp.f32 %v4986_v15  ;;  %v2670_v29 = vpop.f32.mrb[22].mxu0  ;;  %v878_v59 = vrot.slane %v7593_v46, %v7485_v5  ;;  %v874_v11 = vrot.slane %v7593_v46, %v7488_v8  ;;  %v882_v15 = vrot.slane %v7593_v46, %v7491_v9 }
 0x35b   :  { %v6707_v25 = vpop.eup %6706  ;;  %v5494_v27 = vrot.slane %v5480_v18, %v7518_v30  ;;  %6726 = vrcp.f32 %v4988_v19  ;;  %v2741_v31 = vpop.f32.mrb[22].mxu1  ;;  %v2671_v33 = vadd.f32 %v2670_v29, %v854_v0  ;;  %v886_v19 = vrot.slane %v7618_v2, %v7466_v53 }
 0x35c   :  { %v6709_v32 = vpop.eup %6708  ;;  %6728 = vpow2.f32 %v6087_v16  ;;  %v2672_v34 = vpop.f32.mrb[23].mxu0  ;;  %v2742_v39 = vadd.f32 %v2741_v31, %v862_v17 }
 0x35d   :  { %v2743_v23 = vpop.f32.mrb[23].mxu1  ;;  %v6711_v36 = vpop.eup %6710  ;;  %v5495_v52 = vcombine.low %v5487_v26, %v5494_v27  ;;  %v5496_v38 = vcombine.low %v6705_v21, %v6709_v32  ;;  %6730 = vpow2.f32 %v6089_v20  ;;  %v6091_v42 = vmul.f32 -1.442695, %v2671_v33 }
 0x35e   :  { %v6713_v40 = vpop.eup %6712  ;;  %v5497_v41 = vcombine.low %v6707_v25, %v6711_v36  ;;  %6732 = vpow2.f32 %v6088_v22  ;;  %v2673_v43 = vadd.f32 %v2672_v34, %v858_v24  ;;  %v2744_v55 = vadd.f32 %v2743_v23, %v866_v35 }
 0x35f   :  { %v6715_v44 = vpop.eup %6714  ;;  %5967 = vst [vmem:[#allocation14 + $0x10] sm:$0xff] %v5495_v52  ;;  %v7610_v45 = vrot.slane %v5496_v38, %v7518_v30  ;;  %v4989_v47 = vadd.f32 1.0, %v6713_v40  ;;  %6734 = vpow2.f32 %v6090_v28  ;;  %v6093_v58 = vmul.f32 -1.442695, %v2742_v39 }
 0x360   :  { %v6717_v49 = vpop.eup %6716  ;;  %v5513_v10 = vrot.slane %v5497_v41, %v7518_v30  ;;  %v4991_v50 = vadd.f32 1.0, %v6715_v44  ;;  %6736 = vpow2.f32 %v6091_v42  ;;  %v6092_v0 = vmul.f32 -1.442695, %v2673_v43 }
 0x361   :  { %v6719_v57 = vpop.eup %6718  ;;  %6738 = vrcp.f32 %v4989_v47  ;;  %v4990_v63 = vadd.f32 1.0, %v6717_v49  ;;  %v6094_v6 = vmul.f32 -1.442695, %v2744_v55  ;;  %v894_v20 = vrot.slane %v7618_v2, %v7469_v54 }
 0x362   :  { %v6721_v60 = vpop.eup %6720  ;;  %v5528_v61 = vcombine.low %v7610_v45, %v5513_v10  ;;  %6740 = vrcp.f32 %v4991_v50  ;;  %v4992_v62 = vadd.f32 1.0, %v6719_v57  ;;  %v2812_v7 = vpop.f32.mrb[24].mxu0  ;;  %v890_v23 = vrot.slane %v7618_v2, %v7472_v56 }
 0x363   :  { %v6723_v3 = vpop.eup %6722  ;;  %6742 = vrcp.f32 %v4990_v63  ;;  %v2883_v37 = vpop.f32.mrb[24].mxu1  ;;  %v2813_v13 = vadd.f32 %v2812_v7, %v870_v48  ;;  %v898_v36 = vrot.slane %v7618_v2, %v7475_v1 }
 0x364   :  { %v6725_v12 = vpop.eup %6724  ;;  %6744 = vrcp.f32 %v4992_v62  ;;  %v2814_v14 = vpop.f32.mrb[25].mxu0  ;;  %v2884_v25 = vadd.f32 %v2883_v37, %v878_v59  ;;  %v5536_v42 = vrot.slane %v5528_v61, %v7518_v30  ;;  %v902_v59 = vrot.slane %v7618_v2, %v7482_v4 }
 0x365   :  { %v2885_v16 = vpop.f32.mrb[25].mxu1  ;;  %v6727_v17 = vpop.eup %6726  ;;  %v5498_v18 = vcombine.low %v6721_v60, %v6725_v12  ;;  %6746 = vpow2.f32 %v6093_v58  ;;  %v6095_v24 = vmul.f32 -1.442695, %v2813_v13  ;;  %v2815_v46 = vadd.f32 %v2814_v14, %v874_v11 }
 0x366   :  { %v6729_v21 = vpop.eup %6728  ;;  %v5499_v22 = vcombine.low %v6723_v3, %v6727_v17  ;;  %6748 = vpow2.f32 %v6092_v0  ;;  %v2886_v33 = vadd.f32 %v2885_v16, %v882_v15  ;;  %v6097_v40 = vmul.f32 -1.442695, %v2884_v25 }
 0x367   :  { %v6731_v26 = vpop.eup %6730  ;;  %v5520_v27 = vrot.slane %v5498_v18, %v7518_v30  ;;  %v4993_v28 = vadd.f32 1.0, %v6729_v21  ;;  %6750 = vpow2.f32 %v6094_v6  ;;  %v6096_v44 = vmul.f32 -1.442695, %v2815_v46 }
 0x368   :  { %v6733_v29 = vpop.eup %6732  ;;  %v5527_v31 = vrot.slane %v5499_v22, %v7518_v30  ;;  %v4995_v32 = vadd.f32 1.0, %v6731_v26  ;;  %6752 = vpow2.f32 %v6095_v24  ;;  %v6098_v10 = vmul.f32 -1.442695, %v2886_v33 }
 0x369   :  { %v6735_v34 = vpop.eup %6734  ;;  %6754 = vrcp.f32 %v4993_v28  ;;  %v4994_v35 = vadd.f32 1.0, %v6733_v29  ;;  %v910_v37 = vrot.slane %v7618_v2, %v7485_v5  ;;  %v906_v18 = vrot.slane %v7618_v2, %v7488_v8 }
 0x36a   :  { %v6737_v52 = vpop.eup %6736  ;;  %v5529_v38 = vcombine.low %v5520_v27, %v5527_v31  ;;  %6756 = vrcp.f32 %v4995_v32  ;;  %v4996_v39 = vadd.f32 1.0, %v6735_v34  ;;  %v2954_v45 = vpop.f32.mrb[26].mxu0  ;;  %v914_v22 = vrot.slane %v7618_v2, %v7491_v9  ;;  %v7652_v2 = vld [vmem:[#allocation13 + $0x38] sm:$0xff] }
 0x36b   :  { %v6739_v41 = vpop.eup %6738  ;;  %6758 = vrcp.f32 %v4994_v35  ;;  %v4997_v43 = vadd.f32 1.0, %v6737_v52  ;;  %v3025_v47 = vpop.f32.mrb[26].mxu1  ;;  %v2955_v50 = vadd.f32 %v2954_v45, %v886_v19 }
 0x36c   :  { %v6741_v48 = vpop.eup %6740  ;;  %v5543_v49 = vrot.slane %v5529_v38, %v7518_v30  ;;  %6760 = vrcp.f32 %v4996_v39  ;;  %v2956_v55 = vpop.f32.mrb[27].mxu0  ;;  %v3026_v58 = vadd.f32 %v3025_v47, %v894_v20  ;;  %v918_v47 = vrot.slane %v7652_v2, %v7466_v53 }
 0x36d   :  { %v3027_v57 = vpop.f32.mrb[27].mxu1  ;;  %v6743_v63 = vpop.eup %6742  ;;  %6762 = vrcp.f32 %v4997_v43  ;;  %v6099_v0 = vmul.f32 -1.442695, %v2955_v50  ;;  %v2957_v7 = vadd.f32 %v2956_v55, %v890_v23 }
 0x36e   :  { %v6745_v60 = vpop.eup %6744  ;;  %v5544_v61 = vcombine.low %v5536_v42, %v5543_v49  ;;  %v5545_v62 = vcombine.low %v6739_v41, %v6743_v63  ;;  %6764 = vpow2.f32 %v6097_v40  ;;  %v3028_v14 = vadd.f32 %v3027_v57, %v898_v36 }
 0x36f   :  { %v6747_v3 = vpop.eup %6746  ;;  %v5546_v6 = vcombine.low %v6741_v48, %v6745_v60  ;;  %6766 = vpow2.f32 %v6096_v44  ;;  %v6101_v21 = vmul.f32 -1.442695, %v3026_v58  ;;  %v6100_v27 = vmul.f32 -1.442695, %v2957_v7 }
 0x370   :  { %v6749_v11 = vpop.eup %6748  ;;  %5968 = vst [vmem:[#allocation14 + $0x18] sm:$0xff] %v5544_v61  ;;  %v7641_v12 = vrot.slane %v5545_v62, %v7518_v30  ;;  %v4999_v13 = vadd.f32 1.0, %v6747_v3  ;;  %6768 = vpow2.f32 %v6098_v10  ;;  %v6102_v31 = vmul.f32 -1.442695, %v3028_v14 }
 0x371   :  { %v6751_v15 = vpop.eup %6750  ;;  %v7644_v16 = vrot.slane %v5546_v6, %v7518_v30  ;;  %v4998_v17 = vadd.f32 1.0, %v6749_v11  ;;  %6770 = vpow2.f32 %v6099_v0  ;;  %v926_v48 = vrot.slane %v7652_v2, %v7469_v54 }
 0x372   :  { %v6753_v19 = vpop.eup %6752  ;;  %6772 = vrcp.f32 %v4999_v13  ;;  %v5000_v20 = vadd.f32 1.0, %v6751_v15  ;;  %v3096_v28 = vpop.f32.mrb[28].mxu0  ;;  %v922_v58 = vrot.slane %v7652_v2, %v7472_v56 }
 0x373   :  { %v6755_v24 = vpop.eup %6754  ;;  %v5577_v25 = vcombine.low %v7641_v12, %v7644_v16  ;;  %6774 = vrcp.f32 %v4998_v17  ;;  %v5001_v26 = vadd.f32 1.0, %v6753_v19  ;;  %v3167_v46 = vpop.f32.mrb[28].mxu1  ;;  %v3097_v32 = vadd.f32 %v3096_v28, %v902_v59 }
 0x374   :  { %v6757_v29 = vpop.eup %6756  ;;  %6776 = vrcp.f32 %v5000_v20  ;;  %v3168_v33 = vadd.f32 %v3167_v46, %v910_v37  ;;  %v3098_v34 = vpop.f32.mrb[29].mxu0  ;;  %v930_v17 = vrot.slane %v7652_v2, %v7475_v1 }
 0x375   :  { %v3169_v35 = vpop.f32.mrb[29].mxu1  ;;  %v6759_v23 = vpop.eup %6758  ;;  %6778 = vrcp.f32 %v5001_v26  ;;  %v3099_v36 = vadd.f32 %v3098_v34, %v906_v18  ;;  %v6103_v39 = vmul.f32 -1.442695, %v3097_v32  ;;  %v5585_v15 = vrot.slane %v5577_v25, %v7518_v30 }
 0x376   :  { %v6761_v52 = vpop.eup %6760  ;;  %v5547_v38 = vcombine.low %v6755_v24, %v6759_v23  ;;  %6780 = vpow2.f32 %v6101_v21  ;;  %v6105_v40 = vmul.f32 -1.442695, %v3168_v33  ;;  %v3170_v43 = vadd.f32 %v3169_v35, %v914_v22 }
 0x377   :  { %v6763_v41 = vpop.eup %6762  ;;  %v5548_v42 = vcombine.low %v6757_v29, %v6761_v52  ;;  %6782 = vpow2.f32 %v6100_v27  ;;  %v6104_v63 = vmul.f32 -1.442695, %v3099_v36  ;;  %v934_v25 = vrot.slane %v7652_v2, %v7482_v4 }
 0x378   :  { %v6765_v44 = vpop.eup %6764  ;;  %v5569_v45 = vrot.slane %v5547_v38, %v7518_v30  ;;  %6784 = vpow2.f32 %v6102_v31  ;;  %v6106_v62 = vmul.f32 -1.442695, %v3170_v43  ;;  %v942_v29 = vrot.slane %v7652_v2, %v7485_v5 }
 0x379   :  { %v6767_v49 = vpop.eup %6766  ;;  %v5576_v10 = vrot.slane %v5548_v42, %v7518_v30  ;;  %v5003_v50 = vadd.f32 1.0, %v6765_v44  ;;  %6786 = vpow2.f32 %v6103_v39  ;;  %v938_v36 = vrot.slane %v7652_v2, %v7488_v8 }
 0x37a   :  { %v6769_v55 = vpop.eup %6768  ;;  %v5002_v57 = vadd.f32 1.0, %v6767_v49  ;;  %6788 = vpow2.f32 %v6105_v40  ;;  %v3238_v0 = vpop.f32.mrb[30].mxu0  ;;  %v946_v52 = vrot.slane %v7652_v2, %v7491_v9 }
 0x37b   :  { %v6771_v59 = vpop.eup %6770  ;;  %v5578_v60 = vcombine.low %v5569_v45, %v5576_v10  ;;  %6790 = vrcp.f32 %v5003_v50  ;;  %v5004_v61 = vadd.f32 1.0, %v6769_v55  ;;  %v3309_v3 = vpop.f32.mrb[30].mxu1  ;;  %v3239_v37 = vadd.f32 %v3238_v0, %v918_v47 }
 0x37c   :  { %v6773_v6 = vpop.eup %6772  ;;  %6792 = vrcp.f32 %v5002_v57  ;;  %v5005_v7 = vadd.f32 1.0, %v6771_v59  ;;  %v3310_v11 = vadd.f32 %v3309_v3, %v926_v48  ;;  %v3240_v12 = vpop.f32.mrb[31].mxu0  ;;  %v7682_v57 = vld [vmem:[#allocation13 + $0x40] sm:$0xff] }
 0x37d   :  { %v3311_v13 = vpop.f32.mrb[31].mxu1  ;;  %v6775_v14 = vpop.eup %6774  ;;  %v5592_v16 = vrot.slane %v5578_v60, %v7518_v30  ;;  %6794 = vrcp.f32 %v5004_v61  ;;  %v6107_v20 = vmul.f32 -1.442695, %v3239_v37  ;;  %v3241_v27 = vadd.f32 %v3240_v12, %v922_v58 }
 0x37e   :  { %v6777_v18 = vpop.eup %6776  ;;  %v5594_v19 = vcombine.low %v6763_v41, %v6775_v14  ;;  %6796 = vrcp.f32 %v5005_v7  ;;  %v6109_v21 = vmul.f32 -1.442695, %v3310_v11  ;;  %v3312_v34 = vadd.f32 %v3311_v13, %v930_v17 }
 0x37f   :  { %v6779_v22 = vpop.eup %6778  ;;  %v5593_v24 = vcombine.low %v5585_v15, %v5592_v16  ;;  %v5595_v26 = vcombine.low %v6773_v6, %v6777_v18  ;;  %6798 = vpow2.f32 %v6104_v63  ;;  %v6108_v41 = vmul.f32 -1.442695, %v3241_v27 }
 0x380   :  { %v6781_v28 = vpop.eup %6780  ;;  %v7667_v46 = vrot.slane %v5594_v19, %v7518_v30  ;;  %6800 = vpow2.f32 %v6106_v62  ;;  %v6110_v2 = vmul.f32 -1.442695, %v3312_v34  ;;  %v950_v7 = vrot.slane %v7682_v57, %v7466_v53 }
 0x381   :  { %v6783_v31 = vpop.eup %6782  ;;  %5969 = vst [vmem:[#allocation14 + $0x20] sm:$0xff] %v5593_v24  ;;  %v7674_v32 = vrot.slane %v5595_v26, %v7518_v30  ;;  %v5007_v33 = vadd.f32 1.0, %v6781_v28  ;;  %6802 = vpow2.f32 %v6107_v20  ;;  %v958_v37 = vrot.slane %v7682_v57, %v7469_v54 }
 0x382   :  { %v6785_v35 = vpop.eup %6784  ;;  %v5006_v23 = vadd.f32 1.0, %v6783_v31  ;;  %6804 = vpow2.f32 %v6109_v21  ;;  %v3380_v42 = vpop.f32.mrb[32].mxu0  ;;  %v954_v13 = vrot.slane %v7682_v57, %v7472_v56  ;;  %v962_v14 = vrot.slane %v7682_v57, %v7475_v1 }
 0x383   :  { %v6787_v38 = vpop.eup %6786  ;;  %v5626_v39 = vcombine.low %v7667_v46, %v7674_v32  ;;  %6806 = vrcp.f32 %v5007_v33  ;;  %v5008_v40 = vadd.f32 1.0, %v6785_v35  ;;  %v3451_v43 = vpop.f32.mrb[32].mxu1  ;;  %v3381_v47 = vadd.f32 %v3380_v42, %v934_v25 }
 0x384   :  { %v6789_v44 = vpop.eup %6788  ;;  %6808 = vrcp.f32 %v5006_v23  ;;  %v5009_v45 = vadd.f32 1.0, %v6787_v38  ;;  %v3452_v48 = vadd.f32 %v3451_v43, %v942_v29  ;;  %v3382_v49 = vpop.f32.mrb[33].mxu0  ;;  %v966_v26 = vrot.slane %v7682_v57, %v7482_v4 }
 0x385   :  { %v3453_v10 = vpop.f32.mrb[33].mxu1  ;;  %v6791_v50 = vpop.eup %6790  ;;  %6810 = vrcp.f32 %v5008_v40  ;;  %v5011_v55 = vadd.f32 1.0, %v6789_v44  ;;  %v6111_v58 = vmul.f32 -1.442695, %v3381_v47  ;;  %v3383_v59 = vadd.f32 %v3382_v49, %v938_v36 }
 0x386   :  { %v6793_v63 = vpop.eup %6792  ;;  %6812 = vrcp.f32 %v5009_v45  ;;  %v6113_v62 = vmul.f32 -1.442695, %v3452_v48  ;;  %v3454_v0 = vadd.f32 %v3453_v10, %v946_v52  ;;  %v5634_v36 = vrot.slane %v5626_v39, %v7518_v30 }
 0x387   :  { %v6795_v60 = vpop.eup %6794  ;;  %v5596_v61 = vcombine.low %v6779_v22, %v6793_v63  ;;  %6814 = vrcp.f32 %v5011_v55  ;;  %v6112_v18 = vmul.f32 -1.442695, %v3383_v59  ;;  %v974_v39 = vrot.slane %v7682_v57, %v7485_v5 }
 0x388   :  { %v6797_v3 = vpop.eup %6796  ;;  %v5597_v6 = vcombine.low %v6791_v50, %v6795_v60  ;;  %6816 = vpow2.f32 %v6108_v41  ;;  %v6114_v21 = vmul.f32 -1.442695, %v3454_v0  ;;  %v970_v50 = vrot.slane %v7682_v57, %v7488_v8 }
 0x389   :  { %v6799_v11 = vpop.eup %6798  ;;  %v5618_v12 = vrot.slane %v5596_v61, %v7518_v30  ;;  %6818 = vpow2.f32 %v6110_v2 }
 0x38a   :  { %v6801_v15 = vpop.eup %6800  ;;  %v5625_v16 = vrot.slane %v5597_v6, %v7518_v30  ;;  %v5010_v17 = vadd.f32 1.0, %v6799_v11  ;;  %6820 = vpow2.f32 %v6111_v58  ;;  %v3522_v22 = vpop.f32.mrb[34].mxu0 }
 0x38b   :  { %v6803_v19 = vpop.eup %6802  ;;  %v5012_v20 = vadd.f32 1.0, %v6801_v15  ;;  %6822 = vpow2.f32 %v6113_v62  ;;  %v3593_v24 = vpop.f32.mrb[34].mxu1  ;;  %v3523_v25 = vadd.f32 %v3522_v22, %v950_v7  ;;  %v7704_v15 = vld [vmem:[#allocation13 + $0x48] sm:$0xff] }
 0x38c   :  { %v6805_v27 = vpop.eup %6804  ;;  %v5627_v28 = vcombine.low %v5618_v12, %v5625_v16  ;;  %6824 = vrcp.f32 %v5010_v17  ;;  %v5013_v46 = vadd.f32 1.0, %v6803_v19  ;;  %v3524_v29 = vpop.f32.mrb[35].mxu0  ;;  %v3594_v34 = vadd.f32 %v3593_v24, %v958_v37 }
 0x38d   :  { %v3595_v31 = vpop.f32.mrb[35].mxu1  ;;  %v6807_v32 = vpop.eup %6806  ;;  %6826 = vrcp.f32 %v5012_v20  ;;  %v5015_v33 = vadd.f32 1.0, %v6805_v27  ;;  %v3525_v35 = vadd.f32 %v3524_v29, %v954_v13  ;;  %v6115_v38 = vmul.f32 -1.442695, %v3523_v25 }
 0x38e   :  { %v6809_v23 = vpop.eup %6808  ;;  %v5641_v52 = vrot.slane %v5627_v28, %v7518_v30  ;;  %6828 = vrcp.f32 %v5013_v46  ;;  %v6117_v42 = vmul.f32 -1.442695, %v3594_v34  ;;  %v3596_v43 = vadd.f32 %v3595_v31, %v962_v14 }
 0x38f   :  { %v6811_v40 = vpop.eup %6810  ;;  %v5643_v41 = vcombine.low %v6797_v3, %v6809_v23  ;;  %6830 = vrcp.f32 %v5015_v33  ;;  %v6116_v48 = vmul.f32 -1.442695, %v3525_v35  ;;  %v978_v19 = vrot.slane %v7682_v57, %v7491_v9 }
 0x390   :  { %v6813_v44 = vpop.eup %6812  ;;  %v5642_v45 = vcombine.low %v5634_v36, %v5641_v52  ;;  %v5644_v47 = vcombine.low %v6807_v32, %v6811_v40  ;;  %6832 = vpow2.f32 %v6112_v18  ;;  %v6118_v59 = vmul.f32 -1.442695, %v3596_v43 }
 0x391   :  { %v6815_v49 = vpop.eup %6814  ;;  %v5653_v10 = vrot.slane %v5643_v41, %v7518_v30  ;;  %6834 = vpow2.f32 %v6114_v21  ;;  %v982_v28 = vrot.slane %v7704_v15, %v7466_v53  ;;  %v990_v29 = vrot.slane %v7704_v15, %v7469_v54 }
 0x392   :  { %v6817_v55 = vpop.eup %6816  ;;  %5970 = vst [vmem:[#allocation14 + $0x28] sm:$0xff] %v5642_v45  ;;  %v5660_v2 = vrot.slane %v5644_v47, %v7518_v30  ;;  %6836 = vpow2.f32 %v6115_v38  ;;  %v3664_v60 = vpop.f32.mrb[36].mxu0  ;;  %v986_v57 = vrot.slane %v7704_v15, %v7472_v56  ;;  %v994_v34 = vrot.slane %v7704_v15, %v7475_v1 }
 0x393   :  { %v6819_v63 = vpop.eup %6818  ;;  %v5014_v58 = vadd.f32 1.0, %v6817_v55  ;;  %6838 = vpow2.f32 %v6117_v42  ;;  %v3735_v61 = vpop.f32.mrb[36].mxu1  ;;  %v3665_v6 = vadd.f32 %v3664_v60, %v966_v26  ;;  %v998_v40 = vrot.slane %v7704_v15, %v7482_v4 }
 0x394   :  { %v6821_v62 = vpop.eup %6820  ;;  %v5675_v0 = vcombine.low %v5653_v10, %v5660_v2  ;;  %v5016_v3 = vadd.f32 1.0, %v6819_v63  ;;  %6840 = vpow2.f32 %v6116_v48  ;;  %v3666_v7 = vpop.f32.mrb[37].mxu0  ;;  %v3736_v13 = vadd.f32 %v3735_v61, %v974_v39 }
 0x395   :  { %v3737_v37 = vpop.f32.mrb[37].mxu1  ;;  %v6823_v11 = vpop.eup %6822  ;;  %6842 = vrcp.f32 %v5014_v58  ;;  %v5017_v12 = vadd.f32 1.0, %v6821_v62  ;;  %v3667_v14 = vadd.f32 %v3666_v7, %v970_v50  ;;  %v6119_v18 = vmul.f32 -1.442695, %v3665_v6 }
 0x396   :  { %v6825_v16 = vpop.eup %6824  ;;  %6844 = vrcp.f32 %v5016_v3  ;;  %v5019_v17 = vadd.f32 1.0, %v6823_v11  ;;  %v6121_v22 = vmul.f32 -1.442695, %v3736_v13  ;;  %v3738_v33 = vadd.f32 %v3737_v37, %v978_v19 }
 0x397   :  { %v6827_v20 = vpop.eup %6826  ;;  %v5645_v21 = vcombine.low %v6813_v44, %v6825_v16  ;;  %6846 = vrcp.f32 %v5017_v12  ;;  %v6120_v27 = vmul.f32 -1.442695, %v3667_v14  ;;  %v5683_v23 = vrot.slane %v5675_v0, %v7518_v30 }
 0x398   :  { %v6829_v24 = vpop.eup %6828  ;;  %v5646_v26 = vcombine.low %v6815_v49, %v6827_v20  ;;  %6848 = vrcp.f32 %v5019_v17  ;;  %v6122_v63 = vmul.f32 -1.442695, %v3738_v33  ;;  %v1006_v61 = vrot.slane %v7704_v15, %v7485_v5 }
 0x399   :  { %v6831_v46 = vpop.eup %6830  ;;  %v5667_v25 = vrot.slane %v5645_v21, %v7518_v30  ;;  %6850 = vpow2.f32 %v6118_v59  ;;  %v1002_v12 = vrot.slane %v7704_v15, %v7488_v8  ;;  %v1010_v21 = vrot.slane %v7704_v15, %v7491_v9 }
 0x39a   :  { %v6833_v31 = vpop.eup %6832  ;;  %v5674_v32 = vrot.slane %v5646_v26, %v7518_v30  ;;  %6852 = vpow2.f32 %v6119_v18  ;;  %v3806_v52 = vpop.f32.mrb[38].mxu0 }
 0x39b   :  { %v6835_v35 = vpop.eup %6834  ;;  %v5018_v36 = vadd.f32 1.0, %v6833_v31  ;;  %6854 = vpow2.f32 %v6121_v22  ;;  %v3877_v38 = vpop.f32.mrb[38].mxu1  ;;  %v3807_v44 = vadd.f32 %v3806_v52, %v982_v28  ;;  %v7734_v22 = vld [vmem:[#allocation13 + $0x50] sm:$0xff] }
 0x39c   :  { %v6837_v41 = vpop.eup %6836  ;;  %v5676_v42 = vcombine.low %v5667_v25, %v5674_v32  ;;  %v5020_v43 = vadd.f32 1.0, %v6835_v35  ;;  %6856 = vpow2.f32 %v6120_v27  ;;  %v3808_v45 = vpop.f32.mrb[39].mxu0  ;;  %v3878_v10 = vadd.f32 %v3877_v38, %v990_v29 }
 0x39d   :  { %v3879_v47 = vpop.f32.mrb[39].mxu1  ;;  %v6839_v48 = vpop.eup %6838  ;;  %6858 = vrcp.f32 %v5018_v36  ;;  %v5021_v49 = vadd.f32 1.0, %v6837_v41  ;;  %v3809_v39 = vadd.f32 %v3808_v45, %v986_v57  ;;  %v6123_v60 = vmul.f32 -1.442695, %v3807_v44 }
 0x39e   :  { %v6841_v50 = vpop.eup %6840  ;;  %v5690_v55 = vrot.slane %v5676_v42, %v7518_v30  ;;  %6860 = vrcp.f32 %v5020_v43  ;;  %v5023_v2 = vadd.f32 1.0, %v6839_v48  ;;  %v6125_v6 = vmul.f32 -1.442695, %v3878_v10 }
 0x39f   :  { %v6843_v58 = vpop.eup %6842  ;;  %6862 = vrcp.f32 %v5021_v49  ;;  %v5022_v59 = vadd.f32 1.0, %v6841_v50  ;;  %v6124_v11 = vmul.f32 -1.442695, %v3809_v39  ;;  %v3880_v16 = vadd.f32 %v3879_v47, %v994_v34 }
 0x3a0   :  { %v6845_v62 = vpop.eup %6844  ;;  %v5691_v0 = vcombine.low %v5683_v23, %v5690_v55  ;;  %v5692_v3 = vcombine.low %v6829_v24, %v6843_v58  ;;  %6864 = vrcp.f32 %v5023_v2  ;;  %v1014_v35 = vrot.slane %v7734_v22, %v7466_v53 }
 0x3a1   :  { %v6847_v7 = vpop.eup %6846  ;;  %v5693_v37 = vcombine.low %v6831_v46, %v6845_v62  ;;  %6866 = vrcp.f32 %v5022_v59  ;;  %v6126_v15 = vmul.f32 -1.442695, %v3880_v16  ;;  %v1022_v38 = vrot.slane %v7734_v22, %v7469_v54 }
 0x3a2   :  { %v6849_v13 = vpop.eup %6848  ;;  %5971 = vst [vmem:[#allocation14 + $0x30] sm:$0xff] %v5691_v0  ;;  %v7727_v14 = vrot.slane %v5692_v3, %v7518_v30  ;;  %6868 = vpow2.f32 %v6122_v63  ;;  %v3948_v19 = vpop.f32.mrb[40].mxu0  ;;  %v1018_v48 = vrot.slane %v7734_v22, %v7472_v56  ;;  %v1026_v50 = vrot.slane %v7734_v22, %v7475_v1 }
 0x3a3   :  { %v6851_v17 = vpop.eup %6850  ;;  %v7730_v18 = vrot.slane %v5693_v37, %v7518_v30  ;;  %6870 = vpow2.f32 %v6123_v60  ;;  %v4019_v20 = vpop.f32.mrb[40].mxu1  ;;  %v3949_v27 = vadd.f32 %v3948_v19, %v998_v40  ;;  %v1030_v59 = vrot.slane %v7734_v22, %v7482_v4 }
 0x3a4   :  { %v6853_v24 = vpop.eup %6852  ;;  %v5024_v26 = vadd.f32 1.0, %v6851_v17  ;;  %6872 = vpow2.f32 %v6125_v6  ;;  %v4020_v28 = vadd.f32 %v4019_v20, %v1006_v61  ;;  %v3950_v46 = vpop.f32.mrb[41].mxu0  ;;  %v1038_v60 = vrot.slane %v7734_v22, %v7485_v5 }
 0x3a5   :  { %v4021_v25 = vpop.f32.mrb[41].mxu1  ;;  %v6855_v29 = vpop.eup %6854  ;;  %v5724_v57 = vcombine.low %v7727_v14, %v7730_v18  ;;  %v5025_v31 = vadd.f32 1.0, %v6853_v24  ;;  %6874 = vpow2.f32 %v6124_v11  ;;  %v3951_v32 = vadd.f32 %v3950_v46, %v1002_v12 }
 0x3a6   :  { %v6857_v33 = vpop.eup %6856  ;;  %6876 = vrcp.f32 %v5024_v26  ;;  %v5027_v34 = vadd.f32 1.0, %v6855_v29  ;;  %v6127_v52 = vmul.f32 -1.442695, %v3949_v27  ;;  %v6129_v42 = vmul.f32 -1.442695, %v4020_v28 }
 0x3a7   :  { %v6859_v23 = vpop.eup %6858  ;;  %6878 = vrcp.f32 %v5025_v31  ;;  %v5026_v36 = vadd.f32 1.0, %v6857_v33  ;;  %v4022_v43 = vadd.f32 %v4021_v25, %v1010_v21  ;;  %v6128_v47 = vmul.f32 -1.442695, %v3951_v32 }
 0x3a8   :  { %v6861_v40 = vpop.eup %6860  ;;  %v5694_v41 = vcombine.low %v6847_v7, %v6859_v23  ;;  %6880 = vrcp.f32 %v5027_v34  ;;  %v5732_v16 = vrot.slane %v5724_v57, %v7518_v30  ;;  %v1034_v34 = vrot.slane %v7734_v22, %v7488_v8 }
 0x3a9   :  { %v6863_v44 = vpop.eup %6862  ;;  %v5695_v45 = vcombine.low %v6849_v13, %v6861_v40  ;;  %6882 = vrcp.f32 %v5026_v36  ;;  %v6130_v39 = vmul.f32 -1.442695, %v4022_v43 }
 0x3aa   :  { %v6865_v49 = vpop.eup %6864  ;;  %v5716_v10 = vrot.slane %v5694_v41, %v7518_v30  ;;  %6884 = vpow2.f32 %v6126_v15  ;;  %v4090_v63 = vpop.f32.mrb[42].mxu0 }
 0x3ab   :  { %v6867_v55 = vpop.eup %6866  ;;  %v5723_v2 = vrot.slane %v5695_v45, %v7518_v30  ;;  %6886 = vpow2.f32 %v6127_v52  ;;  %v4161_v58 = vpop.f32.mrb[42].mxu1  ;;  %v4091_v0 = vadd.f32 %v4090_v63, %v1014_v35 }
 0x3ac   :  { %v6869_v61 = vpop.eup %6868  ;;  %v5741_v62 = vcombine.low %v6863_v44, %v6867_v55  ;;  %6888 = vpow2.f32 %v6129_v42  ;;  %v4162_v3 = vadd.f32 %v4161_v58, %v1022_v38  ;;  %v4092_v6 = vpop.f32.mrb[43].mxu0  ;;  %v1042_v42 = vrot.slane %v7734_v22, %v7491_v9  ;;  %v7764_v44 = vld [vmem:[#allocation13 + $0x58] sm:$0xff] }
 0x3ad   :  { %v4163_v7 = vpop.f32.mrb[43].mxu1  ;;  %v6871_v37 = vpop.eup %6870  ;;  %v5725_v11 = vcombine.low %v5716_v10, %v5723_v2  ;;  %v5028_v12 = vadd.f32 1.0, %v6869_v61  ;;  %6890 = vpow2.f32 %v6128_v47  ;;  %v4093_v13 = vadd.f32 %v4092_v6, %v1018_v48 }
 0x3ae   :  { %v6873_v14 = vpop.eup %6872  ;;  %v7754_v17 = vrot.slane %v5741_v62, %v7518_v30  ;;  %v5029_v18 = vadd.f32 1.0, %v6871_v37  ;;  %6892 = vpow2.f32 %v6130_v39  ;;  %v6131_v24 = vmul.f32 -1.442695, %v4091_v0 }
 0x3af   :  { %v6875_v19 = vpop.eup %6874  ;;  %v5739_v20 = vrot.slane %v5725_v11, %v7518_v30  ;;  %6894 = vrcp.f32 %v5028_v12  ;;  %v5031_v21 = vadd.f32 1.0, %v6873_v14  ;;  %v6133_v28 = vmul.f32 -1.442695, %v4162_v3 }
 0x3b0   :  { %v6877_v26 = vpop.eup %6876  ;;  %6896 = vrcp.f32 %v5029_v18  ;;  %v5030_v27 = vadd.f32 1.0, %v6875_v19  ;;  %v4164_v46 = vadd.f32 %v4163_v7, %v1026_v50  ;;  %v6132_v57 = vmul.f32 -1.442695, %v4093_v13 }
 0x3b1   :  { %v6879_v25 = vpop.eup %6878  ;;  %v5740_v29 = vcombine.low %v5732_v16, %v5739_v20  ;;  %v5742_v31 = vcombine.low %v6865_v49, %v6877_v26  ;;  %6898 = vrcp.f32 %v5031_v21  ;;  %v1046_v22 = vrot.slane %v7764_v44, %v7466_v53 }
 0x3b2   :  { %v6881_v32 = vpop.eup %6880  ;;  %6900 = vrcp.f32 %v5030_v27  ;;  %v6134_v33 = vmul.f32 -1.442695, %v4164_v46  ;;  %v4232_v23 = vpop.f32.mrb[44].mxu0  ;;  %v1054_v63 = vrot.slane %v7764_v44, %v7469_v54  ;;  %v1050_v6 = vrot.slane %v7764_v44, %v7472_v56 }
 0x3b3   :  { %v6883_v15 = vpop.eup %6882  ;;  %5972 = vst [vmem:[#allocation14 + $0x38] sm:$0xff] %v5740_v29  ;;  %v7760_v35 = vrot.slane %v5742_v31, %v7518_v30  ;;  %6902 = vpow2.f32 %v6131_v24  ;;  %v4303_v36 = vpop.f32.mrb[44].mxu1  ;;  %v4233_v40 = vadd.f32 %v4232_v23, %v1030_v59  ;;  %v1062_v18 = vrot.slane %v7764_v44, %v7482_v4 }
 0x3b4   :  { %v6885_v52 = vpop.eup %6884  ;;  %v5743_v38 = vcombine.low %v6879_v25, %v6883_v15  ;;  %6904 = vpow2.f32 %v6133_v28  ;;  %v4234_v41 = vpop.f32.mrb[45].mxu0  ;;  %v4304_v49 = vadd.f32 %v4303_v36, %v1038_v60  ;;  %v1070_v27 = vrot.slane %v7764_v44, %v7485_v5 }
 0x3b5   :  { %v4305_v43 = vpop.f32.mrb[45].mxu1  ;;  %v6887_v45 = vpop.eup %6886  ;;  %v5773_v47 = vcombine.low %v7754_v17, %v7760_v35  ;;  %v5032_v48 = vadd.f32 1.0, %v6885_v52  ;;  %6906 = vpow2.f32 %v6132_v57  ;;  %v4235_v50 = vadd.f32 %v4234_v41, %v1034_v34 }
 0x3b6   :  { %v6889_v10 = vpop.eup %6888  ;;  %v5033_v39 = vadd.f32 1.0, %v6887_v45  ;;  %6908 = vpow2.f32 %v6134_v33  ;;  %v6135_v61 = vmul.f32 -1.442695, %v4233_v40  ;;  %v4306_v62 = vadd.f32 %v4305_v43, %v1042_v42 }
 0x3b7   :  { %v6891_v55 = vpop.eup %6890  ;;  %6910 = vrcp.f32 %v5032_v48  ;;  %v5035_v2 = vadd.f32 1.0, %v6889_v10  ;;  %v6137_v3 = vmul.f32 -1.442695, %v4304_v49  ;;  %v5765_v37 = vrot.slane %v5743_v38, %v7518_v30 }
 0x3b8   :  { %v6893_v58 = vpop.eup %6892  ;;  %6912 = vrcp.f32 %v5033_v39  ;;  %v5034_v59 = vadd.f32 1.0, %v6891_v55  ;;  %v6136_v12 = vmul.f32 -1.442695, %v4235_v50  ;;  %v6138_v54 = vmul.f32 -1.442695, %v4306_v62 }
 0x3b9   :  { %v6895_v0 = vpop.eup %6894  ;;  %6914 = vrcp.f32 %v5035_v2  ;;  %v5036_v60 = vadd.f32 1.0, %v6893_v58  ;;  %v1058_v17 = vrot.slane %v7764_v44, %v7475_v1  ;;  %v1066_v1 = vrot.slane %v7764_v44, %v7488_v8 }
 0x3ba   :  { %v6897_v7 = vpop.eup %6896  ;;  %v5744_v11 = vcombine.low %v6881_v32, %v6895_v0  ;;  %6916 = vrcp.f32 %v5034_v59  ;;  %v4374_v14 = vpop.f32.mrb[46].mxu0  ;;  %v5781_v33 = vrot.slane %v5773_v47, %v7518_v30  ;;  %v1074_v39 = vrot.slane %v7764_v44, %v7491_v9  ;;  %v677_v0 = vld [vmem:[#allocation13 + $0x60] sm:$0x3] }
 0x3bb   :  { %v6899_v13 = vpop.eup %6898  ;;  %6918 = vrcp.f32 %v5036_v60  ;;  %v4445_v16 = vpop.f32.mrb[46].mxu1  ;;  %v4375_v21 = vadd.f32 %v4374_v14, %v1046_v22  ;;  %v1078_v14 = vrot.slane %v677_v0, %v7466_v53 }
 0x3bc   :  { %v6901_v19 = vpop.eup %6900  ;;  %v5772_v20 = vrot.slane %v5744_v11, %v7518_v30  ;;  %6920 = vpow2.f32 %v6135_v61  ;;  %v4376_v24 = vpop.f32.mrb[47].mxu0  ;;  %v4446_v25 = vadd.f32 %v4445_v16, %v1054_v63 }
 0x3bd   :  { %v4447_v26 = vpop.f32.mrb[47].mxu1  ;;  %v6903_v28 = vpop.eup %6902  ;;  %v5790_v46 = vcombine.low %v6897_v7, %v6901_v19  ;;  %6922 = vpow2.f32 %v6137_v3  ;;  %v4377_v57 = vadd.f32 %v4376_v24, %v1050_v6  ;;  %v6139_v36 = vmul.f32 -1.442695, %v4375_v21 }
 0x3be   :  { %v6905_v29 = vpop.eup %6904  ;;  %v5774_v31 = vcombine.low %v5765_v37, %v5772_v20  ;;  %v5037_v4 = vadd.f32 1.0, %v6903_v28  ;;  %6924 = vpow2.f32 %v6136_v12  ;;  %v4448_v15 = vadd.f32 %v4447_v26, %v1058_v17 }
 0x3bf   :  { %v6907_v32 = vpop.eup %6906  ;;  %v5039_v34 = vadd.f32 1.0, %v6905_v29  ;;  %6926 = vpow2.f32 %v6138_v54  ;;  %v5800_v8 = vrot.slane %v5790_v46, %v7518_v30  ;;  %v6141_v40 = vmul.f32 -1.442695, %v4446_v25 }
 0x3c0   :  { %v6909_v35 = vpop.eup %6908  ;;  %v5788_v5 = vrot.slane %v5774_v31, %v7518_v30  ;;  %6928 = vrcp.f32 %v5037_v4  ;;  %v5038_v23 = vadd.f32 1.0, %v6907_v32  ;;  %v6140_v45 = vmul.f32 -1.442695, %v4377_v57 }
 0x3c1   :  { %v6911_v52 = vpop.eup %6910  ;;  %6930 = vrcp.f32 %v5039_v34  ;;  %v5040_v38 = vadd.f32 1.0, %v6909_v35  ;;  %v6142_v48 = vmul.f32 -1.442695, %v4448_v15  ;;  %v1082_v19 = vrot.slane %v677_v0, %v7472_v56 }
 0x3c2   :  { %v6913_v41 = vpop.eup %6912  ;;  %v5789_v42 = vcombine.low %v5781_v33, %v5788_v5  ;;  %v5791_v43 = vcombine.low %v6899_v13, %v6911_v52  ;;  %6932 = vrcp.f32 %v5038_v23  ;;  %v4516_v49 = vpop.f32.mrb[48].mxu0 }
 0x3c3   :  { %v6915_v47 = vpop.eup %6914  ;;  %6934 = vrcp.f32 %v5040_v38  ;;  %v4587_v10 = vpop.f32.mrb[48].mxu1  ;;  %v4517_v2 = vadd.f32 %v4516_v49, %v1062_v18 }
 0x3c4   :  { %v6917_v50 = vpop.eup %6916  ;;  %5973 = vst [vmem:[#allocation14 + $0x40] sm:$0xff] %v5789_v42  ;;  %v5807_v55 = vrot.slane %v5791_v43, %v7518_v30  ;;  %6936 = vpow2.f32 %v6139_v36  ;;  %v4518_v22 = vpop.f32.mrb[49].mxu0  ;;  %v4588_v61 = vadd.f32 %v4587_v10, %v1070_v27 }
 0x3c5   :  { %v4589_v63 = vpop.f32.mrb[49].mxu1  ;;  %v6919_v58 = vpop.eup %6918  ;;  %v5792_v59 = vcombine.low %v6913_v41, %v6917_v50  ;;  %6938 = vpow2.f32 %v6141_v40  ;;  %v4519_v62 = vadd.f32 %v4518_v22, %v1066_v1  ;;  %v6143_v7 = vmul.f32 -1.442695, %v4517_v2 }
 0x3c6   :  { %v6921_v60 = vpop.eup %6920  ;;  %v5822_v3 = vcombine.low %v5800_v8, %v5807_v55  ;;  %v5793_v6 = vcombine.low %v6915_v47, %v6919_v58  ;;  %6940 = vpow2.f32 %v6140_v45  ;;  %v4590_v11 = vadd.f32 %v4589_v63, %v1074_v39 }
 0x3c7   :  { %v6923_v9 = vpop.eup %6922  ;;  %v5814_v44 = vrot.slane %v5792_v59, %v7518_v30  ;;  %v5041_v37 = vadd.f32 1.0, %v6921_v60  ;;  %6942 = vpow2.f32 %v6142_v48  ;;  %v6145_v18 = vmul.f32 -1.442695, %v4588_v61 }
 0x3c8   :  { %v6925_v12 = vpop.eup %6924  ;;  %v5821_v13 = vrot.slane %v5793_v6, %v7518_v30  ;;  %v5043_v54 = vadd.f32 1.0, %v6923_v9  ;;  %6944 = vpow2.f32 %v6143_v7  ;;  %v6144_v26 = vmul.f32 -1.442695, %v4519_v62 }
 0x3c9   :  { %v6927_v16 = vpop.eup %6926  ;;  %6946 = vrcp.f32 %v5041_v37  ;;  %v5042_v17 = vadd.f32 1.0, %v6925_v12  ;;  %v6146_v28 = vmul.f32 -1.442695, %v4590_v11  ;;  %v5830_v1 = vrot.slane %v5822_v3, %v7518_v30 }
 0x3ca   :  { %v6929_v20 = vpop.eup %6928  ;;  %v5823_v21 = vcombine.low %v5814_v44, %v5821_v13  ;;  %6948 = vrcp.f32 %v5043_v54  ;;  %v5044_v24 = vadd.f32 1.0, %v6927_v16  ;;  %v4658_v46 = vpop.f32.mrb[50].mxu0 }
 0x3cb   :  { %v6931_v27 = vpop.eup %6930  ;;  %6950 = vrcp.f32 %v5042_v17  ;;  %v4659_v29 = vadd.f32 %v4658_v46, %v1078_v14  ;;  %v4660_v31 = vpop.f32.mrb[51].mxu0 }
 0x3cc   :  { %v6933_v25 = vpop.eup %6932  ;;  %v5837_v53 = vrot.slane %v5823_v21, %v7518_v30  ;;  %6952 = vrcp.f32 %v5044_v24  ;;  %v4661_v56 = vadd.f32 %v4660_v31, %v1082_v19 }
 0x3cd   :  { %v6935_v4 = vpop.eup %6934  ;;  %v5839_v57 = vcombine.low %v6929_v20, %v6933_v25  ;;  %6954 = vpow2.f32 %v6145_v18  ;;  %v6147_v15 = vmul.f32 -1.442695, %v4659_v29 }
 0x3ce   :  { %v6937_v32 = vpop.eup %6936  ;;  %v5838_v33 = vcombine.low %v5830_v1, %v5837_v53  ;;  %v5840_v34 = vcombine.low %v6931_v27, %v6935_v4  ;;  %6956 = vpow2.f32 %v6144_v26  ;;  %v6148_v45 = vmul.f32 -1.442695, %v4661_v56 }
 0x3cf   :  { %v6939_v35 = vpop.eup %6938  ;;  %v5849_v5 = vrot.slane %v5839_v57, %v7518_v30  ;;  %v5045_v23 = vadd.f32 1.0, %v6937_v32  ;;  %6958 = vpow2.f32 %v6146_v28 }
 0x3d0   :  { %v6941_v36 = vpop.eup %6940  ;;  %5974 = vst [vmem:[#allocation14 + $0x48] sm:$0xff] %v5838_v33  ;;  %v5856_v52 = vrot.slane %v5840_v34, %v7518_v30  ;;  %v5047_v8 = vadd.f32 1.0, %v6939_v35  ;;  %6960 = vpow2.f32 %v6147_v15 }
 0x3d1   :  { %v6943_v38 = vpop.eup %6942  ;;  %6962 = vrcp.f32 %v5045_v23  ;;  %v5046_v40 = vadd.f32 1.0, %v6941_v36 }
 0x3d2   :  { %v6945_v41 = vpop.eup %6944  ;;  %v5871_v42 = vcombine.low %v5849_v5, %v5856_v52  ;;  %6964 = vrcp.f32 %v5047_v8  ;;  %v5048_v43 = vadd.f32 1.0, %v6943_v38 }
 0x3d3   :  { %v6947_v47 = vpop.eup %6946  ;;  %6966 = vrcp.f32 %v5046_v40  ;;  %v5049_v10 = vadd.f32 1.0, %v6945_v41 }
 0x3d4   :  { %v6949_v48 = vpop.eup %6948  ;;  %6968 = vrcp.f32 %v5048_v43  ;;  %v5879_v44 = vrot.slane %v5871_v42, %v7518_v30 }
 0x3d5   :  { %v6951_v49 = vpop.eup %6950  ;;  %6970 = vpow2.f32 %v6148_v45 }
 0x3d6   :  { %v6953_v39 = vpop.eup %6952  ;;  %v5841_v50 = vcombine.low %v6947_v47, %v6951_v49  ;;  %6972 = vrcp.f32 %v5049_v10 }
 0x3d7   :  { %v6955_v55 = vpop.eup %6954  ;;  %v5842_v2 = vcombine.low %v6949_v48, %v6953_v39 }
 0x3d8   :  { %v6957_v22 = vpop.eup %6956  ;;  %v5863_v63 = vrot.slane %v5841_v50, %v7518_v30  ;;  %v5051_v58 = vadd.f32 1.0, %v6955_v55 }
 0x3d9   :  { %v6959_v59 = vpop.eup %6958  ;;  %v5870_v61 = vrot.slane %v5842_v2, %v7518_v30  ;;  %v5050_v62 = vadd.f32 1.0, %v6957_v22 }
 0x3da   :  { %v6961_v0 = vpop.eup %6960  ;;  %6974 = vrcp.f32 %v5051_v58  ;;  %v5052_v60 = vadd.f32 1.0, %v6959_v59 }
 0x3db   :  { %v6963_v3 = vpop.eup %6962  ;;  %v5872_v6 = vcombine.low %v5863_v63, %v5870_v61  ;;  %6976 = vrcp.f32 %v5050_v62  ;;  %v5053_v11 = vadd.f32 1.0, %v6961_v0 }
 0x3dc   :  { %v6965_v7 = vpop.eup %6964  ;;  %6978 = vrcp.f32 %v5052_v60 }
 0x3dd   :  { %v6967_v9 = vpop.eup %6966  ;;  %v5886_v37 = vrot.slane %v5872_v6, %v7518_v30  ;;  %6980 = vrcp.f32 %v5053_v11 }
 0x3de   :  { %v6969_v12 = vpop.eup %6968  ;;  %v5888_v13 = vcombine.low %v6963_v3, %v6967_v9 }
 0x3df   :  { %v5887_v54 = vcombine.low %v5879_v44, %v5886_v37  ;;  %v5889_v14 = vcombine.low %v6965_v7, %v6969_v12  ;;  %v6971_v16 = vpop.eup %6970 }
 0x3e0   :  { %v5898_v17 = vrot.slane %v5888_v13, %v7518_v30  ;;  %v5054_v19 = vadd.f32 1.0, %v6971_v16  ;;  %v6973_v20 = vpop.eup %6972 }
 0x3e1   :  { %5975 = vst [vmem:[#allocation14 + $0x50] sm:$0xff] %v5887_v54  ;;  %v5905_v18 = vrot.slane %v5889_v14, %v7518_v30 }
 0x3e2   :  { %6982 = vrcp.f32 %v5054_v19 }
 0x3e3   :  { %v5920_v21 = vcombine.low %v5898_v17, %v5905_v18 }
 0x3e4   :  { %v6975_v24 = vpop.eup %6974 }
 0x3e5   :  { %v6977_v26 = vpop.eup %6976  ;;  %v5928_v4 = vrot.slane %v5920_v21, %v7518_v30 }
 0x3e6   :  { %v6979_v27 = vpop.eup %6978  ;;  %v5890_v28 = vcombine.low %v6973_v20, %v6977_v26 }
 0x3e7   :  { %v5891_v46 = vcombine.low %v6975_v24, %v6979_v27  ;;  %v6981_v53 = vpop.eup %6980 }
 0x3e8   :  { %v5912_v25 = vrot.slane %v5890_v28, %v7518_v30 }
 0x3e9   :  { %v5919_v1 = vrot.slane %v5891_v46, %v7518_v30 }
 0x3eb   :  { %v5921_v29 = vcombine.low %v5912_v25, %v5919_v1 }
 0x3ec   :  { %v6983_v31 = vpop.eup %6982 }
 0x3ed   :  { %v5935_v57 = vrot.slane %v5921_v29, %v7518_v30  ;;  %v5937_v56 = vcombine.low %v6981_v53, %v6983_v31 }
 0x3ef   :  { %v5936_v32 = vcombine.low %v5928_v4, %v5935_v57  ;;  %v5944_v33 = vrot.slane %v5937_v56, %v7518_v30 }
 0x3f1   :  { %5976 = vst [vmem:[#allocation14 + $0x58] sm:$0xff] %v5936_v32  ;;  %v5951_v34 = vrot.slane %v5944_v33, %v7518_v30 }
 0x3f3   :  { %5981 = vst.msk [vmem:[#allocation14 + $0x60] sm:$0x3] %vm5979_vm3, %v5951_v34 }
 0x3f4   :  { %7149 = shalt.err (!%p7146_p4)
}
 0x3f5   :  { %s7150_s15 = scalar_lea.hbm %s7830_s7, 1568 }
 0x3f6   :  { %p7151_p5 = scmp.ne.s32.totalorder %s7830_s7, %s7150_s15  ;;  %p7154_p6 = scmp.lt.u32.totalorder %s7150_s15, %s7830_s7 }
 0x3f8   :  { %p7156_p7 = pnand %p7154_p6, %p7151_p5 }
 0x3fa   :  { %7159 = shalt.err (!%p7156_p7)
}
 0x3fb   :  { %5991 = dma.vmem_to_hbm [thread:$0]  %s5989_s3, 1568, %s7830_s7, [#allocation4]  }
 0x3fc   :  { %7168 = dma.done.wait [#allocation4], 1568  }
 0x3fd   :  { %7169 = vsyncadd [#allocation4], 4294965728 }
 0x3fe   :  { %5995 = vsyncpa [#allocation3], 1 }
 0x3ff   :  { %5996 = vsyncpa [#allocation6], 1 }
 0x400   :  { %5997 = vsyncpa [#allocation9], 1 }
 0x401   :  { %5998 = vsyncpa [#allocation12], 1 }
 0x402   :  { %5999 = vsyncpa [#allocation4], 1 }

</bundles_post_ra>
